<compile_context>
chip_gen: v7x
topology: tpu7x:2x2x1
jax: 0.10.0
libtpu: 0.0.40
codegen_flags: <defaults>
</compile_context>

<pallas_src>
import functools

import jax
import jax.numpy as jnp
from jax import lax
from jax.experimental import pallas as pl
from jax.experimental.pallas import tpu as pltpu


# ----------------------------- Pallas kernel -------------------------------

def decoder_recurrent_kernel(
    feats_ref,        # (B, N, E)  encoder features (resident in VMEM)
    emb_ref,          # (S, B, M)  time-major token embeddings (resident)
    h0_ref, c0_ref,   # (B, D)     initial LSTM state (computed in wrapper)
    uhs_ref,          # (B, N, A)  U(features) projection (computed in wrapper)
    Ww_ref, Wb_ref,   # (D, A), (1, A)
    Aw_ref, Ab_ref,   # (1, A), (1, 1)
    ihwe_ref, ihwc_ref,   # (M, 4D), (E, 4D)   W_ih split (embed / context)
    hhw_ref, bias_ref,    # (D, 4D), (1, 4D)   bias = ih_b + hh_b (pre-folded)
    hs_ref,           # (S, B, D)  OUT: hidden states, time-major
    alphas_ref,       # (S, B, N)  OUT: attention weights, time-major
):
    feats = feats_ref[...]                        # (B, N, E)
    uhs = uhs_ref[...]                            # (B, N, A)
    Ww = Ww_ref[...]
    Wb = Wb_ref[...]
    Aw = Aw_ref[...]
    Ab = Ab_ref[...]
    ihwe = ihwe_ref[...]
    ihwc = ihwc_ref[...]
    hhw = hhw_ref[...]
    bias = bias_ref[...]

    S = emb_ref.shape[0]
    D = h0_ref.shape[1]

    def step(s, carry):
        h, c = carry                              # (B, D), (B, D)

        # ----- Bahdanau attention -----
        w_ah = jnp.dot(h, Ww, preferred_element_type=jnp.float32) + Wb   # (B, A)
        comb = jnp.tanh(uhs + w_ah[:, None, :])                          # (B, N, A)
        scores = jnp.sum(comb * Aw[None, :, :], axis=-1) + Ab            # (B, N)
        scores = scores - jnp.max(scores, axis=1, keepdims=True)
        exp_s = jnp.exp(scores)
        denom = jnp.sum(exp_s, axis=1, keepdims=True)
        alpha = exp_s * pl.reciprocal(denom, approx=True)                # (B, N)
        context = jnp.sum(feats * alpha[:, :, None], axis=1)             # (B, E)

        # ----- LSTMCell (PyTorch gate order i, f, g, o) -----
        # cat(embed, context) @ W_ih^T is computed as two matmuls to avoid an
        # in-kernel lane concat.
        emb = emb_ref[s]                                                 # (B, M)
        gates = (jnp.dot(emb, ihwe, preferred_element_type=jnp.float32)
                 + jnp.dot(context, ihwc, preferred_element_type=jnp.float32)
                 + jnp.dot(h, hhw, preferred_element_type=jnp.float32)
                 + bias)                                                 # (B, 4D)
        i_g = jax.nn.sigmoid(gates[:, 0 * D:1 * D])
        f_g = jax.nn.sigmoid(gates[:, 1 * D:2 * D])
        g_g = jnp.tanh(gates[:, 2 * D:3 * D])
        o_g = jax.nn.sigmoid(gates[:, 3 * D:4 * D])
        c_new = f_g * c + i_g * g_g
        h_new = o_g * jnp.tanh(c_new)

        # TODO(synk): nn.Dropout omitted (eval-mode identity; no RNG to match).
        hs_ref[s] = h_new
        alphas_ref[s] = alpha
        return h_new, c_new

    # Short fixed trip count -> unroll for LLO scheduling visibility.
    lax.fori_loop(0, S, step, (h0_ref[...], c0_ref[...]), unroll=True)


# ------------------------------- wrapper ------------------------------------

def decoder_forward(params, features, captions):
    """Pallas version of DecoderRNN.forward. Returns (preds, alphas)."""
    B, N, E = features.shape
    T = captions.shape[1]
    S = T - 1
    D = params["inith_w"].shape[1]

    # ---- Step-invariant prologue hoisted out of the recurrent kernel ----
    embeds = jnp.take(params["embedding"], captions[:, :S], axis=0)   # (B, S, M)
    embeds_t = jnp.transpose(embeds, (1, 0, 2))                       # (S, B, M)
    mean_f = jnp.mean(features, axis=1)                               # (B, E)
    h0 = mean_f @ params["inith_w"] + params["inith_b"][0]            # (B, D)
    c0 = mean_f @ params["initc_w"] + params["initc_b"][0]            # (B, D)
    uhs = (jnp.einsum("bne,ea->bna", features, params["Uw"])
           + params["Ub"][0])                                         # (B, N, A)
    lstm_bias = params["ih_b"] + params["hh_b"]                       # (1, 4D)

    inputs = [
        features, embeds_t, h0, c0, uhs,
        params["Ww"], params["Wb"], params["Aw"], params["Ab"],
        params["ih_we"], params["ih_wc"], params["hh_w"], lstm_bias,
    ]

    vmem_spec = pl.BlockSpec(memory_space=pltpu.MemorySpace.VMEM)
    hs_t, alphas_t = pl.pallas_call(
        decoder_recurrent_kernel,
        out_shape=[
            jax.ShapeDtypeStruct((S, B, D), jnp.float32),
            jax.ShapeDtypeStruct((S, B, N), jnp.float32),
        ],
        in_specs=[vmem_spec] * len(inputs),
        out_specs=[vmem_spec, vmem_spec],
    )(*inputs)

    # ---- Vocab projection hoisted out: one batched MXU-friendly matmul ----
    preds = (jnp.einsum("sbd,dv->bsv", hs_t, params["fcn_w"])
             + params["fcn_b"][0])                                    # (B, S, V)
    alphas = jnp.transpose(alphas_t, (1, 0, 2))                       # (B, S, N)
    return preds, alphas


# --------------------------- pure-JAX reference ------------------------------

def decoder_forward_ref(params, features, captions):
    B, N, E = features.shape
    T = captions.shape[1]
    S = T - 1
    D = params["inith_w"].shape[1]

    embeds = jnp.take(params["embedding"], captions, axis=0)
    mean_f = features.mean(axis=1)
    h = mean_f @ params["inith_w"] + params["inith_b"][0]
    c = mean_f @ params["initc_w"] + params["initc_b"][0]
    uhs = (jnp.einsum("bne,ea->bna", features, params["Uw"])
           + params["Ub"][0][None, None, :])

    preds, alphas = [], []
    for s in range(S):
        w_ah = h @ params["Ww"] + params["Wb"][0]
        comb = jnp.tanh(uhs + w_ah[:, None, :])
        scores = (jnp.sum(comb * params["Aw"][0][None, None, :], axis=-1)
                  + params["Ab"][0, 0])
        alpha = jax.nn.softmax(scores, axis=1)
        context = jnp.sum(features * alpha[:, :, None], axis=1)
        emb = embeds[:, s]
        gates = (emb @ params["ih_we"] + context @ params["ih_wc"]
                 + params["ih_b"][0] + h @ params["hh_w"] + params["hh_b"][0])
        i_g = jax.nn.sigmoid(gates[:, 0 * D:1 * D])
        f_g = jax.nn.sigmoid(gates[:, 1 * D:2 * D])
        g_g = jnp.tanh(gates[:, 2 * D:3 * D])
        o_g = jax.nn.sigmoid(gates[:, 3 * D:4 * D])
        c = f_g * c + i_g * g_g
        h = o_g * jnp.tanh(c)
        preds.append(h @ params["fcn_w"] + params["fcn_b"][0])
        alphas.append(alpha)
    return jnp.stack(preds, axis=1), jnp.stack(alphas, axis=1)


# --------------------------------- main --------------------------------------

if __name__ == "__main__":
    # Small shapes consistent with the module's forward.
    B, N, E = 2, 16, 64          # batch, num_features, encoder_dim
    D, A, M = 32, 32, 32         # decoder_dim, attention_dim, embed_dim
    V, T = 128, 8                # vocab_size, caption length (seq_length = 7)

    key = jax.random.PRNGKey(0)
    ks = jax.random.split(key, 20)
    rnd = lambda k, shape: (0.05 * jax.random.normal(k, shape)).astype(jnp.float32)

    params = {
        "embedding": rnd(ks[0], (V, M)),
        # Attention: U (E->A), W (D->A), A (A->1); weights stored as (in, out)
        "Uw": rnd(ks[1], (E, A)), "Ub": rnd(ks[2], (1, A)),
        "Ww": rnd(ks[3], (D, A)), "Wb": rnd(ks[4], (1, A)),
        "Aw": rnd(ks[5], (1, A)), "Ab": rnd(ks[6], (1, 1)),
        # LSTMCell: W_ih (4D, M+E) split into embed / context parts, transposed
        "ih_we": rnd(ks[7], (M, 4 * D)),
        "ih_wc": rnd(ks[8], (E, 4 * D)),
        "ih_b": rnd(ks[9], (1, 4 * D)),
        "hh_w": rnd(ks[10], (D, 4 * D)),
        "hh_b": rnd(ks[11], (1, 4 * D)),
        # fcn (D -> V)
        "fcn_w": rnd(ks[12], (D, V)), "fcn_b": rnd(ks[13], (1, V)),
        # init_h / init_c (E -> D)
        "inith_w": rnd(ks[14], (E, D)), "inith_b": rnd(ks[15], (1, D)),
        "initc_w": rnd(ks[16], (E, D)), "initc_b": rnd(ks[17], (1, D)),
    }

    features = jax.random.normal(ks[18], (B, N, E), dtype=jnp.float32)
    captions = jax.random.randint(ks[19], (B, T), 0, V, dtype=jnp.int32)

    preds, alphas = jax.block_until_ready(
        jax.jit(functools.partial(decoder_forward, params))(features, captions))

    preds_ref, alphas_ref = decoder_forward_ref(params, features, captions)
    assert preds.shape == (B, T - 1, V) and alphas.shape == (B, T - 1, N)
    # Tolerances cover pl.reciprocal(approx=True) in the softmax denominator
    # (bf16-class relative error) plus f32 reordering differences.
    assert jnp.allclose(preds, preds_ref, atol=2e-3, rtol=1e-2)
    assert jnp.allclose(alphas, alphas_ref, atol=2e-3, rtol=1e-2)

    print("KERNEL_OK")
</pallas_src>

<mosaic_0001>
module attributes {stable_mosaic.version = 11 : i64} {
  func.func @decoder_recurrent_kernel(%arg0: memref<2x16x64xf32, #tpu.memory_space<vmem>>, %arg1: memref<7x2x32xf32, #tpu.memory_space<vmem>>, %arg2: memref<2x32xf32, #tpu.memory_space<vmem>>, %arg3: memref<2x32xf32, #tpu.memory_space<vmem>>, %arg4: memref<2x16x32xf32, #tpu.memory_space<vmem>>, %arg5: memref<32x32xf32, #tpu.memory_space<vmem>>, %arg6: memref<1x32xf32, #tpu.memory_space<vmem>>, %arg7: memref<1x32xf32, #tpu.memory_space<vmem>>, %arg8: memref<1x1xf32, #tpu.memory_space<vmem>>, %arg9: memref<32x128xf32, #tpu.memory_space<vmem>>, %arg10: memref<64x128xf32, #tpu.memory_space<vmem>>, %arg11: memref<32x128xf32, #tpu.memory_space<vmem>>, %arg12: memref<1x128xf32, #tpu.memory_space<vmem>>, %arg13: memref<7x2x32xf32, #tpu.memory_space<vmem>>, %arg14: memref<7x2x16xf32, #tpu.memory_space<vmem>>) attributes {dimension_semantics = [], scalar_prefetch = 0 : i64, scratch_operands = 0 : i64, tpu.core_type = #tpu.core_type<tc>} {
    %c0 = arith.constant 0 : index
    %c0_0 = arith.constant 0 : index
    %c0_1 = arith.constant 0 : index
    %0 = vector.load %arg0[%c0, %c0_0, %c0_1] : memref<2x16x64xf32, #tpu.memory_space<vmem>>, vector<2x16x64xf32>
    %c0_2 = arith.constant 0 : index
    %c0_3 = arith.constant 0 : index
    %c0_4 = arith.constant 0 : index
    %1 = vector.load %arg4[%c0_2, %c0_3, %c0_4] : memref<2x16x32xf32, #tpu.memory_space<vmem>>, vector<2x16x32xf32>
    %c0_5 = arith.constant 0 : index
    %c0_6 = arith.constant 0 : index
    %2 = vector.load %arg5[%c0_5, %c0_6] : memref<32x32xf32, #tpu.memory_space<vmem>>, vector<32x32xf32>
    %c0_7 = arith.constant 0 : index
    %c0_8 = arith.constant 0 : index
    %3 = vector.load %arg6[%c0_7, %c0_8] : memref<1x32xf32, #tpu.memory_space<vmem>>, vector<1x32xf32>
    %c0_9 = arith.constant 0 : index
    %c0_10 = arith.constant 0 : index
    %4 = vector.load %arg7[%c0_9, %c0_10] : memref<1x32xf32, #tpu.memory_space<vmem>>, vector<1x32xf32>
    %c0_11 = arith.constant 0 : index
    %c0_12 = arith.constant 0 : index
    %5 = vector.load %arg8[%c0_11, %c0_12] : memref<1x1xf32, #tpu.memory_space<vmem>>, vector<1x1xf32>
    %c0_13 = arith.constant 0 : index
    %c0_14 = arith.constant 0 : index
    %6 = vector.load %arg9[%c0_13, %c0_14] : memref<32x128xf32, #tpu.memory_space<vmem>>, vector<32x128xf32>
    %c0_15 = arith.constant 0 : index
    %c0_16 = arith.constant 0 : index
    %7 = vector.load %arg10[%c0_15, %c0_16] : memref<64x128xf32, #tpu.memory_space<vmem>>, vector<64x128xf32>
    %c0_17 = arith.constant 0 : index
    %c0_18 = arith.constant 0 : index
    %8 = vector.load %arg11[%c0_17, %c0_18] : memref<32x128xf32, #tpu.memory_space<vmem>>, vector<32x128xf32>
    %c0_19 = arith.constant 0 : index
    %c0_20 = arith.constant 0 : index
    %9 = vector.load %arg12[%c0_19, %c0_20] : memref<1x128xf32, #tpu.memory_space<vmem>>, vector<1x128xf32>
    %c0_21 = arith.constant 0 : index
    %c0_22 = arith.constant 0 : index
    %10 = vector.load %arg2[%c0_21, %c0_22] : memref<2x32xf32, #tpu.memory_space<vmem>>, vector<2x32xf32>
    %c0_23 = arith.constant 0 : index
    %c0_24 = arith.constant 0 : index
    %11 = vector.load %arg3[%c0_23, %c0_24] : memref<2x32xf32, #tpu.memory_space<vmem>>, vector<2x32xf32>
    %c0_i32 = arith.constant 0 : i32
    %cst = arith.constant dense<0.000000e+00> : vector<2x32xf32>
    %12 = tpu.matmul %10, %2, %cst {dimension_numbers = #tpu.dot_dimension_numbers<[1], [0], [0], [1], [0, 0, 1, 1], [], []>} : vector<2x32xf32>, vector<32x32xf32>, vector<2x32xf32> -> vector<2x32xf32>
    %13 = vector.broadcast %3 : vector<1x32xf32> to vector<2x32xf32>
    %14 = arith.addf %12, %13 : vector<2x32xf32>
    %15 = vector.shape_cast %14 : vector<2x32xf32> to vector<2x1x32xf32>
    %16 = vector.broadcast %15 : vector<2x1x32xf32> to vector<2x16x32xf32>
    %17 = arith.addf %1, %16 : vector<2x16x32xf32>
    %18 = math.tanh %17 : vector<2x16x32xf32>
    %19 = vector.shape_cast %4 : vector<1x32xf32> to vector<1x1x32xf32>
    %20 = vector.broadcast %19 : vector<1x1x32xf32> to vector<2x16x32xf32>
    %21 = arith.mulf %18, %20 : vector<2x16x32xf32>
    %cst_25 = arith.constant dense<0.000000e+00> : vector<2x16xf32>
    %22 = vector.multi_reduction <add>, %21, %cst_25 [2] : vector<2x16x32xf32> to vector<2x16xf32>
    %23 = vector.broadcast %5 : vector<1x1xf32> to vector<2x16xf32>
    %24 = arith.addf %22, %23 : vector<2x16xf32>
    %cst_26 = arith.constant dense<0xFF800000> : vector<2xf32>
    %25 = vector.multi_reduction <maximumf>, %24, %cst_26 [1] : vector<2x16xf32> to vector<2xf32>
    %26 = vector.shape_cast %25 : vector<2xf32> to vector<2x1xf32>
    %27 = vector.broadcast %26 : vector<2x1xf32> to vector<2x16xf32>
    %28 = arith.subf %24, %27 : vector<2x16xf32>
    %29 = math.exp %28 : vector<2x16xf32>
    %cst_27 = arith.constant dense<0.000000e+00> : vector<2xf32>
    %30 = vector.multi_reduction <add>, %29, %cst_27 [1] : vector<2x16xf32> to vector<2xf32>
    %31 = vector.shape_cast %30 : vector<2xf32> to vector<2x1xf32>
    %32 = tpu.reciprocal %31 {approx = true} : vector<2x1xf32> -> vector<2x1xf32>
    %33 = vector.broadcast %32 : vector<2x1xf32> to vector<2x16xf32>
    %34 = arith.mulf %29, %33 : vector<2x16xf32>
    %35 = vector.shape_cast %34 : vector<2x16xf32> to vector<2x16x1xf32>
    %36 = vector.broadcast %35 : vector<2x16x1xf32> to vector<2x16x64xf32>
    %37 = arith.mulf %0, %36 : vector<2x16x64xf32>
    %cst_28 = arith.constant dense<0.000000e+00> : vector<2x64xf32>
    %38 = vector.multi_reduction <add>, %37, %cst_28 [1] : vector<2x16x64xf32> to vector<2x64xf32>
    %39 = arith.index_cast %c0_i32 : i32 to index
    %c0_29 = arith.constant 0 : index
    %c0_30 = arith.constant 0 : index
    %40 = vector.load %arg1[%39, %c0_29, %c0_30] : memref<7x2x32xf32, #tpu.memory_space<vmem>>, vector<1x2x32xf32>
    %41 = vector.shape_cast %40 : vector<1x2x32xf32> to vector<2x32xf32>
    %cst_31 = arith.constant dense<0.000000e+00> : vector<2x128xf32>
    %42 = tpu.matmul %41, %6, %cst_31 {dimension_numbers = #tpu.dot_dimension_numbers<[1], [0], [0], [1], [0, 0, 1, 1], [], []>} : vector<2x32xf32>, vector<32x128xf32>, vector<2x128xf32> -> vector<2x128xf32>
    %cst_32 = arith.constant dense<0.000000e+00> : vector<2x128xf32>
    %43 = tpu.matmul %38, %7, %cst_32 {dimension_numbers = #tpu.dot_dimension_numbers<[1], [0], [0], [1], [0, 0, 1, 1], [], []>} : vector<2x64xf32>, vector<64x128xf32>, vector<2x128xf32> -> vector<2x128xf32>
    %44 = arith.addf %42, %43 : vector<2x128xf32>
    %cst_33 = arith.constant dense<0.000000e+00> : vector<2x128xf32>
    %45 = tpu.matmul %10, %8, %cst_33 {dimension_numbers = #tpu.dot_dimension_numbers<[1], [0], [0], [1], [0, 0, 1, 1], [], []>} : vector<2x32xf32>, vector<32x128xf32>, vector<2x128xf32> -> vector<2x128xf32>
    %46 = arith.addf %44, %45 : vector<2x128xf32>
    %47 = vector.broadcast %9 : vector<1x128xf32> to vector<2x128xf32>
    %48 = arith.addf %46, %47 : vector<2x128xf32>
    %49 = vector.extract_strided_slice %48 {offsets = [0, 0], sizes = [2, 32], strides = [1, 1]} : vector<2x128xf32> to vector<2x32xf32>
    %50 = arith.negf %49 : vector<2x32xf32>
    %51 = math.exp %50 : vector<2x32xf32>
    %cst_34 = arith.constant 1.000000e+00 : f32
    %52 = vector.broadcast %cst_34 : f32 to vector<2x32xf32>
    %53 = arith.addf %52, %51 : vector<2x32xf32>
    %54 = arith.divf %52, %53 : vector<2x32xf32>
    %55 = vector.extract_strided_slice %48 {offsets = [0, 32], sizes = [2, 32], strides = [1, 1]} : vector<2x128xf32> to vector<2x32xf32>
    %56 = arith.negf %55 : vector<2x32xf32>
    %57 = math.exp %56 : vector<2x32xf32>
    %cst_35 = arith.constant 1.000000e+00 : f32
    %58 = vector.broadcast %cst_35 : f32 to vector<2x32xf32>
    %59 = arith.addf %58, %57 : vector<2x32xf32>
    %60 = arith.divf %58, %59 : vector<2x32xf32>
    %61 = vector.extract_strided_slice %48 {offsets = [0, 64], sizes = [2, 32], strides = [1, 1]} : vector<2x128xf32> to vector<2x32xf32>
    %62 = math.tanh %61 : vector<2x32xf32>
    %63 = vector.extract_strided_slice %48 {offsets = [0, 96], sizes = [2, 32], strides = [1, 1]} : vector<2x128xf32> to vector<2x32xf32>
    %64 = arith.negf %63 : vector<2x32xf32>
    %65 = math.exp %64 : vector<2x32xf32>
    %cst_36 = arith.constant 1.000000e+00 : f32
    %66 = vector.broadcast %cst_36 : f32 to vector<2x32xf32>
    %67 = arith.addf %66, %65 : vector<2x32xf32>
    %68 = arith.divf %66, %67 : vector<2x32xf32>
    %69 = arith.mulf %60, %11 : vector<2x32xf32>
    %70 = arith.mulf %54, %62 : vector<2x32xf32>
    %71 = arith.addf %69, %70 : vector<2x32xf32>
    %72 = math.tanh %71 : vector<2x32xf32>
    %73 = arith.mulf %68, %72 : vector<2x32xf32>
    %74 = arith.index_cast %c0_i32 : i32 to index
    %c0_37 = arith.constant 0 : index
    %c0_38 = arith.constant 0 : index
    %75 = vector.load %arg13[%74, %c0_37, %c0_38] : memref<7x2x32xf32, #tpu.memory_space<vmem>>, vector<1x2x32xf32>
    %76 = vector.shape_cast %75 : vector<1x2x32xf32> to vector<2x32xf32>
    %77 = vector.shape_cast %73 : vector<2x32xf32> to vector<1x2x32xf32>
    tpu.vector_store %arg13[%74, %c0_37, %c0_38], %77 {strides = array<i32>} : memref<7x2x32xf32, #tpu.memory_space<vmem>>, vector<1x2x32xf32>,
    %78 = arith.index_cast %c0_i32 : i32 to index
    %c0_39 = arith.constant 0 : index
    %c0_40 = arith.constant 0 : index
    %79 = vector.load %arg14[%78, %c0_39, %c0_40] : memref<7x2x16xf32, #tpu.memory_space<vmem>>, vector<1x2x16xf32>
    %80 = vector.shape_cast %79 : vector<1x2x16xf32> to vector<2x16xf32>
    %81 = vector.shape_cast %34 : vector<2x16xf32> to vector<1x2x16xf32>
    tpu.vector_store %arg14[%78, %c0_39, %c0_40], %81 {strides = array<i32>} : memref<7x2x16xf32, #tpu.memory_space<vmem>>, vector<1x2x16xf32>,
    %c1_i32 = arith.constant 1 : i32
    %cst_41 = arith.constant dense<0.000000e+00> : vector<2x32xf32>
    %82 = tpu.matmul %73, %2, %cst_41 {dimension_numbers = #tpu.dot_dimension_numbers<[1], [0], [0], [1], [0, 0, 1, 1], [], []>} : vector<2x32xf32>, vector<32x32xf32>, vector<2x32xf32> -> vector<2x32xf32>
    %83 = vector.broadcast %3 : vector<1x32xf32> to vector<2x32xf32>
    %84 = arith.addf %82, %83 : vector<2x32xf32>
    %85 = vector.shape_cast %84 : vector<2x32xf32> to vector<2x1x32xf32>
    %86 = vector.broadcast %85 : vector<2x1x32xf32> to vector<2x16x32xf32>
    %87 = arith.addf %1, %86 : vector<2x16x32xf32>
    %88 = math.tanh %87 : vector<2x16x32xf32>
    %89 = vector.shape_cast %4 : vector<1x32xf32> to vector<1x1x32xf32>
    %90 = vector.broadcast %89 : vector<1x1x32xf32> to vector<2x16x32xf32>
    %91 = arith.mulf %88, %90 : vector<2x16x32xf32>
    %cst_42 = arith.constant dense<0.000000e+00> : vector<2x16xf32>
    %92 = vector.multi_reduction <add>, %91, %cst_42 [2] : vector<2x16x32xf32> to vector<2x16xf32>
    %93 = vector.broadcast %5 : vector<1x1xf32> to vector<2x16xf32>
    %94 = arith.addf %92, %93 : vector<2x16xf32>
    %cst_43 = arith.constant dense<0xFF800000> : vector<2xf32>
    %95 = vector.multi_reduction <maximumf>, %94, %cst_43 [1] : vector<2x16xf32> to vector<2xf32>
    %96 = vector.shape_cast %95 : vector<2xf32> to vector<2x1xf32>
    %97 = vector.broadcast %96 : vector<2x1xf32> to vector<2x16xf32>
    %98 = arith.subf %94, %97 : vector<2x16xf32>
    %99 = math.exp %98 : vector<2x16xf32>
    %cst_44 = arith.constant dense<0.000000e+00> : vector<2xf32>
    %100 = vector.multi_reduction <add>, %99, %cst_44 [1] : vector<2x16xf32> to vector<2xf32>
    %101 = vector.shape_cast %100 : vector<2xf32> to vector<2x1xf32>
    %102 = tpu.reciprocal %101 {approx = true} : vector<2x1xf32> -> vector<2x1xf32>
    %103 = vector.broadcast %102 : vector<2x1xf32> to vector<2x16xf32>
    %104 = arith.mulf %99, %103 : vector<2x16xf32>
    %105 = vector.shape_cast %104 : vector<2x16xf32> to vector<2x16x1xf32>
    %106 = vector.broadcast %105 : vector<2x16x1xf32> to vector<2x16x64xf32>
    %107 = arith.mulf %0, %106 : vector<2x16x64xf32>
    %cst_45 = arith.constant dense<0.000000e+00> : vector<2x64xf32>
    %108 = vector.multi_reduction <add>, %107, %cst_45 [1] : vector<2x16x64xf32> to vector<2x64xf32>
    %109 = arith.index_cast %c1_i32 : i32 to index
    %c0_46 = arith.constant 0 : index
    %c0_47 = arith.constant 0 : index
    %110 = vector.load %arg1[%109, %c0_46, %c0_47] : memref<7x2x32xf32, #tpu.memory_space<vmem>>, vector<1x2x32xf32>
    %111 = vector.shape_cast %110 : vector<1x2x32xf32> to vector<2x32xf32>
    %cst_48 = arith.constant dense<0.000000e+00> : vector<2x128xf32>
    %112 = tpu.matmul %111, %6, %cst_48 {dimension_numbers = #tpu.dot_dimension_numbers<[1], [0], [0], [1], [0, 0, 1, 1], [], []>} : vector<2x32xf32>, vector<32x128xf32>, vector<2x128xf32> -> vector<2x128xf32>
    %cst_49 = arith.constant dense<0.000000e+00> : vector<2x128xf32>
    %113 = tpu.matmul %108, %7, %cst_49 {dimension_numbers = #tpu.dot_dimension_numbers<[1], [0], [0], [1], [0, 0, 1, 1], [], []>} : vector<2x64xf32>, vector<64x128xf32>, vector<2x128xf32> -> vector<2x128xf32>
    %114 = arith.addf %112, %113 : vector<2x128xf32>
    %cst_50 = arith.constant dense<0.000000e+00> : vector<2x128xf32>
    %115 = tpu.matmul %73, %8, %cst_50 {dimension_numbers = #tpu.dot_dimension_numbers<[1], [0], [0], [1], [0, 0, 1, 1], [], []>} : vector<2x32xf32>, vector<32x128xf32>, vector<2x128xf32> -> vector<2x128xf32>
    %116 = arith.addf %114, %115 : vector<2x128xf32>
    %117 = vector.broadcast %9 : vector<1x128xf32> to vector<2x128xf32>
    %118 = arith.addf %116, %117 : vector<2x128xf32>
    %119 = vector.extract_strided_slice %118 {offsets = [0, 0], sizes = [2, 32], strides = [1, 1]} : vector<2x128xf32> to vector<2x32xf32>
    %120 = arith.negf %119 : vector<2x32xf32>
    %121 = math.exp %120 : vector<2x32xf32>
    %cst_51 = arith.constant 1.000000e+00 : f32
    %122 = vector.broadcast %cst_51 : f32 to vector<2x32xf32>
    %123 = arith.addf %122, %121 : vector<2x32xf32>
    %124 = arith.divf %122, %123 : vector<2x32xf32>
    %125 = vector.extract_strided_slice %118 {offsets = [0, 32], sizes = [2, 32], strides = [1, 1]} : vector<2x128xf32> to vector<2x32xf32>
    %126 = arith.negf %125 : vector<2x32xf32>
    %127 = math.exp %126 : vector<2x32xf32>
    %cst_52 = arith.constant 1.000000e+00 : f32
    %128 = vector.broadcast %cst_52 : f32 to vector<2x32xf32>
    %129 = arith.addf %128, %127 : vector<2x32xf32>
    %130 = arith.divf %128, %129 : vector<2x32xf32>
    %131 = vector.extract_strided_slice %118 {offsets = [0, 64], sizes = [2, 32], strides = [1, 1]} : vector<2x128xf32> to vector<2x32xf32>
    %132 = math.tanh %131 : vector<2x32xf32>
    %133 = vector.extract_strided_slice %118 {offsets = [0, 96], sizes = [2, 32], strides = [1, 1]} : vector<2x128xf32> to vector<2x32xf32>
    %134 = arith.negf %133 : vector<2x32xf32>
    %135 = math.exp %134 : vector<2x32xf32>
    %cst_53 = arith.constant 1.000000e+00 : f32
    %136 = vector.broadcast %cst_53 : f32 to vector<2x32xf32>
    %137 = arith.addf %136, %135 : vector<2x32xf32>
    %138 = arith.divf %136, %137 : vector<2x32xf32>
    %139 = arith.mulf %130, %71 : vector<2x32xf32>
    %140 = arith.mulf %124, %132 : vector<2x32xf32>
    %141 = arith.addf %139, %140 : vector<2x32xf32>
    %142 = math.tanh %141 : vector<2x32xf32>
    %143 = arith.mulf %138, %142 : vector<2x32xf32>
    %144 = arith.index_cast %c1_i32 : i32 to index
    %c0_54 = arith.constant 0 : index
    %c0_55 = arith.constant 0 : index
    %145 = vector.load %arg13[%144, %c0_54, %c0_55] : memref<7x2x32xf32, #tpu.memory_space<vmem>>, vector<1x2x32xf32>
    %146 = vector.shape_cast %145 : vector<1x2x32xf32> to vector<2x32xf32>
    %147 = vector.shape_cast %143 : vector<2x32xf32> to vector<1x2x32xf32>
    tpu.vector_store %arg13[%144, %c0_54, %c0_55], %147 {strides = array<i32>} : memref<7x2x32xf32, #tpu.memory_space<vmem>>, vector<1x2x32xf32>,
    %148 = arith.index_cast %c1_i32 : i32 to index
    %c0_56 = arith.constant 0 : index
    %c0_57 = arith.constant 0 : index
    %149 = vector.load %arg14[%148, %c0_56, %c0_57] : memref<7x2x16xf32, #tpu.memory_space<vmem>>, vector<1x2x16xf32>
    %150 = vector.shape_cast %149 : vector<1x2x16xf32> to vector<2x16xf32>
    %151 = vector.shape_cast %104 : vector<2x16xf32> to vector<1x2x16xf32>
    tpu.vector_store %arg14[%148, %c0_56, %c0_57], %151 {strides = array<i32>} : memref<7x2x16xf32, #tpu.memory_space<vmem>>, vector<1x2x16xf32>,
    %c2_i32 = arith.constant 2 : i32
    %cst_58 = arith.constant dense<0.000000e+00> : vector<2x32xf32>
    %152 = tpu.matmul %143, %2, %cst_58 {dimension_numbers = #tpu.dot_dimension_numbers<[1], [0], [0], [1], [0, 0, 1, 1], [], []>} : vector<2x32xf32>, vector<32x32xf32>, vector<2x32xf32> -> vector<2x32xf32>
    %153 = vector.broadcast %3 : vector<1x32xf32> to vector<2x32xf32>
    %154 = arith.addf %152, %153 : vector<2x32xf32>
    %155 = vector.shape_cast %154 : vector<2x32xf32> to vector<2x1x32xf32>
    %156 = vector.broadcast %155 : vector<2x1x32xf32> to vector<2x16x32xf32>
    %157 = arith.addf %1, %156 : vector<2x16x32xf32>
    %158 = math.tanh %157 : vector<2x16x32xf32>
    %159 = vector.shape_cast %4 : vector<1x32xf32> to vector<1x1x32xf32>
    %160 = vector.broadcast %159 : vector<1x1x32xf32> to vector<2x16x32xf32>
    %161 = arith.mulf %158, %160 : vector<2x16x32xf32>
    %cst_59 = arith.constant dense<0.000000e+00> : vector<2x16xf32>
    %162 = vector.multi_reduction <add>, %161, %cst_59 [2] : vector<2x16x32xf32> to vector<2x16xf32>
    %163 = vector.broadcast %5 : vector<1x1xf32> to vector<2x16xf32>
    %164 = arith.addf %162, %163 : vector<2x16xf32>
    %cst_60 = arith.constant dense<0xFF800000> : vector<2xf32>
    %165 = vector.multi_reduction <maximumf>, %164, %cst_60 [1] : vector<2x16xf32> to vector<2xf32>
    %166 = vector.shape_cast %165 : vector<2xf32> to vector<2x1xf32>
    %167 = vector.broadcast %166 : vector<2x1xf32> to vector<2x16xf32>
    %168 = arith.subf %164, %167 : vector<2x16xf32>
    %169 = math.exp %168 : vector<2x16xf32>
    %cst_61 = arith.constant dense<0.000000e+00> : vector<2xf32>
    %170 = vector.multi_reduction <add>, %169, %cst_61 [1] : vector<2x16xf32> to vector<2xf32>
    %171 = vector.shape_cast %170 : vector<2xf32> to vector<2x1xf32>
    %172 = tpu.reciprocal %171 {approx = true} : vector<2x1xf32> -> vector<2x1xf32>
    %173 = vector.broadcast %172 : vector<2x1xf32> to vector<2x16xf32>
    %174 = arith.mulf %169, %173 : vector<2x16xf32>
    %175 = vector.shape_cast %174 : vector<2x16xf32> to vector<2x16x1xf32>
    %176 = vector.broadcast %175 : vector<2x16x1xf32> to vector<2x16x64xf32>
    %177 = arith.mulf %0, %176 : vector<2x16x64xf32>
    %cst_62 = arith.constant dense<0.000000e+00> : vector<2x64xf32>
    %178 = vector.multi_reduction <add>, %177, %cst_62 [1] : vector<2x16x64xf32> to vector<2x64xf32>
    %179 = arith.index_cast %c2_i32 : i32 to index
    %c0_63 = arith.constant 0 : index
    %c0_64 = arith.constant 0 : index
    %180 = vector.load %arg1[%179, %c0_63, %c0_64] : memref<7x2x32xf32, #tpu.memory_space<vmem>>, vector<1x2x32xf32>
    %181 = vector.shape_cast %180 : vector<1x2x32xf32> to vector<2x32xf32>
    %cst_65 = arith.constant dense<0.000000e+00> : vector<2x128xf32>
    %182 = tpu.matmul %181, %6, %cst_65 {dimension_numbers = #tpu.dot_dimension_numbers<[1], [0], [0], [1], [0, 0, 1, 1], [], []>} : vector<2x32xf32>, vector<32x128xf32>, vector<2x128xf32> -> vector<2x128xf32>
    %cst_66 = arith.constant dense<0.000000e+00> : vector<2x128xf32>
    %183 = tpu.matmul %178, %7, %cst_66 {dimension_numbers = #tpu.dot_dimension_numbers<[1], [0], [0], [1], [0, 0, 1, 1], [], []>} : vector<2x64xf32>, vector<64x128xf32>, vector<2x128xf32> -> vector<2x128xf32>
    %184 = arith.addf %182, %183 : vector<2x128xf32>
    %cst_67 = arith.constant dense<0.000000e+00> : vector<2x128xf32>
    %185 = tpu.matmul %143, %8, %cst_67 {dimension_numbers = #tpu.dot_dimension_numbers<[1], [0], [0], [1], [0, 0, 1, 1], [], []>} : vector<2x32xf32>, vector<32x128xf32>, vector<2x128xf32> -> vector<2x128xf32>
    %186 = arith.addf %184, %185 : vector<2x128xf32>
    %187 = vector.broadcast %9 : vector<1x128xf32> to vector<2x128xf32>
    %188 = arith.addf %186, %187 : vector<2x128xf32>
    %189 = vector.extract_strided_slice %188 {offsets = [0, 0], sizes = [2, 32], strides = [1, 1]} : vector<2x128xf32> to vector<2x32xf32>
    %190 = arith.negf %189 : vector<2x32xf32>
    %191 = math.exp %190 : vector<2x32xf32>
    %cst_68 = arith.constant 1.000000e+00 : f32
    %192 = vector.broadcast %cst_68 : f32 to vector<2x32xf32>
    %193 = arith.addf %192, %191 : vector<2x32xf32>
    %194 = arith.divf %192, %193 : vector<2x32xf32>
    %195 = vector.extract_strided_slice %188 {offsets = [0, 32], sizes = [2, 32], strides = [1, 1]} : vector<2x128xf32> to vector<2x32xf32>
    %196 = arith.negf %195 : vector<2x32xf32>
    %197 = math.exp %196 : vector<2x32xf32>
    %cst_69 = arith.constant 1.000000e+00 : f32
    %198 = vector.broadcast %cst_69 : f32 to vector<2x32xf32>
    %199 = arith.addf %198, %197 : vector<2x32xf32>
    %200 = arith.divf %198, %199 : vector<2x32xf32>
    %201 = vector.extract_strided_slice %188 {offsets = [0, 64], sizes = [2, 32], strides = [1, 1]} : vector<2x128xf32> to vector<2x32xf32>
    %202 = math.tanh %201 : vector<2x32xf32>
    %203 = vector.extract_strided_slice %188 {offsets = [0, 96], sizes = [2, 32], strides = [1, 1]} : vector<2x128xf32> to vector<2x32xf32>
    %204 = arith.negf %203 : vector<2x32xf32>
    %205 = math.exp %204 : vector<2x32xf32>
    %cst_70 = arith.constant 1.000000e+00 : f32
    %206 = vector.broadcast %cst_70 : f32 to vector<2x32xf32>
    %207 = arith.addf %206, %205 : vector<2x32xf32>
    %208 = arith.divf %206, %207 : vector<2x32xf32>
    %209 = arith.mulf %200, %141 : vector<2x32xf32>
    %210 = arith.mulf %194, %202 : vector<2x32xf32>
    %211 = arith.addf %209, %210 : vector<2x32xf32>
    %212 = math.tanh %211 : vector<2x32xf32>
    %213 = arith.mulf %208, %212 : vector<2x32xf32>
    %214 = arith.index_cast %c2_i32 : i32 to index
    %c0_71 = arith.constant 0 : index
    %c0_72 = arith.constant 0 : index
    %215 = vector.load %arg13[%214, %c0_71, %c0_72] : memref<7x2x32xf32, #tpu.memory_space<vmem>>, vector<1x2x32xf32>
    %216 = vector.shape_cast %215 : vector<1x2x32xf32> to vector<2x32xf32>
    %217 = vector.shape_cast %213 : vector<2x32xf32> to vector<1x2x32xf32>
    tpu.vector_store %arg13[%214, %c0_71, %c0_72], %217 {strides = array<i32>} : memref<7x2x32xf32, #tpu.memory_space<vmem>>, vector<1x2x32xf32>,
    %218 = arith.index_cast %c2_i32 : i32 to index
    %c0_73 = arith.constant 0 : index
    %c0_74 = arith.constant 0 : index
    %219 = vector.load %arg14[%218, %c0_73, %c0_74] : memref<7x2x16xf32, #tpu.memory_space<vmem>>, vector<1x2x16xf32>
    %220 = vector.shape_cast %219 : vector<1x2x16xf32> to vector<2x16xf32>
    %221 = vector.shape_cast %174 : vector<2x16xf32> to vector<1x2x16xf32>
    tpu.vector_store %arg14[%218, %c0_73, %c0_74], %221 {strides = array<i32>} : memref<7x2x16xf32, #tpu.memory_space<vmem>>, vector<1x2x16xf32>,
    %c3_i32 = arith.constant 3 : i32
    %cst_75 = arith.constant dense<0.000000e+00> : vector<2x32xf32>
    %222 = tpu.matmul %213, %2, %cst_75 {dimension_numbers = #tpu.dot_dimension_numbers<[1], [0], [0], [1], [0, 0, 1, 1], [], []>} : vector<2x32xf32>, vector<32x32xf32>, vector<2x32xf32> -> vector<2x32xf32>
    %223 = vector.broadcast %3 : vector<1x32xf32> to vector<2x32xf32>
    %224 = arith.addf %222, %223 : vector<2x32xf32>
    %225 = vector.shape_cast %224 : vector<2x32xf32> to vector<2x1x32xf32>
    %226 = vector.broadcast %225 : vector<2x1x32xf32> to vector<2x16x32xf32>
    %227 = arith.addf %1, %226 : vector<2x16x32xf32>
    %228 = math.tanh %227 : vector<2x16x32xf32>
    %229 = vector.shape_cast %4 : vector<1x32xf32> to vector<1x1x32xf32>
    %230 = vector.broadcast %229 : vector<1x1x32xf32> to vector<2x16x32xf32>
    %231 = arith.mulf %228, %230 : vector<2x16x32xf32>
    %cst_76 = arith.constant dense<0.000000e+00> : vector<2x16xf32>
    %232 = vector.multi_reduction <add>, %231, %cst_76 [2] : vector<2x16x32xf32> to vector<2x16xf32>
    %233 = vector.broadcast %5 : vector<1x1xf32> to vector<2x16xf32>
    %234 = arith.addf %232, %233 : vector<2x16xf32>
    %cst_77 = arith.constant dense<0xFF800000> : vector<2xf32>
    %235 = vector.multi_reduction <maximumf>, %234, %cst_77 [1] : vector<2x16xf32> to vector<2xf32>
    %236 = vector.shape_cast %235 : vector<2xf32> to vector<2x1xf32>
    %237 = vector.broadcast %236 : vector<2x1xf32> to vector<2x16xf32>
    %238 = arith.subf %234, %237 : vector<2x16xf32>
    %239 = math.exp %238 : vector<2x16xf32>
    %cst_78 = arith.constant dense<0.000000e+00> : vector<2xf32>
    %240 = vector.multi_reduction <add>, %239, %cst_78 [1] : vector<2x16xf32> to vector<2xf32>
    %241 = vector.shape_cast %240 : vector<2xf32> to vector<2x1xf32>
    %242 = tpu.reciprocal %241 {approx = true} : vector<2x1xf32> -> vector<2x1xf32>
    %243 = vector.broadcast %242 : vector<2x1xf32> to vector<2x16xf32>
    %244 = arith.mulf %239, %243 : vector<2x16xf32>
    %245 = vector.shape_cast %244 : vector<2x16xf32> to vector<2x16x1xf32>
    %246 = vector.broadcast %245 : vector<2x16x1xf32> to vector<2x16x64xf32>
    %247 = arith.mulf %0, %246 : vector<2x16x64xf32>
    %cst_79 = arith.constant dense<0.000000e+00> : vector<2x64xf32>
    %248 = vector.multi_reduction <add>, %247, %cst_79 [1] : vector<2x16x64xf32> to vector<2x64xf32>
    %249 = arith.index_cast %c3_i32 : i32 to index
    %c0_80 = arith.constant 0 : index
    %c0_81 = arith.constant 0 : index
    %250 = vector.load %arg1[%249, %c0_80, %c0_81] : memref<7x2x32xf32, #tpu.memory_space<vmem>>, vector<1x2x32xf32>
    %251 = vector.shape_cast %250 : vector<1x2x32xf32> to vector<2x32xf32>
    %cst_82 = arith.constant dense<0.000000e+00> : vector<2x128xf32>
    %252 = tpu.matmul %251, %6, %cst_82 {dimension_numbers = #tpu.dot_dimension_numbers<[1], [0], [0], [1], [0, 0, 1, 1], [], []>} : vector<2x32xf32>, vector<32x128xf32>, vector<2x128xf32> -> vector<2x128xf32>
    %cst_83 = arith.constant dense<0.000000e+00> : vector<2x128xf32>
    %253 = tpu.matmul %248, %7, %cst_83 {dimension_numbers = #tpu.dot_dimension_numbers<[1], [0], [0], [1], [0, 0, 1, 1], [], []>} : vector<2x64xf32>, vector<64x128xf32>, vector<2x128xf32> -> vector<2x128xf32>
    %254 = arith.addf %252, %253 : vector<2x128xf32>
    %cst_84 = arith.constant dense<0.000000e+00> : vector<2x128xf32>
    %255 = tpu.matmul %213, %8, %cst_84 {dimension_numbers = #tpu.dot_dimension_numbers<[1], [0], [0], [1], [0, 0, 1, 1], [], []>} : vector<2x32xf32>, vector<32x128xf32>, vector<2x128xf32> -> vector<2x128xf32>
    %256 = arith.addf %254, %255 : vector<2x128xf32>
    %257 = vector.broadcast %9 : vector<1x128xf32> to vector<2x128xf32>
    %258 = arith.addf %256, %257 : vector<2x128xf32>
    %259 = vector.extract_strided_slice %258 {offsets = [0, 0], sizes = [2, 32], strides = [1, 1]} : vector<2x128xf32> to vector<2x32xf32>
    %260 = arith.negf %259 : vector<2x32xf32>
    %261 = math.exp %260 : vector<2x32xf32>
    %cst_85 = arith.constant 1.000000e+00 : f32
    %262 = vector.broadcast %cst_85 : f32 to vector<2x32xf32>
    %263 = arith.addf %262, %261 : vector<2x32xf32>
    %264 = arith.divf %262, %263 : vector<2x32xf32>
    %265 = vector.extract_strided_slice %258 {offsets = [0, 32], sizes = [2, 32], strides = [1, 1]} : vector<2x128xf32> to vector<2x32xf32>
    %266 = arith.negf %265 : vector<2x32xf32>
    %267 = math.exp %266 : vector<2x32xf32>
    %cst_86 = arith.constant 1.000000e+00 : f32
    %268 = vector.broadcast %cst_86 : f32 to vector<2x32xf32>
    %269 = arith.addf %268, %267 : vector<2x32xf32>
    %270 = arith.divf %268, %269 : vector<2x32xf32>
    %271 = vector.extract_strided_slice %258 {offsets = [0, 64], sizes = [2, 32], strides = [1, 1]} : vector<2x128xf32> to vector<2x32xf32>
    %272 = math.tanh %271 : vector<2x32xf32>
    %273 = vector.extract_strided_slice %258 {offsets = [0, 96], sizes = [2, 32], strides = [1, 1]} : vector<2x128xf32> to vector<2x32xf32>
    %274 = arith.negf %273 : vector<2x32xf32>
    %275 = math.exp %274 : vector<2x32xf32>
    %cst_87 = arith.constant 1.000000e+00 : f32
    %276 = vector.broadcast %cst_87 : f32 to vector<2x32xf32>
    %277 = arith.addf %276, %275 : vector<2x32xf32>
    %278 = arith.divf %276, %277 : vector<2x32xf32>
    %279 = arith.mulf %270, %211 : vector<2x32xf32>
    %280 = arith.mulf %264, %272 : vector<2x32xf32>
    %281 = arith.addf %279, %280 : vector<2x32xf32>
    %282 = math.tanh %281 : vector<2x32xf32>
    %283 = arith.mulf %278, %282 : vector<2x32xf32>
    %284 = arith.index_cast %c3_i32 : i32 to index
    %c0_88 = arith.constant 0 : index
    %c0_89 = arith.constant 0 : index
    %285 = vector.load %arg13[%284, %c0_88, %c0_89] : memref<7x2x32xf32, #tpu.memory_space<vmem>>, vector<1x2x32xf32>
    %286 = vector.shape_cast %285 : vector<1x2x32xf32> to vector<2x32xf32>
    %287 = vector.shape_cast %283 : vector<2x32xf32> to vector<1x2x32xf32>
    tpu.vector_store %arg13[%284, %c0_88, %c0_89], %287 {strides = array<i32>} : memref<7x2x32xf32, #tpu.memory_space<vmem>>, vector<1x2x32xf32>,
    %288 = arith.index_cast %c3_i32 : i32 to index
    %c0_90 = arith.constant 0 : index
    %c0_91 = arith.constant 0 : index
    %289 = vector.load %arg14[%288, %c0_90, %c0_91] : memref<7x2x16xf32, #tpu.memory_space<vmem>>, vector<1x2x16xf32>
    %290 = vector.shape_cast %289 : vector<1x2x16xf32> to vector<2x16xf32>
    %291 = vector.shape_cast %244 : vector<2x16xf32> to vector<1x2x16xf32>
    tpu.vector_store %arg14[%288, %c0_90, %c0_91], %291 {strides = array<i32>} : memref<7x2x16xf32, #tpu.memory_space<vmem>>, vector<1x2x16xf32>,
    %c4_i32 = arith.constant 4 : i32
    %cst_92 = arith.constant dense<0.000000e+00> : vector<2x32xf32>
    %292 = tpu.matmul %283, %2, %cst_92 {dimension_numbers = #tpu.dot_dimension_numbers<[1], [0], [0], [1], [0, 0, 1, 1], [], []>} : vector<2x32xf32>, vector<32x32xf32>, vector<2x32xf32> -> vector<2x32xf32>
    %293 = vector.broadcast %3 : vector<1x32xf32> to vector<2x32xf32>
    %294 = arith.addf %292, %293 : vector<2x32xf32>
    %295 = vector.shape_cast %294 : vector<2x32xf32> to vector<2x1x32xf32>
    %296 = vector.broadcast %295 : vector<2x1x32xf32> to vector<2x16x32xf32>
    %297 = arith.addf %1, %296 : vector<2x16x32xf32>
    %298 = math.tanh %297 : vector<2x16x32xf32>
    %299 = vector.shape_cast %4 : vector<1x32xf32> to vector<1x1x32xf32>
    %300 = vector.broadcast %299 : vector<1x1x32xf32> to vector<2x16x32xf32>
    %301 = arith.mulf %298, %300 : vector<2x16x32xf32>
    %cst_93 = arith.constant dense<0.000000e+00> : vector<2x16xf32>
    %302 = vector.multi_reduction <add>, %301, %cst_93 [2] : vector<2x16x32xf32> to vector<2x16xf32>
    %303 = vector.broadcast %5 : vector<1x1xf32> to vector<2x16xf32>
    %304 = arith.addf %302, %303 : vector<2x16xf32>
    %cst_94 = arith.constant dense<0xFF800000> : vector<2xf32>
    %305 = vector.multi_reduction <maximumf>, %304, %cst_94 [1] : vector<2x16xf32> to vector<2xf32>
    %306 = vector.shape_cast %305 : vector<2xf32> to vector<2x1xf32>
    %307 = vector.broadcast %306 : vector<2x1xf32> to vector<2x16xf32>
    %308 = arith.subf %304, %307 : vector<2x16xf32>
    %309 = math.exp %308 : vector<2x16xf32>
    %cst_95 = arith.constant dense<0.000000e+00> : vector<2xf32>
    %310 = vector.multi_reduction <add>, %309, %cst_95 [1] : vector<2x16xf32> to vector<2xf32>
    %311 = vector.shape_cast %310 : vector<2xf32> to vector<2x1xf32>
    %312 = tpu.reciprocal %311 {approx = true} : vector<2x1xf32> -> vector<2x1xf32>
    %313 = vector.broadcast %312 : vector<2x1xf32> to vector<2x16xf32>
    %314 = arith.mulf %309, %313 : vector<2x16xf32>
    %315 = vector.shape_cast %314 : vector<2x16xf32> to vector<2x16x1xf32>
    %316 = vector.broadcast %315 : vector<2x16x1xf32> to vector<2x16x64xf32>
    %317 = arith.mulf %0, %316 : vector<2x16x64xf32>
    %cst_96 = arith.constant dense<0.000000e+00> : vector<2x64xf32>
    %318 = vector.multi_reduction <add>, %317, %cst_96 [1] : vector<2x16x64xf32> to vector<2x64xf32>
    %319 = arith.index_cast %c4_i32 : i32 to index
    %c0_97 = arith.constant 0 : index
    %c0_98 = arith.constant 0 : index
    %320 = vector.load %arg1[%319, %c0_97, %c0_98] : memref<7x2x32xf32, #tpu.memory_space<vmem>>, vector<1x2x32xf32>
    %321 = vector.shape_cast %320 : vector<1x2x32xf32> to vector<2x32xf32>
    %cst_99 = arith.constant dense<0.000000e+00> : vector<2x128xf32>
    %322 = tpu.matmul %321, %6, %cst_99 {dimension_numbers = #tpu.dot_dimension_numbers<[1], [0], [0], [1], [0, 0, 1, 1], [], []>} : vector<2x32xf32>, vector<32x128xf32>, vector<2x128xf32> -> vector<2x128xf32>
    %cst_100 = arith.constant dense<0.000000e+00> : vector<2x128xf32>
    %323 = tpu.matmul %318, %7, %cst_100 {dimension_numbers = #tpu.dot_dimension_numbers<[1], [0], [0], [1], [0, 0, 1, 1], [], []>} : vector<2x64xf32>, vector<64x128xf32>, vector<2x128xf32> -> vector<2x128xf32>
    %324 = arith.addf %322, %323 : vector<2x128xf32>
    %cst_101 = arith.constant dense<0.000000e+00> : vector<2x128xf32>
    %325 = tpu.matmul %283, %8, %cst_101 {dimension_numbers = #tpu.dot_dimension_numbers<[1], [0], [0], [1], [0, 0, 1, 1], [], []>} : vector<2x32xf32>, vector<32x128xf32>, vector<2x128xf32> -> vector<2x128xf32>
    %326 = arith.addf %324, %325 : vector<2x128xf32>
    %327 = vector.broadcast %9 : vector<1x128xf32> to vector<2x128xf32>
    %328 = arith.addf %326, %327 : vector<2x128xf32>
    %329 = vector.extract_strided_slice %328 {offsets = [0, 0], sizes = [2, 32], strides = [1, 1]} : vector<2x128xf32> to vector<2x32xf32>
    %330 = arith.negf %329 : vector<2x32xf32>
    %331 = math.exp %330 : vector<2x32xf32>
    %cst_102 = arith.constant 1.000000e+00 : f32
    %332 = vector.broadcast %cst_102 : f32 to vector<2x32xf32>
    %333 = arith.addf %332, %331 : vector<2x32xf32>
    %334 = arith.divf %332, %333 : vector<2x32xf32>
    %335 = vector.extract_strided_slice %328 {offsets = [0, 32], sizes = [2, 32], strides = [1, 1]} : vector<2x128xf32> to vector<2x32xf32>
    %336 = arith.negf %335 : vector<2x32xf32>
    %337 = math.exp %336 : vector<2x32xf32>
    %cst_103 = arith.constant 1.000000e+00 : f32
    %338 = vector.broadcast %cst_103 : f32 to vector<2x32xf32>
    %339 = arith.addf %338, %337 : vector<2x32xf32>
    %340 = arith.divf %338, %339 : vector<2x32xf32>
    %341 = vector.extract_strided_slice %328 {offsets = [0, 64], sizes = [2, 32], strides = [1, 1]} : vector<2x128xf32> to vector<2x32xf32>
    %342 = math.tanh %341 : vector<2x32xf32>
    %343 = vector.extract_strided_slice %328 {offsets = [0, 96], sizes = [2, 32], strides = [1, 1]} : vector<2x128xf32> to vector<2x32xf32>
    %344 = arith.negf %343 : vector<2x32xf32>
    %345 = math.exp %344 : vector<2x32xf32>
    %cst_104 = arith.constant 1.000000e+00 : f32
    %346 = vector.broadcast %cst_104 : f32 to vector<2x32xf32>
    %347 = arith.addf %346, %345 : vector<2x32xf32>
    %348 = arith.divf %346, %347 : vector<2x32xf32>
    %349 = arith.mulf %340, %281 : vector<2x32xf32>
    %350 = arith.mulf %334, %342 : vector<2x32xf32>
    %351 = arith.addf %349, %350 : vector<2x32xf32>
    %352 = math.tanh %351 : vector<2x32xf32>
    %353 = arith.mulf %348, %352 : vector<2x32xf32>
    %354 = arith.index_cast %c4_i32 : i32 to index
    %c0_105 = arith.constant 0 : index
    %c0_106 = arith.constant 0 : index
    %355 = vector.load %arg13[%354, %c0_105, %c0_106] : memref<7x2x32xf32, #tpu.memory_space<vmem>>, vector<1x2x32xf32>
    %356 = vector.shape_cast %355 : vector<1x2x32xf32> to vector<2x32xf32>
    %357 = vector.shape_cast %353 : vector<2x32xf32> to vector<1x2x32xf32>
    tpu.vector_store %arg13[%354, %c0_105, %c0_106], %357 {strides = array<i32>} : memref<7x2x32xf32, #tpu.memory_space<vmem>>, vector<1x2x32xf32>,
    %358 = arith.index_cast %c4_i32 : i32 to index
    %c0_107 = arith.constant 0 : index
    %c0_108 = arith.constant 0 : index
    %359 = vector.load %arg14[%358, %c0_107, %c0_108] : memref<7x2x16xf32, #tpu.memory_space<vmem>>, vector<1x2x16xf32>
    %360 = vector.shape_cast %359 : vector<1x2x16xf32> to vector<2x16xf32>
    %361 = vector.shape_cast %314 : vector<2x16xf32> to vector<1x2x16xf32>
    tpu.vector_store %arg14[%358, %c0_107, %c0_108], %361 {strides = array<i32>} : memref<7x2x16xf32, #tpu.memory_space<vmem>>, vector<1x2x16xf32>,
    %c5_i32 = arith.constant 5 : i32
    %cst_109 = arith.constant dense<0.000000e+00> : vector<2x32xf32>
    %362 = tpu.matmul %353, %2, %cst_109 {dimension_numbers = #tpu.dot_dimension_numbers<[1], [0], [0], [1], [0, 0, 1, 1], [], []>} : vector<2x32xf32>, vector<32x32xf32>, vector<2x32xf32> -> vector<2x32xf32>
    %363 = vector.broadcast %3 : vector<1x32xf32> to vector<2x32xf32>
    %364 = arith.addf %362, %363 : vector<2x32xf32>
    %365 = vector.shape_cast %364 : vector<2x32xf32> to vector<2x1x32xf32>
    %366 = vector.broadcast %365 : vector<2x1x32xf32> to vector<2x16x32xf32>
    %367 = arith.addf %1, %366 : vector<2x16x32xf32>
    %368 = math.tanh %367 : vector<2x16x32xf32>
    %369 = vector.shape_cast %4 : vector<1x32xf32> to vector<1x1x32xf32>
    %370 = vector.broadcast %369 : vector<1x1x32xf32> to vector<2x16x32xf32>
    %371 = arith.mulf %368, %370 : vector<2x16x32xf32>
    %cst_110 = arith.constant dense<0.000000e+00> : vector<2x16xf32>
    %372 = vector.multi_reduction <add>, %371, %cst_110 [2] : vector<2x16x32xf32> to vector<2x16xf32>
    %373 = vector.broadcast %5 : vector<1x1xf32> to vector<2x16xf32>
    %374 = arith.addf %372, %373 : vector<2x16xf32>
    %cst_111 = arith.constant dense<0xFF800000> : vector<2xf32>
    %375 = vector.multi_reduction <maximumf>, %374, %cst_111 [1] : vector<2x16xf32> to vector<2xf32>
    %376 = vector.shape_cast %375 : vector<2xf32> to vector<2x1xf32>
    %377 = vector.broadcast %376 : vector<2x1xf32> to vector<2x16xf32>
    %378 = arith.subf %374, %377 : vector<2x16xf32>
    %379 = math.exp %378 : vector<2x16xf32>
    %cst_112 = arith.constant dense<0.000000e+00> : vector<2xf32>
    %380 = vector.multi_reduction <add>, %379, %cst_112 [1] : vector<2x16xf32> to vector<2xf32>
    %381 = vector.shape_cast %380 : vector<2xf32> to vector<2x1xf32>
    %382 = tpu.reciprocal %381 {approx = true} : vector<2x1xf32> -> vector<2x1xf32>
    %383 = vector.broadcast %382 : vector<2x1xf32> to vector<2x16xf32>
    %384 = arith.mulf %379, %383 : vector<2x16xf32>
    %385 = vector.shape_cast %384 : vector<2x16xf32> to vector<2x16x1xf32>
    %386 = vector.broadcast %385 : vector<2x16x1xf32> to vector<2x16x64xf32>
    %387 = arith.mulf %0, %386 : vector<2x16x64xf32>
    %cst_113 = arith.constant dense<0.000000e+00> : vector<2x64xf32>
    %388 = vector.multi_reduction <add>, %387, %cst_113 [1] : vector<2x16x64xf32> to vector<2x64xf32>
    %389 = arith.index_cast %c5_i32 : i32 to index
    %c0_114 = arith.constant 0 : index
    %c0_115 = arith.constant 0 : index
    %390 = vector.load %arg1[%389, %c0_114, %c0_115] : memref<7x2x32xf32, #tpu.memory_space<vmem>>, vector<1x2x32xf32>
    %391 = vector.shape_cast %390 : vector<1x2x32xf32> to vector<2x32xf32>
    %cst_116 = arith.constant dense<0.000000e+00> : vector<2x128xf32>
    %392 = tpu.matmul %391, %6, %cst_116 {dimension_numbers = #tpu.dot_dimension_numbers<[1], [0], [0], [1], [0, 0, 1, 1], [], []>} : vector<2x32xf32>, vector<32x128xf32>, vector<2x128xf32> -> vector<2x128xf32>
    %cst_117 = arith.constant dense<0.000000e+00> : vector<2x128xf32>
    %393 = tpu.matmul %388, %7, %cst_117 {dimension_numbers = #tpu.dot_dimension_numbers<[1], [0], [0], [1], [0, 0, 1, 1], [], []>} : vector<2x64xf32>, vector<64x128xf32>, vector<2x128xf32> -> vector<2x128xf32>
    %394 = arith.addf %392, %393 : vector<2x128xf32>
    %cst_118 = arith.constant dense<0.000000e+00> : vector<2x128xf32>
    %395 = tpu.matmul %353, %8, %cst_118 {dimension_numbers = #tpu.dot_dimension_numbers<[1], [0], [0], [1], [0, 0, 1, 1], [], []>} : vector<2x32xf32>, vector<32x128xf32>, vector<2x128xf32> -> vector<2x128xf32>
    %396 = arith.addf %394, %395 : vector<2x128xf32>
    %397 = vector.broadcast %9 : vector<1x128xf32> to vector<2x128xf32>
    %398 = arith.addf %396, %397 : vector<2x128xf32>
    %399 = vector.extract_strided_slice %398 {offsets = [0, 0], sizes = [2, 32], strides = [1, 1]} : vector<2x128xf32> to vector<2x32xf32>
    %400 = arith.negf %399 : vector<2x32xf32>
    %401 = math.exp %400 : vector<2x32xf32>
    %cst_119 = arith.constant 1.000000e+00 : f32
    %402 = vector.broadcast %cst_119 : f32 to vector<2x32xf32>
    %403 = arith.addf %402, %401 : vector<2x32xf32>
    %404 = arith.divf %402, %403 : vector<2x32xf32>
    %405 = vector.extract_strided_slice %398 {offsets = [0, 32], sizes = [2, 32], strides = [1, 1]} : vector<2x128xf32> to vector<2x32xf32>
    %406 = arith.negf %405 : vector<2x32xf32>
    %407 = math.exp %406 : vector<2x32xf32>
    %cst_120 = arith.constant 1.000000e+00 : f32
    %408 = vector.broadcast %cst_120 : f32 to vector<2x32xf32>
    %409 = arith.addf %408, %407 : vector<2x32xf32>
    %410 = arith.divf %408, %409 : vector<2x32xf32>
    %411 = vector.extract_strided_slice %398 {offsets = [0, 64], sizes = [2, 32], strides = [1, 1]} : vector<2x128xf32> to vector<2x32xf32>
    %412 = math.tanh %411 : vector<2x32xf32>
    %413 = vector.extract_strided_slice %398 {offsets = [0, 96], sizes = [2, 32], strides = [1, 1]} : vector<2x128xf32> to vector<2x32xf32>
    %414 = arith.negf %413 : vector<2x32xf32>
    %415 = math.exp %414 : vector<2x32xf32>
    %cst_121 = arith.constant 1.000000e+00 : f32
    %416 = vector.broadcast %cst_121 : f32 to vector<2x32xf32>
    %417 = arith.addf %416, %415 : vector<2x32xf32>
    %418 = arith.divf %416, %417 : vector<2x32xf32>
    %419 = arith.mulf %410, %351 : vector<2x32xf32>
    %420 = arith.mulf %404, %412 : vector<2x32xf32>
    %421 = arith.addf %419, %420 : vector<2x32xf32>
    %422 = math.tanh %421 : vector<2x32xf32>
    %423 = arith.mulf %418, %422 : vector<2x32xf32>
    %424 = arith.index_cast %c5_i32 : i32 to index
    %c0_122 = arith.constant 0 : index
    %c0_123 = arith.constant 0 : index
    %425 = vector.load %arg13[%424, %c0_122, %c0_123] : memref<7x2x32xf32, #tpu.memory_space<vmem>>, vector<1x2x32xf32>
    %426 = vector.shape_cast %425 : vector<1x2x32xf32> to vector<2x32xf32>
    %427 = vector.shape_cast %423 : vector<2x32xf32> to vector<1x2x32xf32>
    tpu.vector_store %arg13[%424, %c0_122, %c0_123], %427 {strides = array<i32>} : memref<7x2x32xf32, #tpu.memory_space<vmem>>, vector<1x2x32xf32>,
    %428 = arith.index_cast %c5_i32 : i32 to index
    %c0_124 = arith.constant 0 : index
    %c0_125 = arith.constant 0 : index
    %429 = vector.load %arg14[%428, %c0_124, %c0_125] : memref<7x2x16xf32, #tpu.memory_space<vmem>>, vector<1x2x16xf32>
    %430 = vector.shape_cast %429 : vector<1x2x16xf32> to vector<2x16xf32>
    %431 = vector.shape_cast %384 : vector<2x16xf32> to vector<1x2x16xf32>
    tpu.vector_store %arg14[%428, %c0_124, %c0_125], %431 {strides = array<i32>} : memref<7x2x16xf32, #tpu.memory_space<vmem>>, vector<1x2x16xf32>,
    %c6_i32 = arith.constant 6 : i32
    %cst_126 = arith.constant dense<0.000000e+00> : vector<2x32xf32>
    %432 = tpu.matmul %423, %2, %cst_126 {dimension_numbers = #tpu.dot_dimension_numbers<[1], [0], [0], [1], [0, 0, 1, 1], [], []>} : vector<2x32xf32>, vector<32x32xf32>, vector<2x32xf32> -> vector<2x32xf32>
    %433 = vector.broadcast %3 : vector<1x32xf32> to vector<2x32xf32>
    %434 = arith.addf %432, %433 : vector<2x32xf32>
    %435 = vector.shape_cast %434 : vector<2x32xf32> to vector<2x1x32xf32>
    %436 = vector.broadcast %435 : vector<2x1x32xf32> to vector<2x16x32xf32>
    %437 = arith.addf %1, %436 : vector<2x16x32xf32>
    %438 = math.tanh %437 : vector<2x16x32xf32>
    %439 = vector.shape_cast %4 : vector<1x32xf32> to vector<1x1x32xf32>
    %440 = vector.broadcast %439 : vector<1x1x32xf32> to vector<2x16x32xf32>
    %441 = arith.mulf %438, %440 : vector<2x16x32xf32>
    %cst_127 = arith.constant dense<0.000000e+00> : vector<2x16xf32>
    %442 = vector.multi_reduction <add>, %441, %cst_127 [2] : vector<2x16x32xf32> to vector<2x16xf32>
    %443 = vector.broadcast %5 : vector<1x1xf32> to vector<2x16xf32>
    %444 = arith.addf %442, %443 : vector<2x16xf32>
    %cst_128 = arith.constant dense<0xFF800000> : vector<2xf32>
    %445 = vector.multi_reduction <maximumf>, %444, %cst_128 [1] : vector<2x16xf32> to vector<2xf32>
    %446 = vector.shape_cast %445 : vector<2xf32> to vector<2x1xf32>
    %447 = vector.broadcast %446 : vector<2x1xf32> to vector<2x16xf32>
    %448 = arith.subf %444, %447 : vector<2x16xf32>
    %449 = math.exp %448 : vector<2x16xf32>
    %cst_129 = arith.constant dense<0.000000e+00> : vector<2xf32>
    %450 = vector.multi_reduction <add>, %449, %cst_129 [1] : vector<2x16xf32> to vector<2xf32>
    %451 = vector.shape_cast %450 : vector<2xf32> to vector<2x1xf32>
    %452 = tpu.reciprocal %451 {approx = true} : vector<2x1xf32> -> vector<2x1xf32>
    %453 = vector.broadcast %452 : vector<2x1xf32> to vector<2x16xf32>
    %454 = arith.mulf %449, %453 : vector<2x16xf32>
    %455 = vector.shape_cast %454 : vector<2x16xf32> to vector<2x16x1xf32>
    %456 = vector.broadcast %455 : vector<2x16x1xf32> to vector<2x16x64xf32>
    %457 = arith.mulf %0, %456 : vector<2x16x64xf32>
    %cst_130 = arith.constant dense<0.000000e+00> : vector<2x64xf32>
    %458 = vector.multi_reduction <add>, %457, %cst_130 [1] : vector<2x16x64xf32> to vector<2x64xf32>
    %459 = arith.index_cast %c6_i32 : i32 to index
    %c0_131 = arith.constant 0 : index
    %c0_132 = arith.constant 0 : index
    %460 = vector.load %arg1[%459, %c0_131, %c0_132] : memref<7x2x32xf32, #tpu.memory_space<vmem>>, vector<1x2x32xf32>
    %461 = vector.shape_cast %460 : vector<1x2x32xf32> to vector<2x32xf32>
    %cst_133 = arith.constant dense<0.000000e+00> : vector<2x128xf32>
    %462 = tpu.matmul %461, %6, %cst_133 {dimension_numbers = #tpu.dot_dimension_numbers<[1], [0], [0], [1], [0, 0, 1, 1], [], []>} : vector<2x32xf32>, vector<32x128xf32>, vector<2x128xf32> -> vector<2x128xf32>
    %cst_134 = arith.constant dense<0.000000e+00> : vector<2x128xf32>
    %463 = tpu.matmul %458, %7, %cst_134 {dimension_numbers = #tpu.dot_dimension_numbers<[1], [0], [0], [1], [0, 0, 1, 1], [], []>} : vector<2x64xf32>, vector<64x128xf32>, vector<2x128xf32> -> vector<2x128xf32>
    %464 = arith.addf %462, %463 : vector<2x128xf32>
    %cst_135 = arith.constant dense<0.000000e+00> : vector<2x128xf32>
    %465 = tpu.matmul %423, %8, %cst_135 {dimension_numbers = #tpu.dot_dimension_numbers<[1], [0], [0], [1], [0, 0, 1, 1], [], []>} : vector<2x32xf32>, vector<32x128xf32>, vector<2x128xf32> -> vector<2x128xf32>
    %466 = arith.addf %464, %465 : vector<2x128xf32>
    %467 = vector.broadcast %9 : vector<1x128xf32> to vector<2x128xf32>
    %468 = arith.addf %466, %467 : vector<2x128xf32>
    %469 = vector.extract_strided_slice %468 {offsets = [0, 0], sizes = [2, 32], strides = [1, 1]} : vector<2x128xf32> to vector<2x32xf32>
    %470 = arith.negf %469 : vector<2x32xf32>
    %471 = math.exp %470 : vector<2x32xf32>
    %cst_136 = arith.constant 1.000000e+00 : f32
    %472 = vector.broadcast %cst_136 : f32 to vector<2x32xf32>
    %473 = arith.addf %472, %471 : vector<2x32xf32>
    %474 = arith.divf %472, %473 : vector<2x32xf32>
    %475 = vector.extract_strided_slice %468 {offsets = [0, 32], sizes = [2, 32], strides = [1, 1]} : vector<2x128xf32> to vector<2x32xf32>
    %476 = arith.negf %475 : vector<2x32xf32>
    %477 = math.exp %476 : vector<2x32xf32>
    %cst_137 = arith.constant 1.000000e+00 : f32
    %478 = vector.broadcast %cst_137 : f32 to vector<2x32xf32>
    %479 = arith.addf %478, %477 : vector<2x32xf32>
    %480 = arith.divf %478, %479 : vector<2x32xf32>
    %481 = vector.extract_strided_slice %468 {offsets = [0, 64], sizes = [2, 32], strides = [1, 1]} : vector<2x128xf32> to vector<2x32xf32>
    %482 = math.tanh %481 : vector<2x32xf32>
    %483 = vector.extract_strided_slice %468 {offsets = [0, 96], sizes = [2, 32], strides = [1, 1]} : vector<2x128xf32> to vector<2x32xf32>
    %484 = arith.negf %483 : vector<2x32xf32>
    %485 = math.exp %484 : vector<2x32xf32>
    %cst_138 = arith.constant 1.000000e+00 : f32
    %486 = vector.broadcast %cst_138 : f32 to vector<2x32xf32>
    %487 = arith.addf %486, %485 : vector<2x32xf32>
    %488 = arith.divf %486, %487 : vector<2x32xf32>
    %489 = arith.mulf %480, %421 : vector<2x32xf32>
    %490 = arith.mulf %474, %482 : vector<2x32xf32>
    %491 = arith.addf %489, %490 : vector<2x32xf32>
    %492 = math.tanh %491 : vector<2x32xf32>
    %493 = arith.mulf %488, %492 : vector<2x32xf32>
    %494 = arith.index_cast %c6_i32 : i32 to index
    %c0_139 = arith.constant 0 : index
    %c0_140 = arith.constant 0 : index
    %495 = vector.load %arg13[%494, %c0_139, %c0_140] : memref<7x2x32xf32, #tpu.memory_space<vmem>>, vector<1x2x32xf32>
    %496 = vector.shape_cast %495 : vector<1x2x32xf32> to vector<2x32xf32>
    %497 = vector.shape_cast %493 : vector<2x32xf32> to vector<1x2x32xf32>
    tpu.vector_store %arg13[%494, %c0_139, %c0_140], %497 {strides = array<i32>} : memref<7x2x32xf32, #tpu.memory_space<vmem>>, vector<1x2x32xf32>,
    %498 = arith.index_cast %c6_i32 : i32 to index
    %c0_141 = arith.constant 0 : index
    %c0_142 = arith.constant 0 : index
    %499 = vector.load %arg14[%498, %c0_141, %c0_142] : memref<7x2x16xf32, #tpu.memory_space<vmem>>, vector<1x2x16xf32>
    %500 = vector.shape_cast %499 : vector<1x2x16xf32> to vector<2x16xf32>
    %501 = vector.shape_cast %454 : vector<2x16xf32> to vector<1x2x16xf32>
    tpu.vector_store %arg14[%498, %c0_141, %c0_142], %501 {strides = array<i32>} : memref<7x2x16xf32, #tpu.memory_space<vmem>>, vector<1x2x16xf32>,
    %c7_i32 = arith.constant 7 : i32
    return
  }
}

</mosaic_0001>

<bundles_post_ra>
// kernel: decoder_forward.1
= control target key start
LH: loop header
LB: loop body
LE: loop exit
PB: predicated region body
PF: predicated region fallthrough
CT: control target
= control target key end

     0   :  { %s6172_s0 = inlined_call_operand.vmem [shape: f32[2,16,64], index: 0, kind: input, shape index: {}]   ;;  %s6173_s1 = inlined_call_operand.vmem [shape: f32[7,2,32], index: 1, kind: input, shape index: {}]   ;;  %s6174_s2 = inlined_call_operand.vmem [shape: f32[2,32], index: 2, kind: input, shape index: {}]   ;;  %s6175_s3 = inlined_call_operand.vmem [shape: f32[2,32], index: 3, kind: input, shape index: {}]   ;;  %s6176_s4 = inlined_call_operand.vmem [shape: f32[2,16,32], index: 4, kind: input, shape index: {}]   ;;  %s6177_s5 = inlined_call_operand.vmem [shape: f32[32,32], index: 5, kind: input, shape index: {}]   ;;  %s6178_s6 = inlined_call_operand.vmem [shape: f32[1,32], index: 6, kind: input, shape index: {}]   ;;  %s6179_s7 = inlined_call_operand.vmem [shape: f32[1,32], index: 7, kind: input, shape index: {}]   ;;  %s6180_s8 = inlined_call_operand.<no memory space> [shape: f32[1,1], index: 8, kind: input, shape index: {}]   ;;  %s6181_s9 = inlined_call_operand.vmem [shape: f32[32,128], index: 9, kind: input, shape index: {}]   ;;  %s6182_s10 = inlined_call_operand.vmem [shape: f32[64,128], index: 10, kind: input, shape index: {}]   ;;  %s6183_s11 = inlined_call_operand.vmem [shape: f32[32,128], index: 11, kind: input, shape index: {}]   ;;  %s6184_s12 = inlined_call_operand.vmem [shape: f32[1,128], index: 12, kind: input, shape index: {}]   ;;  %s6185_s13 = inlined_call_operand.vmem [shape: f32[7,2,32], index: 13, kind: output, shape index: {0}]   ;;  %s6186_s14 = inlined_call_operand.hbm [shape: f32[7,2,16], index: 14, kind: output, shape index: {1}]  }
   0x1   :  { %v20_v0 = vstv %s6180_s8 }
   0x2   :  { %21 = vst [vmem:[#allocation2] sm:$0x1] %v20_v0 }
   0x3   :  { %v57_v1 = vld [vmem:[%s6177_s5] sm:$0xff]  ;;  %v58_v2 = vld [vmem:[%s6177_s5 + $0x8] sm:$0xff]  ;;  %v59_v3 = vld [vmem:[%s6177_s5 + $0x10] sm:$0xff]  ;;  %v5051_v4 = vmov 0.0|0.0   ;;  %vm5052_vm0 = vmmov 0   ;;  %v5053_v7 = vmov 0.0  }
   0x4   :  { %4602 = vmatprep.subr.bf16.mxu0 %v5051_v4  ;;  %v5148_v5 = vpack.c.bf16 %v58_v2, %v57_v1  ;;  %v60_v6 = vld [vmem:[%s6177_s5 + $0x18] sm:$0xff]  ;;  %4246 = vmatprep.mubr.msk.f32.mxu0 %vm5052_vm0, %v5053_v7 }
   0x5   :  { %4608 = vmatprep.subr.bf16.mxu1 %v5051_v4  ;;  %4265 = vmatprep.mubr.msk.f32.mxu1 %vm5052_vm0, %v5053_v7  ;;  %v5159_v8 = vpack.c.bf16 %v60_v6, %v59_v3 }
   0x6   :  { %4604 = vmatpush3.bf16.msra.mxu0 %v5148_v5 }
   0x7   :  { %22 = vsyncpa [#allocation4], 0  ;;  %4605 = vmatprep.subr.bf16.mxu0 %v5051_v4  ;;  %v5166_v9 = vld [vmem:[%s6174_s2] sm:$0x3]  ;;  %vm89_vm1 = vcmask 261120   ;;  %v5054_v10 = vmov 0   ;;  %v167_v13 = vlaneseq }
   0x8   :  { %4821 = vset.pattern.permute.xlu0 %v5054_v10  ;;  %4822 = vset.pattern.permute.xlu1 %v5054_v10  ;;  %v5055_v11 = vmov 1966171168   ;;  %v5178_v16 = vld [vmem:[%s6178_s6] ss:$0 sm:$0xff]  ;;  %v5197_v26 = vld [vmem:[%s6176_s4 + $0x8] sm:$0xff]  ;;  %v5204_v29 = vld [vmem:[%s6176_s4 + $0x10] sm:$0xff] }
   0x9   :  { %v165_v12 = vunpack.c.l.s4 %v5055_v11  ;;  %v5173_v15 = vshrl.u32 %v167_v13, 7  ;;  %v5192_v25 = vld [vmem:[%s6176_s4] sm:$0xff]  ;;  %v5209_v30 = vld [vmem:[%s6176_s4 + $0x18] sm:$0xff]  ;;  %v4022_v49 = vld [vmem:[#allocation2] ss:$0 sm:$0xff]  ;;  %v244_v51 = vand.u32 127, %v167_v13 }
   0xa   :  { %4607 = vmatpush3.bf16.msra.mxu0 %v5159_v8  ;;  %v5219_v36 = vld [vmem:[%s6179_s7] ss:$0 sm:$0xff]  ;;  %vm254_vm2 = vcmask 130112   ;;  %vm265_vm3 = vcmask 1041409   ;;  %vm268_vm4 = vcmask 123904   ;;  %vm374_vm5 = vcmask 523264  }
   0xb   :  { %4620 = vmatprep.subr.bf16.mxu0 %v5051_v4  ;;  %v166_v14 = vunpack.c.0.s8 %v165_v12  ;;  %v5186_v22 = vsub.s32 0, %v5173_v15  ;;  %v249_v53 = vadd.s32 4294967288, %v244_v51  ;;  %v5230_v55 = vsub.s32 %v244_v51, %v5173_v15  ;;  %s5056_s21 = smov 64   ;;  %s5057_s5 = smov 32  }
   0xc   :  { %v5250_v12 = vsub.s32 1, %v5173_v15  ;;  %vm652_vm6 = vcmask 254976  }
   0xd   :  { %4247 = vmatmul.mubr.msk.f32.vlgmr.msra.gmra.mrb[0].mxu0 %vm89_vm1, %v5166_v9  ;;  %v5181_v17 = vsub.s32 %v166_v14, %v5173_v15  ;;  %v5233_v56 = vsub.s32 %v249_v53, %v5173_v15 }
   0xe   :  { %4276 = vmatprep.mubr.msk.f32.mxu0 %vm5052_vm0, %v5053_v7 }
  0xe0   :  { %v159_v18 = vpop.f32.mrb[0].mxu0 }
  0xe1   :  { %v160_v19 = vadd.f32 %v5178_v16, %v159_v18  ;;  %v4248_v20 = vpop.f32.mrb[1].mxu0 }
  0xe3   :  { %v170_v21 = vrot.slane %v160_v19, %v5181_v17 }
  0xe5   :  { %v171_v23 = vcombine.high %v170_v21, %v170_v21  ;;  %v178_v24 = vrot.slane %v170_v21, %v5181_v17 }
  0xe7   :  { %v185_v27 = vrot.slane %v171_v23, %v5181_v17  ;;  %v189_v28 = vrot.slane %v178_v24, %v5186_v22 }
  0xe9   :  { %v193_v31 = vrot.slane %v185_v27, %v5186_v22  ;;  %v196_v32 = vadd.f32 %v189_v28, %v5192_v25  ;;  %v197_v33 = vadd.f32 %v189_v28, %v5197_v26 }
  0xeb   :  { %v198_v34 = vadd.f32 %v193_v31, %v5204_v29  ;;  %v199_v35 = vadd.f32 %v193_v31, %v5209_v30  ;;  %4823 = vtanh.f32 %v196_v32 }
  0xec   :  { %4825 = vtanh.f32 %v197_v33 }
  0xed   :  { %4827 = vtanh.f32 %v198_v34 }
  0xee   :  { %4829 = vtanh.f32 %v199_v35 }
  0xf5   :  { %v4824_v37 = vpop.eup %4823 }
  0xf6   :  { %v4826_v38 = vpop.eup %4825  ;;  %v210_v39 = vmul.f32 %v4824_v37, %v5219_v36 }
  0xf7   :  { %v4828_v40 = vpop.eup %4827  ;;  %v211_v44 = vmul.f32 %v4826_v38, %v5219_v36 }
  0xf8   :  { %v4830_v41 = vpop.eup %4829  ;;  %v214_v42 = vsel %vm89_vm1, %v210_v39, 0.0  ;;  %v212_v43 = vmul.f32 %v4828_v40, %v5219_v36 }
  0xf9   :  { %215 = vadd.xlane.f32.xlu0 %v214_v42  ;;  %v213_v46 = vmul.f32 %v4830_v41, %v5219_v36  ;;  %v217_v47 = vsel %vm89_vm1, %v211_v44, 0.0 }
  0xfa   :  { %v220_v45 = vsel %vm89_vm1, %v212_v43, 0.0 }
  0xfb   :  { %221 = vadd.xlane.f32.xlu1 %v220_v45  ;;  %v223_v48 = vsel %vm89_vm1, %v213_v46, 0.0 }
  0xfd   :  { %218 = vadd.xlane.f32.xlu0 %v217_v47 }
  0xff   :  { %224 = vadd.xlane.f32.xlu1 %v223_v48 }
 0x113   :  { %232 = vperm.xlu0 %4821, %v4022_v49  }
 0x186   :  { %v216_v50 = vpop.xlane.xlu0 %215 }
 0x188   :  { %v222_v52 = vpop.xlane.xlu1 %221 }
 0x18a   :  { %v219_v54 = vpop.xlane.xlu0 %218 }
 0x18c   :  { %v225_v57 = vpop.xlane.xlu1 %224 }
 0x192   :  { %v5235_v58 = vpop.permute.xlu0 %232 }
 0x193   :  { %v235_v59 = vadd.f32 %v5235_v58, %v216_v50  ;;  %v236_v60 = vadd.f32 %v5235_v58, %v219_v54  ;;  %v237_v61 = vadd.f32 %v5235_v58, %v222_v52  ;;  %v238_v62 = vadd.f32 %v5235_v58, %v225_v57 }
 0x195   :  { %v248_v63 = vrot.slane %v235_v59, %v5230_v55  ;;  %v253_v0 = vrot.slane %v236_v60, %v5233_v56  ;;  %v259_v1 = vrot.slane %v237_v61, %v5230_v55  ;;  %v263_v2 = vrot.slane %v238_v62, %v5233_v56 }
 0x197   :  { %v255_v3 = vsel %vm254_vm2, %v253_v0, %v248_v63  ;;  %v264_v6 = vsel %vm254_vm2, %v263_v2, %v259_v1  ;;  %v65_v63 = vld [vmem:[%s6181_s9 + $0x8] sm:$0xff]  ;;  %v70_v1 = vld [vmem:[%s6182_s10 + $0x10] sm:$0xff]  ;;  %v71_v2 = vld [vmem:[%s6182_s10 + $0x18] sm:$0xff] }
 0x198   :  { %v266_v10 = vsel %vm265_vm3, %v264_v6, %v255_v3  ;;  %v5289_v3 = vpack.c.bf16 %v71_v2, %v70_v1  ;;  %v66_v6 = vld [vmem:[%s6181_s9 + $0x10] sm:$0xff] }
 0x199   :  { %v269_v11 = vsel %vm268_vm4, %v266_v10, -inf  ;;  %v67_v10 = vld [vmem:[%s6181_s9 + $0x18] sm:$0xff] }
 0x19a   :  { %270 = vmax.xlane.f32.xlu1 %v269_v11  ;;  %v5298_v11 = vpack.c.bf16 %v67_v10, %v66_v6 }
 0x227   :  { %v271_v13 = vpop.xlane.xlu1 %270 }
 0x228   :  { %v276_v14 = vrot.slane %v271_v13, %v5186_v22  ;;  %v280_v18 = vrot.slane %v271_v13, %v5250_v12  ;;  %v72_v13 = vld [vmem:[%s6182_s10 + $0x20] sm:$0xff] }
 0x22a   :  { %v283_v19 = vsub.f32 %v235_v59, %v276_v14  ;;  %v284_v20 = vsub.f32 %v236_v60, %v276_v14  ;;  %v285_v23 = vsub.f32 %v237_v61, %v280_v18  ;;  %v286_v27 = vsub.f32 %v238_v62, %v280_v18  ;;  %v68_v59 = vld [vmem:[%s6182_s10] sm:$0xff]  ;;  %v69_v60 = vld [vmem:[%s6182_s10 + $0x8] sm:$0xff] }
 0x22b   :  { %v5270_v61 = vpack.c.bf16 %v69_v60, %v68_v59  ;;  %v64_v62 = vld [vmem:[%s6181_s9] sm:$0xff]  ;;  %v73_v14 = vld [vmem:[%s6182_s10 + $0x28] sm:$0xff] }
 0x22c   :  { %v287_v21 = vmul.f32 1.442695, %v283_v19  ;;  %v289_v24 = vmul.f32 1.442695, %v284_v20  ;;  %v291_v28 = vmul.f32 1.442695, %v285_v23  ;;  %v5278_v0 = vpack.c.bf16 %v65_v63, %v64_v62 }
 0x22d   :  { %v293_v31 = vmul.f32 1.442695, %v286_v27  ;;  %4610 = vmatpush3.bf16.msra.mxu1 %v5270_v61  ;;  %v5307_v18 = vpack.c.bf16 %v73_v14, %v72_v13  ;;  %v76_v19 = vld [vmem:[%s6183_s11] sm:$0xff]  ;;  %v77_v20 = vld [vmem:[%s6183_s11 + $0x8] sm:$0xff]  ;;  %v75_v27 = vld [vmem:[%s6182_s10 + $0x38] sm:$0xff] }
 0x22e   :  { %4831 = vpow2.f32 %v287_v21  ;;  %4622 = vmatpush3.bf16.msra.mxu0 %v5278_v0  ;;  %4611 = vmatprep.subr.bf16.mxu1 %v5051_v4  ;;  %v393_v21 = vld [vmem:[%s6173_s1] sm:$0x3]  ;;  %v5320_v23 = vpack.c.bf16 %v77_v20, %v76_v19 }
 0x22f   :  { %4833 = vpow2.f32 %v289_v24  ;;  %4623 = vmatprep.subr.bf16.mxu0 %v5051_v4  ;;  %v74_v24 = vld [vmem:[%s6182_s10 + $0x30] sm:$0xff] }
 0x230   :  { %4835 = vpow2.f32 %v291_v28  ;;  %v78_v28 = vld [vmem:[%s6183_s11 + $0x10] sm:$0xff] }
 0x231   :  { %4837 = vpow2.f32 %v293_v31  ;;  %4613 = vmatpush3.bf16.msra.mxu1 %v5289_v3  ;;  %v79_v31 = vld [vmem:[%s6183_s11 + $0x18] sm:$0xff] }
 0x232   :  { %4625 = vmatpush3.bf16.msra.mxu0 %v5298_v11  ;;  %4614 = vmatprep.subr.bf16.mxu1 %v5051_v4 }
 0x233   :  { %4626 = vmatprep.subr.bf16.mxu0 %v5051_v4 }
 0x235   :  { %4616 = vmatpush3.bf16.msra.mxu1 %v5307_v18  ;;  %4277 = vmatmul.mubr.msk.f32.vlgmr.msra.gmra.mrb[2].mxu0 %vm89_vm1, %v393_v21 }
 0x236   :  { %4628 = vmatpush3.bf16.msra.mxu0 %v5320_v23  ;;  %4617 = vmatprep.subr.bf16.mxu1 %v5051_v4 }
 0x237   :  { %4629 = vmatprep.subr.bf16.mxu0 %v5051_v4  ;;  %4287 = vmatprep.mubr.msk.f32.mxu0 %vm5052_vm0, %v5053_v7 }
 0x238   :  { %v4832_v32 = vpop.eup %4831 }
 0x239   :  { %300 = vperm.xlu1 %4822, %v4832_v32   ;;  %v4834_v15 = vpop.eup %4833 }
 0x23a   :  { %v4836_v33 = vpop.eup %4835 }
 0x23b   :  { %v4838_v34 = vpop.eup %4837 }
 0x23d   :  { %303 = vperm.xlu1 %4822, %v4834_v15  }
 0x241   :  { %306 = vperm.xlu1 %4822, %v4836_v33  }
 0x245   :  { %309 = vperm.xlu1 %4822, %v4838_v34  }
 0x2b8   :  { %v301_v35 = vpop.permute.xlu1 %300 }
 0x2b9   :  { %v314_v41 = vrot.slane %v301_v35, %v5230_v55 }
 0x2bc   :  { %v304_v37 = vpop.permute.xlu1 %303 }
 0x2bd   :  { %v318_v39 = vrot.slane %v304_v37, %v5233_v56 }
 0x2bf   :  { %v319_v44 = vsel %vm254_vm2, %v318_v39, %v314_v41 }
 0x2c0   :  { %v307_v38 = vpop.permute.xlu1 %306 }
 0x2c1   :  { %v323_v42 = vrot.slane %v307_v38, %v5230_v55 }
 0x2c4   :  { %v310_v40 = vpop.permute.xlu1 %309 }
 0x2c5   :  { %v327_v43 = vrot.slane %v310_v40, %v5233_v56 }
 0x2c7   :  { %v328_v45 = vsel %vm254_vm2, %v327_v43, %v323_v42  ;;  %v5379_v43 = vld [vmem:[%s6172_s0 + $0x10] sm:$0xff] }
 0x2c8   :  { %v329_v46 = vsel %vm265_vm3, %v328_v45, %v319_v44  ;;  %v5384_v45 = vld [vmem:[%s6172_s0 + $0x18] sm:$0xff] }
 0x2c9   :  { %v331_v47 = vsel %vm268_vm4, %v329_v46, 0.0 }
 0x2ca   :  { %332 = vadd.xlane.f32.xlu1 %v331_v47 }
 0x357   :  { %v333_v48 = vpop.xlane.xlu1 %332 }
 0x358   :  { %4839 = vrcp.f32 %v333_v48 }
 0x362   :  { %v4840_v49 = vpop.eup %4839 }
 0x363   :  { %v339_v50 = vrot.slane %v4840_v49, %v5186_v22  ;;  %v343_v53 = vrot.slane %v4840_v49, %v5250_v12 }
 0x365   :  { %v346_v51 = vmul.f32 %v4832_v32, %v339_v50  ;;  %v347_v52 = vmul.f32 %v4834_v15, %v339_v50  ;;  %v348_v54 = vmul.f32 %v4836_v33, %v343_v53  ;;  %v349_v57 = vmul.f32 %v4838_v34, %v343_v53  ;;  %v5365_v33 = vld [vmem:[%s6172_s0] sm:$0xff]  ;;  %v5370_v34 = vld [vmem:[%s6172_s0 + $0x8] sm:$0xff] }
 0x366   :  { %v5337_v32 = vpack.c.bf16 %v75_v27, %v74_v24  ;;  %v5341_v15 = vpack.c.bf16 %v79_v31, %v78_v28  ;;  %v538_v28 = vpop.f32.mrb[2].mxu0 }
 0x367   :  { %352 = vperm.xlu0 %4821, %v346_v51   ;;  %v4278_v31 = vpop.f32.mrb[3].mxu0 }
 0x368   :  { %4619 = vmatpush3.bf16.msra.mxu1 %v5337_v32  ;;  %4631 = vmatpush3.bf16.msra.mxu0 %v5341_v15 }
 0x369   :  { %4632 = vmatprep.subr.bf16.mxu1 %v5051_v4  ;;  %4638 = vmatprep.subr.bf16.mxu0 %v5051_v4 }
 0x36b   :  { %357 = vperm.xlu0 %4821, %v347_v52   ;;  %4288 = vmatmul.mubr.msk.f32.vlgmr.msra.gmra.mrb[4].mxu0 %vm89_vm1, %v5166_v9 }
 0x36c   :  { %4640 = vmatpush3.bf16.msra.mxu0 %v5270_v61  ;;  %4317 = vmatprep.mubr.msk.f32.mxu0 %vm5052_vm0, %v5053_v7 }
 0x36d   :  { %4641 = vmatprep.subr.bf16.mxu0 %v5051_v4 }
 0x36f   :  { %362 = vperm.xlu0 %4821, %v348_v54  }
 0x370   :  { %4643 = vmatpush3.bf16.msra.mxu0 %v5289_v3 }
 0x371   :  { %4644 = vmatprep.subr.bf16.mxu0 %v5051_v4 }
 0x373   :  { %367 = vperm.xlu0 %4821, %v349_v57  }
 0x374   :  { %4646 = vmatpush3.bf16.msra.mxu0 %v5307_v18 }
 0x375   :  { %4647 = vmatprep.subr.bf16.mxu0 %v5051_v4 }
 0x378   :  { %4649 = vmatpush3.bf16.msra.mxu0 %v5337_v32 }
 0x379   :  { %4662 = vmatprep.subr.bf16.mxu0 %v5051_v4 }
 0x3e6   :  { %v353_v9 = vpop.permute.xlu0 %352 }
 0x3e7   :  { %v370_v35 = vmul.f32 %v353_v9, %v5365_v33  ;;  %v657_v50 = vrot.slane %v353_v9, %v5230_v55 }
 0x3e9   :  { %v375_v39 = vsel %vm374_vm5, %v370_v35, 0.0 }
 0x3ea   :  { %v358_v37 = vpop.permute.xlu0 %357 }
 0x3eb   :  { %v371_v38 = vmul.f32 %v358_v37, %v5370_v34  ;;  %v661_v46 = vrot.slane %v358_v37, %v5233_v56 }
 0x3ed   :  { %v376_v40 = vsel %vm374_vm5, %v371_v38, 0.0  ;;  %v662_v54 = vsel %vm254_vm2, %v661_v46, %v657_v50  ;;  %v82_v46 = vld [vmem:[%s6175_s3] sm:$0x3] }
 0x3ee   :  { %v377_v41 = vadd.f32 %v376_v40, %v375_v39  ;;  %v363_v42 = vpop.permute.xlu0 %362  ;;  %v5409_v40 = vld [vmem:[%s6184_s12] ss:$0 sm:$0xff] }
 0x3ef   :  { %v372_v47 = vmul.f32 %v363_v42, %v5379_v43  ;;  %v666_v51 = vrot.slane %v363_v42, %v5230_v55 }
 0x3f0   :  { %v378_v44 = vrot.slane %v377_v41, 4 }
 0x3f1   :  { %v384_v57 = vsel %vm374_vm5, %v372_v47, 0.0 }
 0x3f2   :  { %v379_v48 = vadd.f32 %v378_v44, %v377_v41  ;;  %v368_v49 = vpop.permute.xlu0 %367 }
 0x3f3   :  { %v373_v52 = vmul.f32 %v368_v49, %v5384_v45  ;;  %v670_v53 = vrot.slane %v368_v49, %v5233_v56 }
 0x3f4   :  { %v380_v62 = vrot.slane %v379_v48, 2 }
 0x3f5   :  { %v385_v59 = vsel %vm374_vm5, %v373_v52, 0.0  ;;  %v671_v60 = vsel %vm254_vm2, %v670_v53, %v666_v51 }
 0x3f6   :  { %v386_v63 = vadd.f32 %v385_v59, %v384_v57  ;;  %v672_v1 = vsel %vm265_vm3, %v671_v60, %v662_v54  ;;  %v381_v10 = vadd.f32 %v380_v62, %v379_v48 }
 0x3f7   :  { %674 = vst.msk [vmem:[#allocation3] sm:$0x3] %vm268_vm4, %v672_v1 }
 0x3f8   :  { %v387_v2 = vrot.slane %v386_v63, 4  ;;  %v382_v14 = vrot.slane %v381_v10, 1 }
 0x3fa   :  { %v388_v6 = vadd.f32 %v387_v2, %v386_v63  ;;  %v383_v21 = vadd.f32 %v382_v14, %v381_v10  ;;  %v4029_v2 = vld [vmem:[%s6173_s1 + $0x2] sm:$0x3] }
 0x3fc   :  { %v389_v13 = vrot.slane %v388_v6, 2 }
 0x3fe   :  { %v390_v19 = vadd.f32 %v389_v13, %v388_v6 }
 0x400   :  { %v391_v20 = vrot.slane %v390_v19, 1 }
 0x402   :  { %v392_v24 = vadd.f32 %v391_v20, %v390_v19 }
 0x404   :  { %v396_v27 = vsel %vm265_vm3, %v392_v24, %v383_v21 }
 0x405   :  { %4266 = vmatmul.mubr.msk.f32.vlgmr.msra.gmra.mrb[0].mxu1 %vm374_vm5, %v396_v27 }
 0x406   :  { %4634 = vmatpush3.bf16.msra.mxu1 %v5148_v5  ;;  %4298 = vmatprep.mubr.msk.f32.mxu1 %vm5052_vm0, %v5053_v7 }
 0x407   :  { %4635 = vmatprep.subr.bf16.mxu1 %v5051_v4 }
 0x40a   :  { %4637 = vmatpush3.bf16.msra.mxu1 %v5159_v8 }
 0x40b   :  { %4650 = vmatprep.subr.bf16.mxu1 %v5051_v4 }
 0x43e   :  { %v608_v9 = vpop.f32.mrb[4].mxu0 }
 0x43f   :  { %v4289_v35 = vpop.f32.mrb[5].mxu0 }
 0x4d8   :  { %v465_v37 = vpop.f32.mrb[0].mxu1 }
 0x4d9   :  { %v539_v38 = vadd.f32 %v538_v28, %v465_v37  ;;  %v4267_v39 = vpop.f32.mrb[1].mxu1 }
 0x4db   :  { %v612_v41 = vadd.f32 %v608_v9, %v539_v38 }
 0x4dd   :  { %v619_v42 = vadd.f32 %v5409_v40, %v612_v41 }
 0x4df   :  { %4841 = vtanh.f32 %v619_v42  ;;  %v4027_v47 = vmul.f32 -1.442695, %v619_v42 }
 0x4e1   :  { %4843 = vpow2.f32 %v4027_v47 }
 0x4e9   :  { %v4842_v44 = vpop.eup %4841 }
 0x4ea   :  { %633 = vrot.lane.b32.xlu0 %v4842_v44, %s5056_s21 }
 0x4eb   :  { %v4844_v48 = vpop.eup %4843 }
 0x4ec   :  { %v623_v49 = vadd.f32 1.0, %v4844_v48 }
 0x4ee   :  { %628 = vrot.lane.b32.xlu0 %v82_v46, %s5057_s5  ;;  %4845 = vrcp.f32 %v623_v49 }
 0x4f8   :  { %v4846_v50 = vpop.eup %4845 }
 0x55c   :  { %v634_v51 = vpop.permute.xlu0 %633 }
 0x55d   :  { %v636_v52 = vmul.f32 %v4846_v50, %v634_v51 }
 0x55f   :  { %638 = vrot.lane.b32.xlu0 %v636_v52, %s5057_s5 }
 0x560   :  { %v629_v53 = vpop.permute.xlu0 %628 }
 0x561   :  { %v631_v54 = vmul.f32 %v4846_v50, %v629_v53 }
 0x5d1   :  { %v639_v57 = vpop.permute.xlu0 %638 }
 0x5d2   :  { %v5418_v59 = vadd.f32 %v639_v57, %v631_v54 }
 0x5d4   :  { %4847 = vtanh.f32 %v5418_v59 }
 0x5de   :  { %v4848_v60 = vpop.eup %4847 }
 0x5df   :  { %644 = vrot.lane.b32.xlu1 %v4848_v60, %s5056_s21 }
 0x651   :  { %v645_v62 = vpop.permute.xlu1 %644 }
 0x652   :  { %v647_v63 = vmul.f32 %v4846_v50, %v645_v62 }
 0x654   :  { %649 = vrot.lane.b32.xlu0 %v647_v63, %s5057_s5 }
 0x6c6   :  { %v650_v1 = vpop.permute.xlu0 %649 }
 0x6c7   :  { %653 = vst.msk [vmem:[%s6185_s13] sm:$0x3] %vm652_vm6, %v650_v1  ;;  %4299 = vmatmul.mubr.msk.f32.vlgmr.msra.gmra.mrb[2].mxu1 %vm89_vm1, %v650_v1 }
 0x6c8   :  { %4652 = vmatpush3.bf16.msra.mxu1 %v5278_v0  ;;  %4328 = vmatprep.mubr.msk.f32.mxu1 %vm5052_vm0, %v5053_v7 }
 0x6c9   :  { %4653 = vmatprep.subr.bf16.mxu1 %v5051_v4 }
 0x6cc   :  { %4655 = vmatpush3.bf16.msra.mxu1 %v5298_v11 }
 0x6cd   :  { %4656 = vmatprep.subr.bf16.mxu1 %v5051_v4 }
 0x6cf   :  { %4329 = vmatmul.mubr.msk.f32.vlgmr.msra.gmra.mrb[4].mxu1 %vm89_vm1, %v4029_v2 }
 0x6d0   :  { %4658 = vmatpush3.bf16.msra.mxu1 %v5320_v23  ;;  %4339 = vmatprep.mubr.msk.f32.mxu1 %vm5052_vm0, %v5053_v7 }
 0x6d1   :  { %4659 = vmatprep.subr.bf16.mxu1 %v5051_v4 }
 0x6d4   :  { %4661 = vmatpush3.bf16.msra.mxu1 %v5341_v15 }
 0x6d5   :  { %4668 = vmatprep.subr.bf16.mxu1 %v5051_v4 }
 0x6d7   :  { %4340 = vmatmul.mubr.msk.f32.vlgmr.msra.gmra.mrb[6].mxu1 %vm89_vm1, %v650_v1 }
 0x6d8   :  { %4670 = vmatpush3.bf16.msra.mxu1 %v5270_v61  ;;  %4369 = vmatprep.mubr.msk.f32.mxu1 %vm5052_vm0, %v5053_v7 }
 0x6d9   :  { %4671 = vmatprep.subr.bf16.mxu1 %v5051_v4 }
 0x6dc   :  { %4673 = vmatpush3.bf16.msra.mxu1 %v5289_v3 }
 0x6dd   :  { %4674 = vmatprep.subr.bf16.mxu1 %v5051_v4 }
 0x6e0   :  { %4676 = vmatpush3.bf16.msra.mxu1 %v5307_v18 }
 0x6e1   :  { %4677 = vmatprep.subr.bf16.mxu1 %v5051_v4 }
 0x6e4   :  { %4679 = vmatpush3.bf16.msra.mxu1 %v5337_v32 }
 0x6e5   :  { %4692 = vmatprep.subr.bf16.mxu1 %v5051_v4 }
 0x79a   :  { %v743_v6 = vpop.f32.mrb[2].mxu1 }
 0x79b   :  { %v744_v10 = vadd.f32 %v5178_v16, %v743_v6  ;;  %v4300_v13 = vpop.f32.mrb[3].mxu1 }
 0x79d   :  { %v754_v14 = vrot.slane %v744_v10, %v5181_v17 }
 0x79f   :  { %v755_v19 = vcombine.high %v754_v14, %v754_v14  ;;  %v762_v20 = vrot.slane %v754_v14, %v5181_v17 }
 0x7a1   :  { %v769_v21 = vrot.slane %v755_v19, %v5181_v17  ;;  %v773_v24 = vrot.slane %v762_v20, %v5186_v22 }
 0x7a2   :  { %v5460_v27 = vpop.f32.mrb[4].mxu1 }
 0x7a3   :  { %v777_v28 = vrot.slane %v769_v21, %v5186_v22  ;;  %v780_v31 = vadd.f32 %v773_v24, %v5192_v25  ;;  %v781_v9 = vadd.f32 %v773_v24, %v5197_v26  ;;  %v4330_v35 = vpop.f32.mrb[5].mxu1 }
 0x7a5   :  { %v782_v37 = vadd.f32 %v777_v28, %v5204_v29  ;;  %v783_v38 = vadd.f32 %v777_v28, %v5209_v30  ;;  %4849 = vtanh.f32 %v780_v31 }
 0x7a6   :  { %4851 = vtanh.f32 %v781_v9 }
 0x7a7   :  { %4853 = vtanh.f32 %v782_v37 }
 0x7a8   :  { %4855 = vtanh.f32 %v783_v38 }
 0x7aa   :  { %v5467_v39 = vpop.f32.mrb[6].mxu1 }
 0x7ab   :  { %v4341_v41 = vpop.f32.mrb[7].mxu1 }
 0x7af   :  { %v4850_v42 = vpop.eup %4849 }
 0x7b0   :  { %v4852_v44 = vpop.eup %4851  ;;  %v788_v46 = vmul.f32 %v4850_v42, %v5219_v36 }
 0x7b1   :  { %v4854_v47 = vpop.eup %4853  ;;  %v789_v48 = vmul.f32 %v4852_v44, %v5219_v36 }
 0x7b2   :  { %v792_v49 = vsel %vm89_vm1, %v788_v46, 0.0  ;;  %v790_v50 = vmul.f32 %v4854_v47, %v5219_v36  ;;  %v4856_v51 = vpop.eup %4855 }
 0x7b3   :  { %v795_v52 = vsel %vm89_vm1, %v789_v48, 0.0  ;;  %793 = vadd.xlane.f32.xlu0 %v792_v49  ;;  %v791_v54 = vmul.f32 %v4856_v51, %v5219_v36 }
 0x7b4   :  { %796 = vadd.xlane.f32.xlu1 %v795_v52  ;;  %v798_v53 = vsel %vm89_vm1, %v790_v50, 0.0 }
 0x7b5   :  { %v801_v57 = vsel %vm89_vm1, %v791_v54, 0.0 }
 0x7b7   :  { %799 = vadd.xlane.f32.xlu0 %v798_v53 }
 0x7bb   :  { %802 = vadd.xlane.f32.xlu0 %v801_v57 }
 0x840   :  { %v794_v60 = vpop.xlane.xlu0 %793 }
 0x841   :  { %v797_v62 = vpop.xlane.xlu1 %796  ;;  %v804_v2 = vadd.f32 %v794_v60, %v5235_v58 }
 0x842   :  { %v805_v1 = vadd.f32 %v797_v62, %v5235_v58 }
 0x843   :  { %v815_v14 = vrot.slane %v804_v2, %v5230_v55 }
 0x844   :  { %v800_v63 = vpop.xlane.xlu0 %799  ;;  %v819_v13 = vrot.slane %v805_v1, %v5233_v56 }
 0x845   :  { %v806_v6 = vadd.f32 %v800_v63, %v5235_v58 }
 0x846   :  { %v820_v24 = vsel %vm254_vm2, %v819_v13, %v815_v14 }
 0x847   :  { %v824_v20 = vrot.slane %v806_v6, %v5230_v55 }
 0x848   :  { %v803_v10 = vpop.xlane.xlu0 %802 }
 0x849   :  { %v807_v19 = vadd.f32 %v803_v10, %v5235_v58 }
 0x84b   :  { %v828_v21 = vrot.slane %v807_v19, %v5233_v56 }
 0x84d   :  { %v829_v28 = vsel %vm254_vm2, %v828_v21, %v824_v20 }
 0x84e   :  { %v830_v31 = vsel %vm265_vm3, %v829_v28, %v820_v24 }
 0x84f   :  { %v832_v9 = vsel %vm268_vm4, %v830_v31, -inf }
 0x850   :  { %833 = vmax.xlane.f32.xlu0 %v832_v9 }
 0x8dd   :  { %v834_v35 = vpop.xlane.xlu0 %833 }
 0x8de   :  { %v839_v37 = vrot.slane %v834_v35, %v5186_v22  ;;  %v843_v38 = vrot.slane %v834_v35, %v5250_v12 }
 0x8e0   :  { %v846_v41 = vsub.f32 %v804_v2, %v839_v37  ;;  %v847_v42 = vsub.f32 %v805_v1, %v839_v37  ;;  %v849_v44 = vsub.f32 %v807_v19, %v843_v38  ;;  %v848_v46 = vsub.f32 %v806_v6, %v843_v38 }
 0x8e2   :  { %v850_v47 = vmul.f32 1.442695, %v846_v41  ;;  %v852_v48 = vmul.f32 1.442695, %v847_v42  ;;  %v856_v49 = vmul.f32 1.442695, %v849_v44 }
 0x8e3   :  { %v854_v50 = vmul.f32 1.442695, %v848_v46 }
 0x8e4   :  { %4857 = vpow2.f32 %v850_v47 }
 0x8e5   :  { %4859 = vpow2.f32 %v852_v48 }
 0x8e6   :  { %4861 = vpow2.f32 %v856_v49 }
 0x8e7   :  { %4863 = vpow2.f32 %v854_v50 }
 0x8ee   :  { %v4858_v51 = vpop.eup %4857 }
 0x8ef   :  { %v4860_v52 = vpop.eup %4859  ;;  %863 = vperm.xlu0 %4821, %v4858_v51  }
 0x8f0   :  { %866 = vperm.xlu1 %4822, %v4860_v52   ;;  %v4862_v53 = vpop.eup %4861 }
 0x8f1   :  { %v4864_v54 = vpop.eup %4863 }
 0x8f3   :  { %872 = vperm.xlu0 %4821, %v4862_v53  }
 0x8f4   :  { %869 = vperm.xlu1 %4822, %v4864_v54  }
 0x96e   :  { %v864_v57 = vpop.permute.xlu0 %863 }
 0x96f   :  { %v867_v60 = vpop.permute.xlu1 %866  ;;  %v877_v63 = vrot.slane %v864_v57, %v5230_v55 }
 0x970   :  { %v881_v62 = vrot.slane %v867_v60, %v5233_v56 }
 0x972   :  { %v873_v1 = vpop.permute.xlu0 %872  ;;  %v882_v13 = vsel %vm254_vm2, %v881_v62, %v877_v63 }
 0x973   :  { %v870_v2 = vpop.permute.xlu1 %869  ;;  %v890_v6 = vrot.slane %v873_v1, %v5233_v56 }
 0x974   :  { %v886_v10 = vrot.slane %v870_v2, %v5230_v55 }
 0x976   :  { %v891_v14 = vsel %vm254_vm2, %v890_v6, %v886_v10 }
 0x977   :  { %v892_v19 = vsel %vm265_vm3, %v891_v14, %v882_v13 }
 0x978   :  { %v894_v20 = vsel %vm268_vm4, %v892_v19, 0.0 }
 0x979   :  { %895 = vadd.xlane.f32.xlu1 %v894_v20 }
 0xa06   :  { %v896_v21 = vpop.xlane.xlu1 %895 }
 0xa07   :  { %4865 = vrcp.f32 %v896_v21 }
 0xa11   :  { %v4866_v24 = vpop.eup %4865 }
 0xa12   :  { %v902_v28 = vrot.slane %v4866_v24, %v5186_v22  ;;  %v906_v35 = vrot.slane %v4866_v24, %v5250_v12 }
 0xa14   :  { %v909_v31 = vmul.f32 %v4858_v51, %v902_v28  ;;  %v910_v9 = vmul.f32 %v4860_v52, %v902_v28  ;;  %v911_v37 = vmul.f32 %v4864_v54, %v906_v35  ;;  %v912_v38 = vmul.f32 %v4862_v53, %v906_v35 }
 0xa16   :  { %915 = vperm.xlu0 %4821, %v909_v31  }
 0xa1a   :  { %920 = vperm.xlu0 %4821, %v910_v9  }
 0xa1e   :  { %925 = vperm.xlu0 %4821, %v911_v37  }
 0xa22   :  { %930 = vperm.xlu0 %4821, %v912_v38  }
 0xa95   :  { %v916_v41 = vpop.permute.xlu0 %915 }
 0xa96   :  { %v933_v42 = vmul.f32 %v916_v41, %v5365_v33  ;;  %v1210_v60 = vrot.slane %v916_v41, %v5230_v55 }
 0xa98   :  { %v937_v47 = vsel %vm374_vm5, %v933_v42, 0.0 }
 0xa99   :  { %v921_v44 = vpop.permute.xlu0 %920 }
 0xa9a   :  { %v934_v46 = vmul.f32 %v921_v44, %v5370_v34  ;;  %v1214_v52 = vrot.slane %v921_v44, %v5233_v56 }
 0xa9c   :  { %v938_v48 = vsel %vm374_vm5, %v934_v46, 0.0  ;;  %v1215_v2 = vsel %vm254_vm2, %v1214_v52, %v1210_v60 }
 0xa9d   :  { %v939_v49 = vadd.f32 %v938_v48, %v937_v47  ;;  %v926_v50 = vpop.permute.xlu0 %925 }
 0xa9e   :  { %v935_v54 = vmul.f32 %v926_v50, %v5379_v43  ;;  %v1219_v62 = vrot.slane %v926_v50, %v5230_v55 }
 0xa9f   :  { %v940_v51 = vrot.slane %v939_v49, 4 }
 0xaa0   :  { %v946_v6 = vsel %vm374_vm5, %v935_v54, 0.0 }
 0xaa1   :  { %v941_v57 = vadd.f32 %v940_v51, %v939_v49  ;;  %v931_v53 = vpop.permute.xlu0 %930 }
 0xaa2   :  { %v936_v63 = vmul.f32 %v931_v53, %v5384_v45  ;;  %v1223_v1 = vrot.slane %v931_v53, %v5233_v56 }
 0xaa3   :  { %v942_v14 = vrot.slane %v941_v57, 2 }
 0xaa4   :  { %v947_v10 = vsel %vm374_vm5, %v936_v63, 0.0  ;;  %v1224_v13 = vsel %vm254_vm2, %v1223_v1, %v1219_v62 }
 0xaa5   :  { %v948_v19 = vadd.f32 %v947_v10, %v946_v6  ;;  %v1225_v20 = vsel %vm265_vm3, %v1224_v13, %v1215_v2  ;;  %v943_v24 = vadd.f32 %v942_v14, %v941_v57 }
 0xaa6   :  { %1228 = vst.msk [vmem:[#allocation3 + $0x2] sm:$0x3] %vm268_vm4, %v1225_v20 }
 0xaa7   :  { %v949_v21 = vrot.slane %v948_v19, 4  ;;  %v944_v35 = vrot.slane %v943_v24, 1 }
 0xaa9   :  { %v950_v28 = vadd.f32 %v949_v21, %v948_v19  ;;  %v945_v38 = vadd.f32 %v944_v35, %v943_v24 }
 0xaab   :  { %v951_v31 = vrot.slane %v950_v28, 2 }
 0xaad   :  { %v952_v9 = vadd.f32 %v951_v31, %v950_v28 }
 0xaaf   :  { %v953_v37 = vrot.slane %v952_v9, 1 }
 0xab1   :  { %v954_v41 = vadd.f32 %v953_v37, %v952_v9 }
 0xab3   :  { %v959_v42 = vsel %vm265_vm3, %v954_v41, %v945_v38 }
 0xab4   :  { %4318 = vmatmul.mubr.msk.f32.vlgmr.msra.gmra.mrb[6].mxu0 %vm374_vm5, %v959_v42 }
 0xab5   :  { %4664 = vmatpush3.bf16.msra.mxu0 %v5148_v5  ;;  %4350 = vmatprep.mubr.msk.f32.mxu0 %vm5052_vm0, %v5053_v7 }
 0xab6   :  { %4665 = vmatprep.subr.bf16.mxu0 %v5051_v4 }
 0xab9   :  { %4667 = vmatpush3.bf16.msra.mxu0 %v5159_v8 }
 0xaba   :  { %4680 = vmatprep.subr.bf16.mxu0 %v5051_v4 }
 0xb87   :  { %v1028_v44 = vpop.f32.mrb[6].mxu0 }
 0xb88   :  { %v1102_v46 = vadd.f32 %v5460_v27, %v1028_v44  ;;  %v4319_v47 = vpop.f32.mrb[7].mxu0 }
 0xb8a   :  { %v1175_v48 = vadd.f32 %v5467_v39, %v1102_v46 }
 0xb8c   :  { %v1176_v49 = vadd.f32 %v5409_v40, %v1175_v48 }
 0xb8e   :  { %4867 = vtanh.f32 %v1176_v49  ;;  %v4033_v51 = vmul.f32 -1.442695, %v1176_v49 }
 0xb90   :  { %4869 = vpow2.f32 %v4033_v51 }
 0xb98   :  { %v4868_v50 = vpop.eup %4867 }
 0xb99   :  { %1186 = vrot.lane.b32.xlu0 %v4868_v50, %s5056_s21 }
 0xb9a   :  { %v4870_v52 = vpop.eup %4869 }
 0xb9b   :  { %v1180_v54 = vadd.f32 1.0, %v4870_v52 }
 0xb9d   :  { %4871 = vrcp.f32 %v1180_v54 }
 0xba7   :  { %v4872_v57 = vpop.eup %4871 }
 0xba8   :  { %v1184_v27 = vmul.f32 %v4872_v57, %v5418_v59  ;;  %v4036_v59 = vld [vmem:[%s6173_s1 + $0x4] sm:$0x3] }
 0xc0b   :  { %v1187_v53 = vpop.permute.xlu0 %1186 }
 0xc0c   :  { %v1189_v60 = vmul.f32 %v4872_v57, %v1187_v53 }
 0xc0e   :  { %1191 = vrot.lane.b32.xlu0 %v1189_v60, %s5057_s5 }
 0xc80   :  { %v1192_v62 = vpop.permute.xlu0 %1191 }
 0xc81   :  { %v5531_v39 = vadd.f32 %v1192_v62, %v1184_v27 }
 0xc83   :  { %4873 = vtanh.f32 %v5531_v39 }
 0xc8d   :  { %v4874_v63 = vpop.eup %4873 }
 0xc8e   :  { %1197 = vrot.lane.b32.xlu0 %v4874_v63, %s5056_s21 }
 0xd00   :  { %v1198_v1 = vpop.permute.xlu0 %1197 }
 0xd01   :  { %v1200_v2 = vmul.f32 %v4872_v57, %v1198_v1 }
 0xd03   :  { %1202 = vrot.lane.b32.xlu0 %v1200_v2, %s5057_s5 }
 0xd75   :  { %v1203_v6 = vpop.permute.xlu0 %1202 }
 0xd76   :  { %4034 = vst.msk [vmem:[%s6185_s13 + $0x2] sm:$0x3] %vm652_vm6, %v1203_v6  ;;  %4351 = vmatmul.mubr.msk.f32.vlgmr.msra.gmra.mrb[8].mxu0 %vm89_vm1, %v1203_v6 }
 0xd77   :  { %4682 = vmatpush3.bf16.msra.mxu0 %v5278_v0  ;;  %4380 = vmatprep.mubr.msk.f32.mxu0 %vm5052_vm0, %v5053_v7 }
 0xd78   :  { %4683 = vmatprep.subr.bf16.mxu0 %v5051_v4 }
 0xd7b   :  { %4685 = vmatpush3.bf16.msra.mxu0 %v5298_v11 }
 0xd7c   :  { %4686 = vmatprep.subr.bf16.mxu0 %v5051_v4 }
 0xd7e   :  { %4381 = vmatmul.mubr.msk.f32.vlgmr.msra.gmra.mrb[10].mxu0 %vm89_vm1, %v4036_v59 }
 0xd7f   :  { %4688 = vmatpush3.bf16.msra.mxu0 %v5320_v23  ;;  %4391 = vmatprep.mubr.msk.f32.mxu0 %vm5052_vm0, %v5053_v7 }
 0xd80   :  { %4689 = vmatprep.subr.bf16.mxu0 %v5051_v4 }
 0xd83   :  { %4691 = vmatpush3.bf16.msra.mxu0 %v5341_v15 }
 0xd84   :  { %4698 = vmatprep.subr.bf16.mxu0 %v5051_v4 }
 0xd86   :  { %4392 = vmatmul.mubr.msk.f32.vlgmr.msra.gmra.mrb[12].mxu0 %vm89_vm1, %v1203_v6 }
 0xd87   :  { %4700 = vmatpush3.bf16.msra.mxu0 %v5270_v61  ;;  %4421 = vmatprep.mubr.msk.f32.mxu0 %vm5052_vm0, %v5053_v7 }
 0xd88   :  { %4701 = vmatprep.subr.bf16.mxu0 %v5051_v4 }
 0xd8b   :  { %4703 = vmatpush3.bf16.msra.mxu0 %v5289_v3 }
 0xd8c   :  { %4704 = vmatprep.subr.bf16.mxu0 %v5051_v4 }
 0xd8f   :  { %4706 = vmatpush3.bf16.msra.mxu0 %v5307_v18 }
 0xd90   :  { %4707 = vmatprep.subr.bf16.mxu0 %v5051_v4 }
 0xd93   :  { %4709 = vmatpush3.bf16.msra.mxu0 %v5337_v32 }
 0xd94   :  { %4722 = vmatprep.subr.bf16.mxu0 %v5051_v4 }
 0xe49   :  { %v1297_v10 = vpop.f32.mrb[8].mxu0 }
 0xe4a   :  { %v1298_v13 = vadd.f32 %v5178_v16, %v1297_v10  ;;  %v4352_v14 = vpop.f32.mrb[9].mxu0 }
 0xe4c   :  { %v1308_v19 = vrot.slane %v1298_v13, %v5181_v17 }
 0xe4e   :  { %v1309_v20 = vcombine.high %v1308_v19, %v1308_v19  ;;  %v1316_v21 = vrot.slane %v1308_v19, %v5181_v17 }
 0xe50   :  { %v1323_v24 = vrot.slane %v1309_v20, %v5181_v17  ;;  %v1327_v28 = vrot.slane %v1316_v21, %v5186_v22 }
 0xe51   :  { %v5573_v31 = vpop.f32.mrb[10].mxu0 }
 0xe52   :  { %v1331_v9 = vrot.slane %v1323_v24, %v5186_v22  ;;  %v1334_v35 = vadd.f32 %v1327_v28, %v5192_v25  ;;  %v1335_v37 = vadd.f32 %v1327_v28, %v5197_v26  ;;  %v4382_v38 = vpop.f32.mrb[11].mxu0 }
 0xe54   :  { %v1336_v16 = vadd.f32 %v1331_v9, %v5204_v29  ;;  %4875 = vtanh.f32 %v1334_v35  ;;  %v1337_v41 = vadd.f32 %v1331_v9, %v5209_v30 }
 0xe55   :  { %4877 = vtanh.f32 %v1335_v37 }
 0xe56   :  { %4879 = vtanh.f32 %v1336_v16 }
 0xe57   :  { %4881 = vtanh.f32 %v1337_v41 }
 0xe59   :  { %v5580_v42 = vpop.f32.mrb[12].mxu0 }
 0xe5a   :  { %v4393_v44 = vpop.f32.mrb[13].mxu0 }
 0xe5e   :  { %v4876_v46 = vpop.eup %4875 }
 0xe5f   :  { %v4878_v47 = vpop.eup %4877  ;;  %v1342_v48 = vmul.f32 %v4876_v46, %v5219_v36 }
 0xe60   :  { %v4880_v49 = vpop.eup %4879  ;;  %v1343_v25 = vmul.f32 %v4878_v47, %v5219_v36 }
 0xe61   :  { %v1346_v26 = vsel %vm89_vm1, %v1342_v48, 0.0  ;;  %v1344_v30 = vmul.f32 %v4880_v49, %v5219_v36  ;;  %v4882_v50 = vpop.eup %4881 }
 0xe62   :  { %v1349_v29 = vsel %vm89_vm1, %v1343_v25, 0.0  ;;  %1347 = vadd.xlane.f32.xlu0 %v1346_v26  ;;  %v1345_v52 = vmul.f32 %v4882_v50, %v5219_v36 }
 0xe63   :  { %1350 = vadd.xlane.f32.xlu1 %v1349_v29  ;;  %v1352_v51 = vsel %vm89_vm1, %v1344_v30, 0.0 }
 0xe64   :  { %v1355_v54 = vsel %vm89_vm1, %v1345_v52, 0.0 }
 0xe67   :  { %1353 = vadd.xlane.f32.xlu1 %v1352_v51 }
 0xe6b   :  { %1356 = vadd.xlane.f32.xlu1 %v1355_v54 }
 0xeef   :  { %v1348_v53 = vpop.xlane.xlu0 %1347 }
 0xef0   :  { %v1351_v57 = vpop.xlane.xlu1 %1350  ;;  %v1358_v62 = vadd.f32 %v1348_v53, %v5235_v58 }
 0xef1   :  { %v1359_v27 = vadd.f32 %v1351_v57, %v5235_v58 }
 0xef2   :  { %v1369_v6 = vrot.slane %v1358_v62, %v5230_v55 }
 0xef3   :  { %v1373_v2 = vrot.slane %v1359_v27, %v5233_v56 }
 0xef4   :  { %v1354_v60 = vpop.xlane.xlu1 %1353 }
 0xef5   :  { %v1360_v63 = vadd.f32 %v1354_v60, %v5235_v58  ;;  %v1374_v13 = vsel %vm254_vm2, %v1373_v2, %v1369_v6 }
 0xef7   :  { %v1378_v59 = vrot.slane %v1360_v63, %v5230_v55 }
 0xef8   :  { %v1357_v1 = vpop.xlane.xlu1 %1356 }
 0xef9   :  { %v1361_v36 = vadd.f32 %v1357_v1, %v5235_v58 }
 0xefb   :  { %v1382_v10 = vrot.slane %v1361_v36, %v5233_v56 }
 0xefd   :  { %v1383_v14 = vsel %vm254_vm2, %v1382_v10, %v1378_v59 }
 0xefe   :  { %v1384_v19 = vsel %vm265_vm3, %v1383_v14, %v1374_v13 }
 0xeff   :  { %v1386_v20 = vsel %vm268_vm4, %v1384_v19, -inf }
 0xf00   :  { %1387 = vmax.xlane.f32.xlu1 %v1386_v20 }
 0xf8d   :  { %v1388_v21 = vpop.xlane.xlu1 %1387 }
 0xf8e   :  { %v1393_v24 = vrot.slane %v1388_v21, %v5186_v22  ;;  %v1397_v28 = vrot.slane %v1388_v21, %v5250_v12 }
 0xf90   :  { %v1400_v9 = vsub.f32 %v1358_v62, %v1393_v24  ;;  %v1401_v35 = vsub.f32 %v1359_v27, %v1393_v24  ;;  %v1402_v37 = vsub.f32 %v1360_v63, %v1397_v28  ;;  %v1403_v41 = vsub.f32 %v1361_v36, %v1397_v28 }
 0xf92   :  { %v1404_v38 = vmul.f32 1.442695, %v1400_v9  ;;  %v1406_v16 = vmul.f32 1.442695, %v1401_v35  ;;  %v1408_v44 = vmul.f32 1.442695, %v1402_v37 }
 0xf93   :  { %v1410_v46 = vmul.f32 1.442695, %v1403_v41 }
 0xf94   :  { %4883 = vpow2.f32 %v1404_v38 }
 0xf95   :  { %4885 = vpow2.f32 %v1406_v16 }
 0xf96   :  { %4887 = vpow2.f32 %v1408_v44 }
 0xf97   :  { %4889 = vpow2.f32 %v1410_v46 }
 0xf9e   :  { %v4884_v47 = vpop.eup %4883 }
 0xf9f   :  { %v4886_v48 = vpop.eup %4885  ;;  %1417 = vperm.xlu1 %4822, %v4884_v47  }
 0xfa0   :  { %1420 = vperm.xlu0 %4821, %v4886_v48   ;;  %v4888_v49 = vpop.eup %4887 }
 0xfa1   :  { %v4890_v25 = vpop.eup %4889 }
 0xfa3   :  { %1423 = vperm.xlu1 %4822, %v4888_v49  }
 0xfa7   :  { %1426 = vperm.xlu1 %4822, %v4890_v25  }
0x101e   :  { %v1418_v26 = vpop.permute.xlu1 %1417 }
0x101f   :  { %v1421_v29 = vpop.permute.xlu0 %1420  ;;  %v1431_v51 = vrot.slane %v1418_v26, %v5230_v55 }
0x1020   :  { %v1435_v50 = vrot.slane %v1421_v29, %v5233_v56 }
0x1022   :  { %v1424_v30 = vpop.permute.xlu1 %1423  ;;  %v1436_v53 = vsel %vm254_vm2, %v1435_v50, %v1431_v51 }
0x1023   :  { %v1440_v54 = vrot.slane %v1424_v30, %v5230_v55 }
0x1026   :  { %v1427_v52 = vpop.permute.xlu1 %1426 }
0x1027   :  { %v1444_v57 = vrot.slane %v1427_v52, %v5233_v56 }
0x1029   :  { %v1445_v60 = vsel %vm254_vm2, %v1444_v57, %v1440_v54 }
0x102a   :  { %v1446_v27 = vsel %vm265_vm3, %v1445_v60, %v1436_v53 }
0x102b   :  { %v1448_v62 = vsel %vm268_vm4, %v1446_v27, 0.0 }
0x102c   :  { %1449 = vadd.xlane.f32.xlu1 %v1448_v62 }
0x10b9   :  { %v1450_v63 = vpop.xlane.xlu1 %1449 }
0x10ba   :  { %4891 = vrcp.f32 %v1450_v63 }
0x10c4   :  { %v4892_v1 = vpop.eup %4891 }
0x10c5   :  { %v1456_v2 = vrot.slane %v4892_v1, %v5186_v22  ;;  %v1460_v59 = vrot.slane %v4892_v1, %v5250_v12 }
0x10c7   :  { %v1463_v6 = vmul.f32 %v4884_v47, %v1456_v2  ;;  %v1464_v36 = vmul.f32 %v4886_v48, %v1456_v2  ;;  %v1465_v10 = vmul.f32 %v4888_v49, %v1460_v59  ;;  %v1466_v13 = vmul.f32 %v4890_v25, %v1460_v59 }
0x10c9   :  { %1469 = vperm.xlu0 %4821, %v1463_v6  }
0x10cd   :  { %1474 = vperm.xlu0 %4821, %v1464_v36  }
0x10d1   :  { %1479 = vperm.xlu0 %4821, %v1465_v10  }
0x10d5   :  { %1484 = vperm.xlu0 %4821, %v1466_v13  }
0x1148   :  { %v1470_v14 = vpop.permute.xlu0 %1469 }
0x1149   :  { %v1487_v19 = vmul.f32 %v1470_v14, %v5365_v33  ;;  %v1764_v46 = vrot.slane %v1470_v14, %v5230_v55 }
0x114b   :  { %v1491_v24 = vsel %vm374_vm5, %v1487_v19, 0.0 }
0x114c   :  { %v1475_v20 = vpop.permute.xlu0 %1474 }
0x114d   :  { %v1488_v21 = vmul.f32 %v1475_v20, %v5370_v34  ;;  %v1768_v38 = vrot.slane %v1475_v20, %v5233_v56 }
0x114f   :  { %v1492_v28 = vsel %vm374_vm5, %v1488_v21, 0.0  ;;  %v1769_v48 = vsel %vm254_vm2, %v1768_v38, %v1764_v46  ;;  %v5684_v38 = vld [vmem:[%s6178_s6] ss:$0 sm:$0xff] }
0x1150   :  { %v1493_v9 = vadd.f32 %v1492_v28, %v1491_v24  ;;  %v1480_v35 = vpop.permute.xlu0 %1479 }
0x1151   :  { %v1489_v16 = vmul.f32 %v1480_v35, %v5379_v43  ;;  %v1773_v33 = vrot.slane %v1480_v35, %v5230_v55 }
0x1152   :  { %v1494_v37 = vrot.slane %v1493_v9, 4 }
0x1153   :  { %v1500_v49 = vsel %vm374_vm5, %v1489_v16, 0.0 }
0x1154   :  { %v1495_v41 = vadd.f32 %v1494_v37, %v1493_v9  ;;  %v1485_v44 = vpop.permute.xlu0 %1484 }
0x1155   :  { %v1490_v47 = vmul.f32 %v1485_v44, %v5384_v45  ;;  %v1777_v34 = vrot.slane %v1485_v44, %v5233_v56 }
0x1156   :  { %v1496_v29 = vrot.slane %v1495_v41, 2 }
0x1157   :  { %v1501_v25 = vsel %vm374_vm5, %v1490_v47, 0.0  ;;  %v1778_v26 = vsel %vm254_vm2, %v1777_v34, %v1773_v33 }
0x1158   :  { %v1502_v43 = vadd.f32 %v1501_v25, %v1500_v49  ;;  %v1779_v30 = vsel %vm265_vm3, %v1778_v26, %v1769_v48  ;;  %v1497_v51 = vadd.f32 %v1496_v29, %v1495_v41  ;;  %v5697_v25 = vld [vmem:[%s6176_s4] sm:$0xff]  ;;  %v5703_v29 = vld [vmem:[%s6176_s4 + $0x8] sm:$0xff] }
0x1159   :  { %1782 = vst.msk [vmem:[#allocation3 + $0x4] sm:$0x3] %vm268_vm4, %v1779_v30 }
0x115a   :  { %v1503_v50 = vrot.slane %v1502_v43, 4  ;;  %v1498_v54 = vrot.slane %v1497_v51, 1 }
0x115c   :  { %v1504_v52 = vadd.f32 %v1503_v50, %v1502_v43  ;;  %v1499_v60 = vadd.f32 %v1498_v54, %v1497_v51  ;;  %v5709_v50 = vld [vmem:[%s6176_s4 + $0x10] sm:$0xff] }
0x115e   :  { %v1505_v45 = vrot.slane %v1504_v52, 2 }
0x1160   :  { %v1506_v57 = vadd.f32 %v1505_v45, %v1504_v52  ;;  %v5715_v52 = vld [vmem:[%s6176_s4 + $0x18] sm:$0xff] }
0x1162   :  { %v1507_v53 = vrot.slane %v1506_v57, 1 }
0x1164   :  { %v1508_v27 = vadd.f32 %v1507_v53, %v1506_v57 }
0x1166   :  { %v1513_v62 = vsel %vm265_vm3, %v1508_v27, %v1499_v60  ;;  %v5723_v27 = vld [vmem:[%s6179_s7] ss:$0 sm:$0xff] }
0x1167   :  { %4370 = vmatmul.mubr.msk.f32.vlgmr.msra.gmra.mrb[8].mxu1 %vm374_vm5, %v1513_v62 }
0x1168   :  { %4694 = vmatpush3.bf16.msra.mxu1 %v5148_v5  ;;  %4402 = vmatprep.mubr.msk.f32.mxu1 %vm5052_vm0, %v5053_v7 }
0x1169   :  { %4695 = vmatprep.subr.bf16.mxu1 %v5051_v4 }
0x116c   :  { %4697 = vmatpush3.bf16.msra.mxu1 %v5159_v8 }
0x116d   :  { %4710 = vmatprep.subr.bf16.mxu1 %v5051_v4 }
0x123a   :  { %v1582_v63 = vpop.f32.mrb[8].mxu1 }
0x123b   :  { %v1656_v1 = vadd.f32 %v5573_v31, %v1582_v63  ;;  %v4371_v2 = vpop.f32.mrb[9].mxu1 }
0x123d   :  { %v1729_v6 = vadd.f32 %v5580_v42, %v1656_v1 }
0x123f   :  { %v1730_v36 = vadd.f32 %v5409_v40, %v1729_v6 }
0x1241   :  { %4893 = vtanh.f32 %v1730_v36  ;;  %v4040_v10 = vmul.f32 -1.442695, %v1730_v36 }
0x1243   :  { %4895 = vpow2.f32 %v4040_v10 }
0x124b   :  { %v4894_v59 = vpop.eup %4893 }
0x124c   :  { %1740 = vrot.lane.b32.xlu0 %v4894_v59, %s5056_s21 }
0x124d   :  { %v4896_v13 = vpop.eup %4895 }
0x124e   :  { %v1734_v14 = vadd.f32 1.0, %v4896_v13 }
0x1250   :  { %4897 = vrcp.f32 %v1734_v14 }
0x125a   :  { %v4898_v19 = vpop.eup %4897 }
0x125b   :  { %v1738_v31 = vmul.f32 %v4898_v19, %v5531_v39  ;;  %v4043_v39 = vld [vmem:[%s6173_s1 + $0x6] sm:$0x3] }
0x12be   :  { %v1741_v20 = vpop.permute.xlu0 %1740 }
0x12bf   :  { %v1743_v21 = vmul.f32 %v4898_v19, %v1741_v20 }
0x12c1   :  { %1745 = vrot.lane.b32.xlu0 %v1743_v21, %s5057_s5 }
0x1333   :  { %v1746_v24 = vpop.permute.xlu0 %1745 }
0x1334   :  { %v5644_v42 = vadd.f32 %v1746_v24, %v1738_v31 }
0x1336   :  { %4899 = vtanh.f32 %v5644_v42 }
0x1340   :  { %v4900_v40 = vpop.eup %4899 }
0x1341   :  { %1751 = vrot.lane.b32.xlu0 %v4900_v40, %s5056_s21 }
0x13b3   :  { %v1752_v28 = vpop.permute.xlu0 %1751 }
0x13b4   :  { %v1754_v9 = vmul.f32 %v4898_v19, %v1752_v28 }
0x13b6   :  { %1756 = vrot.lane.b32.xlu1 %v1754_v9, %s5057_s5 }
0x1428   :  { %v1757_v35 = vpop.permute.xlu1 %1756 }
0x1429   :  { %4041 = vst.msk [vmem:[%s6185_s13 + $0x4] sm:$0x3] %vm652_vm6, %v1757_v35  ;;  %4403 = vmatmul.mubr.msk.f32.vlgmr.msra.gmra.mrb[10].mxu1 %vm89_vm1, %v1757_v35 }
0x142a   :  { %4712 = vmatpush3.bf16.msra.mxu1 %v5278_v0  ;;  %4432 = vmatprep.mubr.msk.f32.mxu1 %vm5052_vm0, %v5053_v7 }
0x142b   :  { %4713 = vmatprep.subr.bf16.mxu1 %v5051_v4 }
0x142e   :  { %4715 = vmatpush3.bf16.msra.mxu1 %v5298_v11 }
0x142f   :  { %4716 = vmatprep.subr.bf16.mxu1 %v5051_v4 }
0x1431   :  { %4433 = vmatmul.mubr.msk.f32.vlgmr.msra.gmra.mrb[12].mxu1 %vm89_vm1, %v4043_v39 }
0x1432   :  { %4718 = vmatpush3.bf16.msra.mxu1 %v5320_v23  ;;  %4443 = vmatprep.mubr.msk.f32.mxu1 %vm5052_vm0, %v5053_v7 }
0x1433   :  { %4719 = vmatprep.subr.bf16.mxu1 %v5051_v4 }
0x1436   :  { %4721 = vmatpush3.bf16.msra.mxu1 %v5341_v15 }
0x1437   :  { %4728 = vmatprep.subr.bf16.mxu1 %v5051_v4 }
0x1439   :  { %4444 = vmatmul.mubr.msk.f32.vlgmr.msra.gmra.mrb[14].mxu1 %vm89_vm1, %v1757_v35 }
0x143a   :  { %4730 = vmatpush3.bf16.msra.mxu1 %v5270_v61  ;;  %4473 = vmatprep.mubr.msk.f32.mxu1 %vm5052_vm0, %v5053_v7 }
0x143b   :  { %4731 = vmatprep.subr.bf16.mxu1 %v5051_v4 }
0x143e   :  { %4733 = vmatpush3.bf16.msra.mxu1 %v5289_v3 }
0x143f   :  { %4734 = vmatprep.subr.bf16.mxu1 %v5051_v4 }
0x1442   :  { %4736 = vmatpush3.bf16.msra.mxu1 %v5307_v18 }
0x1443   :  { %4737 = vmatprep.subr.bf16.mxu1 %v5051_v4 }
0x1446   :  { %4739 = vmatpush3.bf16.msra.mxu1 %v5337_v32 }
0x1447   :  { %4752 = vmatprep.subr.bf16.mxu1 %v5051_v4 }
0x14fc   :  { %v1851_v37 = vpop.f32.mrb[10].mxu1 }
0x14fd   :  { %v1852_v16 = vadd.f32 %v5684_v38, %v1851_v37  ;;  %v4404_v41 = vpop.f32.mrb[11].mxu1 }
0x14ff   :  { %v1862_v44 = vrot.slane %v1852_v16, %v5181_v17 }
0x1501   :  { %v1863_v46 = vcombine.high %v1862_v44, %v1862_v44  ;;  %v1870_v33 = vrot.slane %v1862_v44, %v5181_v17 }
0x1503   :  { %v1877_v47 = vrot.slane %v1863_v46, %v5181_v17  ;;  %v1881_v34 = vrot.slane %v1870_v33, %v5186_v22 }
0x1504   :  { %v5691_v48 = vpop.f32.mrb[12].mxu1 }
0x1505   :  { %v1885_v49 = vrot.slane %v1877_v47, %v5186_v22  ;;  %v1888_v26 = vadd.f32 %v5697_v25, %v1881_v34  ;;  %v1889_v43 = vadd.f32 %v5703_v29, %v1881_v34  ;;  %v4434_v30 = vpop.f32.mrb[13].mxu1 }
0x1507   :  { %v1890_v51 = vadd.f32 %v5709_v50, %v1885_v49  ;;  %v1891_v45 = vadd.f32 %v5715_v52, %v1885_v49  ;;  %4901 = vtanh.f32 %v1888_v26 }
0x1508   :  { %4903 = vtanh.f32 %v1889_v43 }
0x1509   :  { %4905 = vtanh.f32 %v1890_v51 }
0x150a   :  { %4907 = vtanh.f32 %v1891_v45 }
0x150c   :  { %v5718_v54 = vpop.f32.mrb[14].mxu1 }
0x150d   :  { %v4445_v57 = vpop.f32.mrb[15].mxu1 }
0x1511   :  { %v4902_v53 = vpop.eup %4901 }
0x1512   :  { %v4904_v60 = vpop.eup %4903  ;;  %v1896_v62 = vmul.f32 %v5723_v27, %v4902_v53 }
0x1513   :  { %v4906_v63 = vpop.eup %4905  ;;  %v1897_v1 = vmul.f32 %v5723_v27, %v4904_v60 }
0x1514   :  { %v1900_v2 = vsel %vm89_vm1, %v1896_v62, 0.0  ;;  %v1898_v6 = vmul.f32 %v5723_v27, %v4906_v63  ;;  %v4908_v36 = vpop.eup %4907 }
0x1515   :  { %v1903_v59 = vsel %vm89_vm1, %v1897_v1, 0.0  ;;  %1901 = vadd.xlane.f32.xlu0 %v1900_v2  ;;  %v1899_v13 = vmul.f32 %v5723_v27, %v4908_v36 }
0x1516   :  { %1904 = vadd.xlane.f32.xlu1 %v1903_v59  ;;  %v1906_v10 = vsel %vm89_vm1, %v1898_v6, 0.0 }
0x1517   :  { %v1909_v14 = vsel %vm89_vm1, %v1899_v13, 0.0 }
0x1519   :  { %1907 = vadd.xlane.f32.xlu0 %v1906_v10 }
0x151d   :  { %1910 = vadd.xlane.f32.xlu0 %v1909_v14 }
0x15a2   :  { %v1902_v19 = vpop.xlane.xlu0 %1901 }
0x15a3   :  { %v1905_v20 = vpop.xlane.xlu1 %1904  ;;  %v1912_v24 = vadd.f32 %v1902_v19, %v5235_v58 }
0x15a4   :  { %v1913_v31 = vadd.f32 %v1905_v20, %v5235_v58 }
0x15a5   :  { %v1923_v35 = vrot.slane %v1912_v24, %v5230_v55 }
0x15a6   :  { %v1908_v21 = vpop.xlane.xlu0 %1907  ;;  %v1927_v9 = vrot.slane %v1913_v31, %v5233_v56 }
0x15a7   :  { %v1914_v40 = vadd.f32 %v1908_v21, %v5235_v58 }
0x15a8   :  { %v1928_v41 = vsel %vm254_vm2, %v1927_v9, %v1923_v35 }
0x15a9   :  { %v1932_v37 = vrot.slane %v1914_v40, %v5230_v55 }
0x15aa   :  { %v1911_v28 = vpop.xlane.xlu0 %1910 }
0x15ab   :  { %v1915_v39 = vadd.f32 %v1911_v28, %v5235_v58 }
0x15ad   :  { %v1936_v16 = vrot.slane %v1915_v39, %v5233_v56 }
0x15af   :  { %v1937_v44 = vsel %vm254_vm2, %v1936_v16, %v1932_v37 }
0x15b0   :  { %v1938_v46 = vsel %vm265_vm3, %v1937_v44, %v1928_v41 }
0x15b1   :  { %v1940_v33 = vsel %vm268_vm4, %v1938_v46, -inf }
0x15b2   :  { %1941 = vmax.xlane.f32.xlu0 %v1940_v33  ;;  %v5760_v33 = vld [vmem:[%s6172_s0] sm:$0xff] }
0x163f   :  { %v1942_v47 = vpop.xlane.xlu0 %1941 }
0x1640   :  { %v1947_v34 = vrot.slane %v1942_v47, %v5186_v22  ;;  %v1951_v49 = vrot.slane %v1942_v47, %v5250_v12 }
0x1642   :  { %v1954_v26 = vsub.f32 %v1912_v24, %v1947_v34  ;;  %v1955_v43 = vsub.f32 %v1913_v31, %v1947_v34  ;;  %v1956_v30 = vsub.f32 %v1914_v40, %v1951_v49  ;;  %v1957_v51 = vsub.f32 %v1915_v39, %v1951_v49  ;;  %v5766_v49 = vld [vmem:[%s6172_s0 + $0x8] sm:$0xff] }
0x1644   :  { %v1958_v45 = vmul.f32 1.442695, %v1954_v26  ;;  %v1960_v57 = vmul.f32 1.442695, %v1955_v43  ;;  %v1962_v53 = vmul.f32 1.442695, %v1956_v30 }
0x1645   :  { %v1964_v60 = vmul.f32 1.442695, %v1957_v51 }
0x1646   :  { %4909 = vpow2.f32 %v1958_v45 }
0x1647   :  { %4911 = vpow2.f32 %v1960_v57 }
0x1648   :  { %4913 = vpow2.f32 %v1962_v53 }
0x1649   :  { %4915 = vpow2.f32 %v1964_v60  ;;  %v5775_v60 = vld [vmem:[%s6172_s0 + $0x10] sm:$0xff] }
0x1650   :  { %v4910_v62 = vpop.eup %4909 }
0x1651   :  { %v4912_v63 = vpop.eup %4911  ;;  %1971 = vperm.xlu0 %4821, %v4910_v62  }
0x1652   :  { %1974 = vperm.xlu1 %4822, %v4912_v63   ;;  %v4914_v1 = vpop.eup %4913 }
0x1653   :  { %v4916_v2 = vpop.eup %4915 }
0x1655   :  { %1977 = vperm.xlu0 %4821, %v4914_v1  }
0x1656   :  { %1980 = vperm.xlu1 %4822, %v4916_v2  }
0x16d0   :  { %v1972_v6 = vpop.permute.xlu0 %1971 }
0x16d1   :  { %v1975_v36 = vpop.permute.xlu1 %1974  ;;  %v1985_v10 = vrot.slane %v1972_v6, %v5230_v55 }
0x16d2   :  { %v1989_v59 = vrot.slane %v1975_v36, %v5233_v56  ;;  %v5783_v36 = vld [vmem:[%s6172_s0 + $0x18] sm:$0xff] }
0x16d4   :  { %v1978_v13 = vpop.permute.xlu0 %1977  ;;  %v1990_v21 = vsel %vm254_vm2, %v1989_v59, %v1985_v10 }
0x16d5   :  { %v1981_v14 = vpop.permute.xlu1 %1980  ;;  %v1994_v19 = vrot.slane %v1978_v13, %v5230_v55 }
0x16d6   :  { %v1998_v20 = vrot.slane %v1981_v14, %v5233_v56 }
0x16d8   :  { %v1999_v31 = vsel %vm254_vm2, %v1998_v20, %v1994_v19 }
0x16d9   :  { %v2000_v24 = vsel %vm265_vm3, %v1999_v31, %v1990_v21 }
0x16da   :  { %v2002_v40 = vsel %vm268_vm4, %v2000_v24, 0.0 }
0x16db   :  { %2003 = vadd.xlane.f32.xlu0 %v2002_v40 }
0x1768   :  { %v2004_v28 = vpop.xlane.xlu0 %2003 }
0x1769   :  { %4917 = vrcp.f32 %v2004_v28 }
0x1773   :  { %v4918_v9 = vpop.eup %4917 }
0x1774   :  { %v2010_v35 = vrot.slane %v4918_v9, %v5186_v22  ;;  %v2014_v16 = vrot.slane %v4918_v9, %v5250_v12 }
0x1776   :  { %v2017_v39 = vmul.f32 %v4910_v62, %v2010_v35  ;;  %v2018_v37 = vmul.f32 %v4912_v63, %v2010_v35  ;;  %v2019_v41 = vmul.f32 %v4914_v1, %v2014_v16  ;;  %v2020_v44 = vmul.f32 %v4916_v2, %v2014_v16 }
0x1778   :  { %2023 = vperm.xlu1 %4822, %v2017_v39  }
0x177c   :  { %2028 = vperm.xlu1 %4822, %v2018_v37  }
0x1780   :  { %2033 = vperm.xlu1 %4822, %v2019_v41  }
0x1784   :  { %2038 = vperm.xlu1 %4822, %v2020_v44  }
0x17f7   :  { %v2024_v46 = vpop.permute.xlu1 %2023 }
0x17f8   :  { %v2041_v47 = vmul.f32 %v5760_v33, %v2024_v46  ;;  %v2318_v2 = vrot.slane %v2024_v46, %v5230_v55 }
0x17fa   :  { %v2045_v43 = vsel %vm374_vm5, %v2041_v47, 0.0 }
0x17fb   :  { %v2029_v34 = vpop.permute.xlu1 %2028 }
0x17fc   :  { %v2042_v26 = vmul.f32 %v5766_v49, %v2029_v34  ;;  %v2322_v53 = vrot.slane %v2029_v34, %v5233_v56 }
0x17fe   :  { %v2046_v30 = vsel %vm374_vm5, %v2042_v26, 0.0  ;;  %v2323_v13 = vsel %vm254_vm2, %v2322_v53, %v2318_v2 }
0x17ff   :  { %v2047_v51 = vadd.f32 %v2046_v30, %v2045_v43  ;;  %v2034_v45 = vpop.permute.xlu1 %2033  ;;  %v5806_v30 = vld [vmem:[%s6184_s12] ss:$0 sm:$0xff] }
0x1800   :  { %v2043_v62 = vmul.f32 %v5775_v60, %v2034_v45  ;;  %v2327_v6 = vrot.slane %v2034_v45, %v5230_v55 }
0x1801   :  { %v2048_v57 = vrot.slane %v2047_v51, 4 }
0x1802   :  { %v2054_v14 = vsel %vm374_vm5, %v2043_v62, 0.0 }
0x1803   :  { %v2049_v63 = vadd.f32 %v2048_v57, %v2047_v51  ;;  %v2039_v1 = vpop.permute.xlu1 %2038 }
0x1804   :  { %v2044_v59 = vmul.f32 %v5783_v36, %v2039_v1  ;;  %v2331_v10 = vrot.slane %v2039_v1, %v5233_v56 }
0x1805   :  { %v2050_v21 = vrot.slane %v2049_v63, 2 }
0x1806   :  { %v2055_v19 = vsel %vm374_vm5, %v2044_v59, 0.0  ;;  %v2332_v20 = vsel %vm254_vm2, %v2331_v10, %v2327_v6 }
0x1807   :  { %v2056_v31 = vadd.f32 %v2055_v19, %v2054_v14  ;;  %v2333_v24 = vsel %vm265_vm3, %v2332_v20, %v2323_v13  ;;  %v2051_v28 = vadd.f32 %v2050_v21, %v2049_v63 }
0x1808   :  { %2336 = vst.msk [vmem:[#allocation3 + $0x6] sm:$0x3] %vm268_vm4, %v2333_v24 }
0x1809   :  { %v2057_v40 = vrot.slane %v2056_v31, 4  ;;  %v2052_v39 = vrot.slane %v2051_v28, 1 }
0x180b   :  { %v2058_v9 = vadd.f32 %v2057_v40, %v2056_v31  ;;  %v2053_v41 = vadd.f32 %v2052_v39, %v2051_v28 }
0x180d   :  { %v2059_v35 = vrot.slane %v2058_v9, 2 }
0x180f   :  { %v2060_v37 = vadd.f32 %v2059_v35, %v2058_v9 }
0x1811   :  { %v2061_v16 = vrot.slane %v2060_v37, 1 }
0x1813   :  { %v2062_v44 = vadd.f32 %v2061_v16, %v2060_v37 }
0x1815   :  { %v2067_v46 = vsel %vm265_vm3, %v2062_v44, %v2053_v41 }
0x1816   :  { %4422 = vmatmul.mubr.msk.f32.vlgmr.msra.gmra.mrb[14].mxu0 %vm374_vm5, %v2067_v46 }
0x1817   :  { %4724 = vmatpush3.bf16.msra.mxu0 %v5148_v5  ;;  %4454 = vmatprep.mubr.msk.f32.mxu0 %vm5052_vm0, %v5053_v7 }
0x1818   :  { %4725 = vmatprep.subr.bf16.mxu0 %v5051_v4 }
0x181b   :  { %4727 = vmatpush3.bf16.msra.mxu0 %v5159_v8 }
0x181c   :  { %4740 = vmatprep.subr.bf16.mxu0 %v5051_v4 }
0x18e9   :  { %v2136_v47 = vpop.f32.mrb[14].mxu0 }
0x18ea   :  { %v2210_v34 = vadd.f32 %v5691_v48, %v2136_v47  ;;  %v4423_v26 = vpop.f32.mrb[15].mxu0 }
0x18ec   :  { %v2283_v43 = vadd.f32 %v5718_v54, %v2210_v34 }
0x18ee   :  { %v2284_v51 = vadd.f32 %v5806_v30, %v2283_v43 }
0x18f0   :  { %4919 = vtanh.f32 %v2284_v51  ;;  %v4047_v57 = vmul.f32 -1.442695, %v2284_v51 }
0x18f2   :  { %4921 = vpow2.f32 %v4047_v57 }
0x18fa   :  { %v4920_v45 = vpop.eup %4919 }
0x18fb   :  { %2294 = vrot.lane.b32.xlu1 %v4920_v45, %s5056_s21 }
0x18fc   :  { %v4922_v53 = vpop.eup %4921 }
0x18fd   :  { %v2288_v62 = vadd.f32 1.0, %v4922_v53 }
0x18ff   :  { %4923 = vrcp.f32 %v2288_v62 }
0x1909   :  { %v4924_v48 = vpop.eup %4923 }
0x190a   :  { %v2292_v54 = vmul.f32 %v4924_v48, %v5644_v42  ;;  %v4050_v42 = vld [vmem:[%s6173_s1 + $0x8] sm:$0x3] }
0x196d   :  { %v2295_v63 = vpop.permute.xlu1 %2294 }
0x196e   :  { %v2297_v1 = vmul.f32 %v4924_v48, %v2295_v63 }
0x1970   :  { %2299 = vrot.lane.b32.xlu1 %v2297_v1, %s5057_s5 }
0x19e2   :  { %v2300_v2 = vpop.permute.xlu1 %2299 }
0x19e3   :  { %v5812_v6 = vadd.f32 %v2300_v2, %v2292_v54 }
0x19e5   :  { %4925 = vtanh.f32 %v5812_v6 }
0x19ef   :  { %v4926_v59 = vpop.eup %4925 }
0x19f0   :  { %2305 = vrot.lane.b32.xlu1 %v4926_v59, %s5056_s21 }
0x1a62   :  { %v2306_v10 = vpop.permute.xlu1 %2305 }
0x1a63   :  { %v2308_v13 = vmul.f32 %v4924_v48, %v2306_v10 }
0x1a65   :  { %2310 = vrot.lane.b32.xlu0 %v2308_v13, %s5057_s5 }
0x1ad7   :  { %v2311_v14 = vpop.permute.xlu0 %2310 }
0x1ad8   :  { %4048 = vst.msk [vmem:[%s6185_s13 + $0x6] sm:$0x3] %vm652_vm6, %v2311_v14  ;;  %4455 = vmatmul.mubr.msk.f32.vlgmr.msra.gmra.mrb[16].mxu0 %vm89_vm1, %v2311_v14 }
0x1ad9   :  { %4742 = vmatpush3.bf16.msra.mxu0 %v5278_v0  ;;  %4484 = vmatprep.mubr.msk.f32.mxu0 %vm5052_vm0, %v5053_v7 }
0x1ada   :  { %4743 = vmatprep.subr.bf16.mxu0 %v5051_v4 }
0x1add   :  { %4745 = vmatpush3.bf16.msra.mxu0 %v5298_v11 }
0x1ade   :  { %4746 = vmatprep.subr.bf16.mxu0 %v5051_v4 }
0x1ae0   :  { %4485 = vmatmul.mubr.msk.f32.vlgmr.msra.gmra.mrb[18].mxu0 %vm89_vm1, %v4050_v42 }
0x1ae1   :  { %4748 = vmatpush3.bf16.msra.mxu0 %v5320_v23  ;;  %4495 = vmatprep.mubr.msk.f32.mxu0 %vm5052_vm0, %v5053_v7 }
0x1ae2   :  { %4749 = vmatprep.subr.bf16.mxu0 %v5051_v4 }
0x1ae5   :  { %4751 = vmatpush3.bf16.msra.mxu0 %v5341_v15 }
0x1ae6   :  { %4758 = vmatprep.subr.bf16.mxu0 %v5051_v4 }
0x1ae8   :  { %4496 = vmatmul.mubr.msk.f32.vlgmr.msra.gmra.mrb[20].mxu0 %vm89_vm1, %v2311_v14 }
0x1ae9   :  { %4760 = vmatpush3.bf16.msra.mxu0 %v5270_v61  ;;  %4525 = vmatprep.mubr.msk.f32.mxu0 %vm5052_vm0, %v5053_v7 }
0x1aea   :  { %4761 = vmatprep.subr.bf16.mxu0 %v5051_v4 }
0x1aed   :  { %4763 = vmatpush3.bf16.msra.mxu0 %v5289_v3 }
0x1aee   :  { %4764 = vmatprep.subr.bf16.mxu0 %v5051_v4 }
0x1af1   :  { %4766 = vmatpush3.bf16.msra.mxu0 %v5307_v18 }
0x1af2   :  { %4767 = vmatprep.subr.bf16.mxu0 %v5051_v4 }
0x1af5   :  { %4769 = vmatpush3.bf16.msra.mxu0 %v5337_v32 }
0x1af6   :  { %4782 = vmatprep.subr.bf16.mxu0 %v5051_v4 }
0x1bab   :  { %v2405_v19 = vpop.f32.mrb[16].mxu0 }
0x1bac   :  { %v2406_v20 = vadd.f32 %v5684_v38, %v2405_v19  ;;  %v4456_v21 = vpop.f32.mrb[17].mxu0 }
0x1bae   :  { %v2416_v31 = vrot.slane %v2406_v20, %v5181_v17 }
0x1bb0   :  { %v2417_v24 = vcombine.high %v2416_v31, %v2416_v31  ;;  %v2424_v40 = vrot.slane %v2416_v31, %v5181_v17 }
0x1bb2   :  { %v2431_v28 = vrot.slane %v2417_v24, %v5181_v17  ;;  %v2435_v9 = vrot.slane %v2424_v40, %v5186_v22 }
0x1bb3   :  { %v5854_v35 = vpop.f32.mrb[18].mxu0 }
0x1bb4   :  { %v2439_v39 = vrot.slane %v2431_v28, %v5186_v22  ;;  %v2442_v37 = vadd.f32 %v5697_v25, %v2435_v9  ;;  %v2443_v16 = vadd.f32 %v5703_v29, %v2435_v9  ;;  %v4486_v41 = vpop.f32.mrb[19].mxu0 }
0x1bb6   :  { %v2444_v44 = vadd.f32 %v5709_v50, %v2439_v39  ;;  %v2445_v46 = vadd.f32 %v5715_v52, %v2439_v39  ;;  %4927 = vtanh.f32 %v2442_v37 }
0x1bb7   :  { %4929 = vtanh.f32 %v2443_v16 }
0x1bb8   :  { %4931 = vtanh.f32 %v2444_v44 }
0x1bb9   :  { %4933 = vtanh.f32 %v2445_v46 }
0x1bbb   :  { %v5861_v47 = vpop.f32.mrb[20].mxu0 }
0x1bbc   :  { %v4497_v34 = vpop.f32.mrb[21].mxu0 }
0x1bc0   :  { %v4928_v26 = vpop.eup %4927 }
0x1bc1   :  { %v4930_v43 = vpop.eup %4929  ;;  %v2450_v51 = vmul.f32 %v5723_v27, %v4928_v26 }
0x1bc2   :  { %v4932_v45 = vpop.eup %4931  ;;  %v2451_v57 = vmul.f32 %v5723_v27, %v4930_v43 }
0x1bc3   :  { %v2454_v53 = vsel %vm89_vm1, %v2450_v51, 0.0  ;;  %v2452_v62 = vmul.f32 %v5723_v27, %v4932_v45  ;;  %v4934_v48 = vpop.eup %4933 }
0x1bc4   :  { %v2457_v63 = vsel %vm89_vm1, %v2451_v57, 0.0  ;;  %2455 = vadd.xlane.f32.xlu1 %v2454_v53  ;;  %v2453_v54 = vmul.f32 %v5723_v27, %v4934_v48 }
0x1bc5   :  { %2458 = vadd.xlane.f32.xlu0 %v2457_v63  ;;  %v2460_v1 = vsel %vm89_vm1, %v2452_v62, 0.0 }
0x1bc6   :  { %v2463_v2 = vsel %vm89_vm1, %v2453_v54, 0.0 }
0x1bc8   :  { %2461 = vadd.xlane.f32.xlu1 %v2460_v1 }
0x1bcc   :  { %2464 = vadd.xlane.f32.xlu1 %v2463_v2 }
0x1c51   :  { %v2456_v59 = vpop.xlane.xlu1 %2455 }
0x1c52   :  { %v2459_v10 = vpop.xlane.xlu0 %2458  ;;  %v2466_v42 = vadd.f32 %v2456_v59, %v5235_v58 }
0x1c53   :  { %v2467_v14 = vadd.f32 %v2459_v10, %v5235_v58 }
0x1c54   :  { %v2477_v31 = vrot.slane %v2466_v42, %v5230_v55 }
0x1c55   :  { %v2462_v13 = vpop.xlane.xlu1 %2461  ;;  %v2481_v21 = vrot.slane %v2467_v14, %v5233_v56 }
0x1c56   :  { %v2468_v19 = vadd.f32 %v2462_v13, %v5235_v58 }
0x1c57   :  { %v2482_v9 = vsel %vm254_vm2, %v2481_v21, %v2477_v31 }
0x1c58   :  { %v2486_v40 = vrot.slane %v2468_v19, %v5230_v55 }
0x1c59   :  { %v2465_v20 = vpop.xlane.xlu1 %2464 }
0x1c5a   :  { %v2469_v24 = vadd.f32 %v2465_v20, %v5235_v58 }
0x1c5c   :  { %v2490_v28 = vrot.slane %v2469_v24, %v5233_v56 }
0x1c5e   :  { %v2491_v39 = vsel %vm254_vm2, %v2490_v28, %v2486_v40 }
0x1c5f   :  { %v2492_v37 = vsel %vm265_vm3, %v2491_v39, %v2482_v9 }
0x1c60   :  { %v2494_v16 = vsel %vm268_vm4, %v2492_v37, -inf }
0x1c61   :  { %2495 = vmax.xlane.f32.xlu1 %v2494_v16 }
0x1cee   :  { %v2496_v41 = vpop.xlane.xlu1 %2495 }
0x1cef   :  { %v2501_v44 = vrot.slane %v2496_v41, %v5186_v22  ;;  %v2505_v46 = vrot.slane %v2496_v41, %v5250_v12 }
0x1cf1   :  { %v2508_v34 = vsub.f32 %v2466_v42, %v2501_v44  ;;  %v2509_v26 = vsub.f32 %v2467_v14, %v2501_v44  ;;  %v2510_v43 = vsub.f32 %v2468_v19, %v2505_v46  ;;  %v2511_v57 = vsub.f32 %v2469_v24, %v2505_v46 }
0x1cf3   :  { %v2512_v51 = vmul.f32 1.442695, %v2508_v34  ;;  %v2514_v45 = vmul.f32 1.442695, %v2509_v26  ;;  %v2516_v53 = vmul.f32 1.442695, %v2510_v43 }
0x1cf4   :  { %v2518_v62 = vmul.f32 1.442695, %v2511_v57 }
0x1cf5   :  { %4935 = vpow2.f32 %v2512_v51 }
0x1cf6   :  { %4937 = vpow2.f32 %v2514_v45 }
0x1cf7   :  { %4939 = vpow2.f32 %v2516_v53 }
0x1cf8   :  { %4941 = vpow2.f32 %v2518_v62 }
0x1cff   :  { %v4936_v48 = vpop.eup %4935 }
0x1d00   :  { %v4938_v63 = vpop.eup %4937  ;;  %2525 = vperm.xlu1 %4822, %v4936_v48  }
0x1d01   :  { %2528 = vperm.xlu0 %4821, %v4938_v63   ;;  %v4940_v1 = vpop.eup %4939 }
0x1d02   :  { %v4942_v54 = vpop.eup %4941 }
0x1d04   :  { %2531 = vperm.xlu1 %4822, %v4940_v1  }
0x1d08   :  { %2534 = vperm.xlu1 %4822, %v4942_v54  }
0x1d7f   :  { %v2526_v2 = vpop.permute.xlu1 %2525 }
0x1d80   :  { %v2529_v59 = vpop.permute.xlu0 %2528  ;;  %v2539_v14 = vrot.slane %v2526_v2, %v5230_v55 }
0x1d81   :  { %v2543_v13 = vrot.slane %v2529_v59, %v5233_v56 }
0x1d83   :  { %v2532_v10 = vpop.permute.xlu1 %2531  ;;  %v2544_v21 = vsel %vm254_vm2, %v2543_v13, %v2539_v14 }
0x1d84   :  { %v2548_v19 = vrot.slane %v2532_v10, %v5230_v55 }
0x1d87   :  { %v2535_v42 = vpop.permute.xlu1 %2534 }
0x1d88   :  { %v2552_v20 = vrot.slane %v2535_v42, %v5233_v56 }
0x1d8a   :  { %v2553_v31 = vsel %vm254_vm2, %v2552_v20, %v2548_v19 }
0x1d8b   :  { %v2554_v24 = vsel %vm265_vm3, %v2553_v31, %v2544_v21 }
0x1d8c   :  { %v2556_v40 = vsel %vm268_vm4, %v2554_v24, 0.0 }
0x1d8d   :  { %2557 = vadd.xlane.f32.xlu1 %v2556_v40 }
0x1e1a   :  { %v2558_v28 = vpop.xlane.xlu1 %2557 }
0x1e1b   :  { %4943 = vrcp.f32 %v2558_v28 }
0x1e25   :  { %v4944_v9 = vpop.eup %4943 }
0x1e26   :  { %v2564_v39 = vrot.slane %v4944_v9, %v5186_v22  ;;  %v2568_v41 = vrot.slane %v4944_v9, %v5250_v12 }
0x1e28   :  { %v2571_v37 = vmul.f32 %v4936_v48, %v2564_v39  ;;  %v2572_v16 = vmul.f32 %v4938_v63, %v2564_v39  ;;  %v2573_v44 = vmul.f32 %v4940_v1, %v2568_v41  ;;  %v2574_v46 = vmul.f32 %v4942_v54, %v2568_v41 }
0x1e2a   :  { %2577 = vperm.xlu0 %4821, %v2571_v37  }
0x1e2e   :  { %2582 = vperm.xlu0 %4821, %v2572_v16  }
0x1e32   :  { %2587 = vperm.xlu0 %4821, %v2573_v44  }
0x1e36   :  { %2592 = vperm.xlu0 %4821, %v2574_v46  }
0x1ea9   :  { %v2578_v34 = vpop.permute.xlu0 %2577 }
0x1eaa   :  { %v2595_v26 = vmul.f32 %v5760_v33, %v2578_v34  ;;  %v2872_v59 = vrot.slane %v2578_v34, %v5230_v55 }
0x1eac   :  { %v2599_v45 = vsel %vm374_vm5, %v2595_v26, 0.0 }
0x1ead   :  { %v2583_v43 = vpop.permute.xlu0 %2582 }
0x1eae   :  { %v2596_v51 = vmul.f32 %v5766_v49, %v2583_v43  ;;  %v2876_v63 = vrot.slane %v2583_v43, %v5233_v56 }
0x1eb0   :  { %v2600_v57 = vsel %vm374_vm5, %v2596_v51, 0.0  ;;  %v2877_v42 = vsel %vm254_vm2, %v2876_v63, %v2872_v59 }
0x1eb1   :  { %v2601_v53 = vadd.f32 %v2600_v57, %v2599_v45  ;;  %v2588_v62 = vpop.permute.xlu0 %2587 }
0x1eb2   :  { %v2597_v1 = vmul.f32 %v5775_v60, %v2588_v62  ;;  %v2881_v10 = vrot.slane %v2588_v62, %v5230_v55 }
0x1eb3   :  { %v2602_v48 = vrot.slane %v2601_v53, 4 }
0x1eb4   :  { %v2608_v19 = vsel %vm374_vm5, %v2597_v1, 0.0 }
0x1eb5   :  { %v2603_v2 = vadd.f32 %v2602_v48, %v2601_v53  ;;  %v2593_v54 = vpop.permute.xlu0 %2592 }
0x1eb6   :  { %v2598_v13 = vmul.f32 %v5783_v36, %v2593_v54  ;;  %v2885_v14 = vrot.slane %v2593_v54, %v5233_v56 }
0x1eb7   :  { %v2604_v31 = vrot.slane %v2603_v2, 2 }
0x1eb8   :  { %v2609_v20 = vsel %vm374_vm5, %v2598_v13, 0.0  ;;  %v2886_v21 = vsel %vm254_vm2, %v2885_v14, %v2881_v10 }
0x1eb9   :  { %v2610_v24 = vadd.f32 %v2609_v20, %v2608_v19  ;;  %v2887_v40 = vsel %vm265_vm3, %v2886_v21, %v2877_v42  ;;  %v2605_v9 = vadd.f32 %v2604_v31, %v2603_v2 }
0x1eba   :  { %2890 = vst.msk [vmem:[#allocation3 + $0x8] sm:$0x3] %vm268_vm4, %v2887_v40 }
0x1ebb   :  { %v2611_v28 = vrot.slane %v2610_v24, 4  ;;  %v2606_v16 = vrot.slane %v2605_v9, 1 }
0x1ebd   :  { %v2612_v39 = vadd.f32 %v2611_v28, %v2610_v24  ;;  %v2607_v46 = vadd.f32 %v2606_v16, %v2605_v9 }
0x1ebf   :  { %v2613_v37 = vrot.slane %v2612_v39, 2 }
0x1ec1   :  { %v2614_v41 = vadd.f32 %v2613_v37, %v2612_v39 }
0x1ec3   :  { %v2615_v44 = vrot.slane %v2614_v41, 1 }
0x1ec5   :  { %v2616_v34 = vadd.f32 %v2615_v44, %v2614_v41 }
0x1ec7   :  { %v2621_v26 = vsel %vm265_vm3, %v2616_v34, %v2607_v46 }
0x1ec8   :  { %4474 = vmatmul.mubr.msk.f32.vlgmr.msra.gmra.mrb[16].mxu1 %vm374_vm5, %v2621_v26 }
0x1ec9   :  { %4754 = vmatpush3.bf16.msra.mxu1 %v5148_v5  ;;  %4506 = vmatprep.mubr.msk.f32.mxu1 %vm5052_vm0, %v5053_v7 }
0x1eca   :  { %4755 = vmatprep.subr.bf16.mxu1 %v5051_v4 }
0x1ecd   :  { %4757 = vmatpush3.bf16.msra.mxu1 %v5159_v8 }
0x1ece   :  { %4770 = vmatprep.subr.bf16.mxu1 %v5051_v4 }
0x1f9b   :  { %v2690_v43 = vpop.f32.mrb[16].mxu1 }
0x1f9c   :  { %v2764_v51 = vadd.f32 %v5854_v35, %v2690_v43  ;;  %v4475_v45 = vpop.f32.mrb[17].mxu1 }
0x1f9e   :  { %v2837_v57 = vadd.f32 %v5861_v47, %v2764_v51 }
0x1fa0   :  { %v2838_v53 = vadd.f32 %v5806_v30, %v2837_v57 }
0x1fa2   :  { %4945 = vtanh.f32 %v2838_v53  ;;  %v4054_v48 = vmul.f32 -1.442695, %v2838_v53 }
0x1fa4   :  { %4947 = vpow2.f32 %v4054_v48 }
0x1fac   :  { %v4946_v62 = vpop.eup %4945 }
0x1fad   :  { %2848 = vrot.lane.b32.xlu0 %v4946_v62, %s5056_s21 }
0x1fae   :  { %v4948_v63 = vpop.eup %4947 }
0x1faf   :  { %v2842_v1 = vadd.f32 1.0, %v4948_v63 }
0x1fb1   :  { %4949 = vrcp.f32 %v2842_v1 }
0x1fbb   :  { %v4950_v2 = vpop.eup %4949 }
0x1fbc   :  { %v2846_v35 = vmul.f32 %v4950_v2, %v5812_v6  ;;  %v4057_v6 = vld [vmem:[%s6173_s1 + $0xa] sm:$0x3] }
0x201f   :  { %v2849_v54 = vpop.permute.xlu0 %2848 }
0x2020   :  { %v2851_v59 = vmul.f32 %v4950_v2, %v2849_v54 }
0x2022   :  { %2853 = vrot.lane.b32.xlu0 %v2851_v59, %s5057_s5 }
0x2094   :  { %v2854_v10 = vpop.permute.xlu0 %2853 }
0x2095   :  { %v5925_v47 = vadd.f32 %v2854_v10, %v2846_v35 }
0x2097   :  { %4951 = vtanh.f32 %v5925_v47 }
0x20a1   :  { %v4952_v13 = vpop.eup %4951 }
0x20a2   :  { %2859 = vrot.lane.b32.xlu0 %v4952_v13, %s5056_s21 }
0x2114   :  { %v2860_v14 = vpop.permute.xlu0 %2859 }
0x2115   :  { %v2862_v42 = vmul.f32 %v4950_v2, %v2860_v14 }
0x2117   :  { %2864 = vrot.lane.b32.xlu0 %v2862_v42, %s5057_s5 }
0x2189   :  { %v2865_v19 = vpop.permute.xlu0 %2864 }
0x218a   :  { %4055 = vst.msk [vmem:[%s6185_s13 + $0x8] sm:$0x3] %vm652_vm6, %v2865_v19  ;;  %4507 = vmatmul.mubr.msk.f32.vlgmr.msra.gmra.mrb[18].mxu1 %vm89_vm1, %v2865_v19 }
0x218b   :  { %4772 = vmatpush3.bf16.msra.mxu1 %v5278_v0  ;;  %4536 = vmatprep.mubr.msk.f32.mxu1 %vm5052_vm0, %v5053_v7 }
0x218c   :  { %4773 = vmatprep.subr.bf16.mxu1 %v5051_v4 }
0x218f   :  { %4775 = vmatpush3.bf16.msra.mxu1 %v5298_v11 }
0x2190   :  { %4776 = vmatprep.subr.bf16.mxu1 %v5051_v4 }
0x2192   :  { %4537 = vmatmul.mubr.msk.f32.vlgmr.msra.gmra.mrb[20].mxu1 %vm89_vm1, %v4057_v6 }
0x2193   :  { %4778 = vmatpush3.bf16.msra.mxu1 %v5320_v23  ;;  %4547 = vmatprep.mubr.msk.f32.mxu1 %vm5052_vm0, %v5053_v7 }
0x2194   :  { %4779 = vmatprep.subr.bf16.mxu1 %v5051_v4 }
0x2197   :  { %4781 = vmatpush3.bf16.msra.mxu1 %v5341_v15 }
0x2198   :  { %4788 = vmatprep.subr.bf16.mxu1 %v5051_v4 }
0x219a   :  { %4548 = vmatmul.mubr.msk.f32.vlgmr.msra.gmra.mrb[22].mxu1 %vm89_vm1, %v2865_v19 }
0x219b   :  { %4790 = vmatpush3.bf16.msra.mxu1 %v5270_v61  ;;  %4577 = vmatprep.mubr.msk.f32.mxu1 %vm5052_vm0, %v5053_v7 }
0x219c   :  { %4791 = vmatprep.subr.bf16.mxu1 %v5051_v4 }
0x219f   :  { %4793 = vmatpush3.bf16.msra.mxu1 %v5289_v3 }
0x21a0   :  { %4794 = vmatprep.subr.bf16.mxu1 %v5051_v4 }
0x21a3   :  { %4796 = vmatpush3.bf16.msra.mxu1 %v5307_v18 }
0x21a4   :  { %4797 = vmatprep.subr.bf16.mxu1 %v5051_v4 }
0x21a7   :  { %4799 = vmatpush3.bf16.msra.mxu1 %v5337_v32 }
0x225d   :  { %v2959_v20 = vpop.f32.mrb[18].mxu1 }
0x225e   :  { %v2960_v21 = vadd.f32 %v5684_v38, %v2959_v20  ;;  %v4508_v31 = vpop.f32.mrb[19].mxu1 }
0x2260   :  { %v2970_v61 = vrot.slane %v2960_v21, %v5181_v17 }
0x2262   :  { %v2971_v24 = vcombine.high %v2970_v61, %v2970_v61  ;;  %v2978_v40 = vrot.slane %v2970_v61, %v5181_v17 }
0x2264   :  { %v2985_v28 = vrot.slane %v2971_v24, %v5181_v17  ;;  %v2989_v3 = vrot.slane %v2978_v40, %v5186_v22 }
0x2265   :  { %v5966_v9 = vpop.f32.mrb[20].mxu1 }
0x2266   :  { %v2993_v18 = vrot.slane %v2985_v28, %v5186_v22  ;;  %v2996_v39 = vadd.f32 %v5697_v25, %v2989_v3  ;;  %v2997_v32 = vadd.f32 %v5703_v29, %v2989_v3  ;;  %v4538_v37 = vpop.f32.mrb[21].mxu1 }
0x2268   :  { %v2998_v38 = vadd.f32 %v5709_v50, %v2993_v18  ;;  %4953 = vtanh.f32 %v2996_v39  ;;  %v2999_v16 = vadd.f32 %v5715_v52, %v2993_v18 }
0x2269   :  { %4955 = vtanh.f32 %v2997_v32 }
0x226a   :  { %4957 = vtanh.f32 %v2998_v38 }
0x226b   :  { %4959 = vtanh.f32 %v2999_v16 }
0x226d   :  { %v5973_v41 = vpop.f32.mrb[22].mxu1 }
0x226e   :  { %v4549_v44 = vpop.f32.mrb[23].mxu1 }
0x2272   :  { %v4954_v46 = vpop.eup %4953 }
0x2273   :  { %v4956_v34 = vpop.eup %4955  ;;  %v3004_v26 = vmul.f32 %v5723_v27, %v4954_v46 }
0x2274   :  { %v4958_v43 = vpop.eup %4957  ;;  %v3005_v25 = vmul.f32 %v5723_v27, %v4956_v34 }
0x2275   :  { %v3008_v29 = vsel %vm89_vm1, %v3004_v26, 0.0  ;;  %v3006_v52 = vmul.f32 %v5723_v27, %v4958_v43  ;;  %v4960_v51 = vpop.eup %4959 }
0x2276   :  { %v3011_v50 = vsel %vm89_vm1, %v3005_v25, 0.0  ;;  %3009 = vadd.xlane.f32.xlu0 %v3008_v29  ;;  %v3007_v57 = vmul.f32 %v5723_v27, %v4960_v51 }
0x2277   :  { %3012 = vadd.xlane.f32.xlu1 %v3011_v50  ;;  %v3014_v45 = vsel %vm89_vm1, %v3006_v52, 0.0 }
0x2278   :  { %v3017_v53 = vsel %vm89_vm1, %v3007_v57, 0.0 }
0x227b   :  { %3015 = vadd.xlane.f32.xlu1 %v3014_v45 }
0x227f   :  { %3018 = vadd.xlane.f32.xlu1 %v3017_v53 }
0x2303   :  { %v3010_v48 = vpop.xlane.xlu0 %3009 }
0x2304   :  { %v3013_v62 = vpop.xlane.xlu1 %3012  ;;  %v3020_v2 = vadd.f32 %v3010_v48, %v5235_v58 }
0x2305   :  { %v3021_v1 = vadd.f32 %v3013_v62, %v5235_v58 }
0x2306   :  { %v3031_v10 = vrot.slane %v3020_v2, %v5230_v55 }
0x2307   :  { %v3035_v35 = vrot.slane %v3021_v1, %v5233_v56 }
0x2308   :  { %v3016_v63 = vpop.xlane.xlu1 %3015 }
0x2309   :  { %v3022_v54 = vadd.f32 %v3016_v63, %v5235_v58  ;;  %v3036_v42 = vsel %vm254_vm2, %v3035_v35, %v3031_v10 }
0x230b   :  { %v3040_v13 = vrot.slane %v3022_v54, %v5230_v55 }
0x230c   :  { %v3019_v59 = vpop.xlane.xlu1 %3018 }
0x230d   :  { %v3023_v27 = vadd.f32 %v3019_v59, %v5235_v58 }
0x230f   :  { %v3044_v14 = vrot.slane %v3023_v27, %v5233_v56 }
0x2311   :  { %v3045_v19 = vsel %vm254_vm2, %v3044_v14, %v3040_v13 }
0x2312   :  { %v3046_v6 = vsel %vm265_vm3, %v3045_v19, %v3036_v42 }
0x2313   :  { %v3048_v20 = vsel %vm268_vm4, %v3046_v6, -inf }
0x2314   :  { %3049 = vmax.xlane.f32.xlu1 %v3048_v20 }
0x23a1   :  { %v3050_v21 = vpop.xlane.xlu1 %3049 }
0x23a2   :  { %v3055_v31 = vrot.slane %v3050_v21, %v5186_v22  ;;  %v3059_v61 = vrot.slane %v3050_v21, %v5250_v12 }
0x23a4   :  { %v3062_v24 = vsub.f32 %v3020_v2, %v3055_v31  ;;  %v3063_v40 = vsub.f32 %v3021_v1, %v3055_v31  ;;  %v3064_v28 = vsub.f32 %v3022_v54, %v3059_v61  ;;  %v3065_v39 = vsub.f32 %v3023_v27, %v3059_v61 }
0x23a6   :  { %v3066_v3 = vmul.f32 1.442695, %v3062_v24  ;;  %v3068_v18 = vmul.f32 1.442695, %v3063_v40  ;;  %v3070_v32 = vmul.f32 1.442695, %v3064_v28 }
0x23a7   :  { %v3072_v37 = vmul.f32 1.442695, %v3065_v39 }
0x23a8   :  { %4961 = vpow2.f32 %v3066_v3 }
0x23a9   :  { %4963 = vpow2.f32 %v3068_v18 }
0x23aa   :  { %4965 = vpow2.f32 %v3070_v32 }
0x23ab   :  { %4967 = vpow2.f32 %v3072_v37 }
0x23b2   :  { %v4962_v38 = vpop.eup %4961 }
0x23b3   :  { %v4964_v16 = vpop.eup %4963  ;;  %3079 = vperm.xlu1 %4822, %v4962_v38  }
0x23b4   :  { %3082 = vperm.xlu0 %4821, %v4964_v16   ;;  %v4966_v44 = vpop.eup %4965 }
0x23b5   :  { %v4968_v46 = vpop.eup %4967 }
0x23b7   :  { %3085 = vperm.xlu1 %4822, %v4966_v44  }
0x23bb   :  { %3088 = vperm.xlu1 %4822, %v4968_v46  }
0x2432   :  { %v3080_v34 = vpop.permute.xlu1 %3079 }
0x2433   :  { %v3083_v26 = vpop.permute.xlu0 %3082  ;;  %v3093_v29 = vrot.slane %v3080_v34, %v5230_v55 }
0x2434   :  { %v3097_v25 = vrot.slane %v3083_v26, %v5233_v56 }
0x2436   :  { %v3086_v43 = vpop.permute.xlu1 %3085  ;;  %v3098_v45 = vsel %vm254_vm2, %v3097_v25, %v3093_v29 }
0x2437   :  { %v3102_v52 = vrot.slane %v3086_v43, %v5230_v55 }
0x243a   :  { %v3089_v50 = vpop.permute.xlu1 %3088 }
0x243b   :  { %v3106_v51 = vrot.slane %v3089_v50, %v5233_v56 }
0x243d   :  { %v3107_v57 = vsel %vm254_vm2, %v3106_v51, %v3102_v52 }
0x243e   :  { %v3108_v53 = vsel %vm265_vm3, %v3107_v57, %v3098_v45 }
0x243f   :  { %v3110_v62 = vsel %vm268_vm4, %v3108_v53, 0.0 }
0x2440   :  { %3111 = vadd.xlane.f32.xlu1 %v3110_v62 }
0x24cd   :  { %v3112_v48 = vpop.xlane.xlu1 %3111 }
0x24ce   :  { %4969 = vrcp.f32 %v3112_v48 }
0x24d8   :  { %v4970_v63 = vpop.eup %4969 }
0x24d9   :  { %v3118_v1 = vrot.slane %v4970_v63, %v5186_v22  ;;  %v3122_v59 = vrot.slane %v4970_v63, %v5250_v12 }
0x24db   :  { %v3125_v2 = vmul.f32 %v4962_v38, %v3118_v1  ;;  %v3126_v54 = vmul.f32 %v4964_v16, %v3118_v1  ;;  %v3127_v35 = vmul.f32 %v4966_v44, %v3122_v59  ;;  %v3128_v10 = vmul.f32 %v4968_v46, %v3122_v59 }
0x24dd   :  { %3131 = vperm.xlu0 %4821, %v3125_v2  }
0x24e1   :  { %3136 = vperm.xlu0 %4821, %v3126_v54  }
0x24e5   :  { %3141 = vperm.xlu0 %4821, %v3127_v35  }
0x24e9   :  { %3146 = vperm.xlu0 %4821, %v3128_v10  }
0x255c   :  { %v3132_v27 = vpop.permute.xlu0 %3131 }
0x255d   :  { %v3149_v13 = vmul.f32 %v5760_v33, %v3132_v27  ;;  %v3426_v3 = vrot.slane %v3132_v27, %v5230_v55 }
0x255f   :  { %v3153_v19 = vsel %vm374_vm5, %v3149_v13, 0.0 }
0x2560   :  { %v3137_v14 = vpop.permute.xlu0 %3136 }
0x2561   :  { %v3150_v42 = vmul.f32 %v5766_v49, %v3137_v14  ;;  %v3430_v61 = vrot.slane %v3137_v14, %v5233_v56 }
0x2563   :  { %v3154_v6 = vsel %vm374_vm5, %v3150_v42, 0.0  ;;  %v3431_v39 = vsel %vm254_vm2, %v3430_v61, %v3426_v3  ;;  %v5018_v61 = vld [vmem:[%s6176_s4 + $0x8] sm:$0xff]  ;;  %v5020_v3 = vld [vmem:[%s6176_s4 + $0x18] sm:$0xff] }
0x2564   :  { %v3155_v20 = vadd.f32 %v3154_v6, %v3153_v19  ;;  %v3142_v21 = vpop.permute.xlu0 %3141 }
0x2565   :  { %v3151_v24 = vmul.f32 %v5775_v60, %v3142_v21  ;;  %v3435_v33 = vrot.slane %v3142_v21, %v5230_v55  ;;  %v5017_v21 = vld [vmem:[%s6176_s4] sm:$0xff] }
0x2566   :  { %v3156_v31 = vrot.slane %v3155_v20, 4 }
0x2567   :  { %v3162_v32 = vsel %vm374_vm5, %v3151_v24, 0.0 }
0x2568   :  { %v3157_v40 = vadd.f32 %v3156_v31, %v3155_v20  ;;  %v3147_v28 = vpop.permute.xlu0 %3146 }
0x2569   :  { %v3152_v18 = vmul.f32 %v5783_v36, %v3147_v28  ;;  %v3439_v49 = vrot.slane %v3147_v28, %v5233_v56 }
0x256a   :  { %v3158_v16 = vrot.slane %v3157_v40, 2 }
0x256b   :  { %v3163_v37 = vsel %vm374_vm5, %v3152_v18, 0.0  ;;  %v3440_v38 = vsel %vm254_vm2, %v3439_v49, %v3435_v33 }
0x256c   :  { %v3164_v60 = vadd.f32 %v3163_v37, %v3162_v32  ;;  %v3441_v44 = vsel %vm265_vm3, %v3440_v38, %v3431_v39  ;;  %v3159_v34 = vadd.f32 %v3158_v16, %v3157_v40  ;;  %v5021_v37 = vld [vmem:[%s6179_s7] ss:$0 sm:$0xff] }
0x256d   :  { %3444 = vst.msk [vmem:[#allocation3 + $0xa] sm:$0x3] %vm268_vm4, %v3441_v44 }
0x256e   :  { %v3165_v46 = vrot.slane %v3164_v60, 4  ;;  %v3160_v43 = vrot.slane %v3159_v34, 1 }
0x2570   :  { %v3166_v26 = vadd.f32 %v3165_v46, %v3164_v60  ;;  %v3161_v50 = vadd.f32 %v3160_v43, %v3159_v34 }
0x2572   :  { %v3167_v36 = vrot.slane %v3166_v26, 2 }
0x2574   :  { %v3168_v25 = vadd.f32 %v3167_v36, %v3166_v26 }
0x2576   :  { %v3169_v29 = vrot.slane %v3168_v25, 1 }
0x2578   :  { %v3170_v52 = vadd.f32 %v3169_v29, %v3168_v25 }
0x257a   :  { %v3175_v51 = vsel %vm265_vm3, %v3170_v52, %v3161_v50 }
0x257b   :  { %4526 = vmatmul.mubr.msk.f32.vlgmr.msra.gmra.mrb[22].mxu0 %vm374_vm5, %v3175_v51 }
0x257c   :  { %4784 = vmatpush3.bf16.msra.mxu0 %v5148_v5  ;;  %4558 = vmatprep.mubr.msk.f32.mxu0 %vm5052_vm0, %v5053_v7 }
0x257d   :  { %4785 = vmatprep.subr.bf16.mxu0 %v5051_v4 }
0x2580   :  { %4787 = vmatpush3.bf16.msra.mxu0 %v5159_v8 }
0x2581   :  { %4800 = vmatprep.subr.bf16.mxu0 %v5051_v4 }
0x264e   :  { %v3244_v45 = vpop.f32.mrb[22].mxu0 }
0x264f   :  { %v3318_v57 = vadd.f32 %v5966_v9, %v3244_v45  ;;  %v4527_v53 = vpop.f32.mrb[23].mxu0 }
0x2651   :  { %v3391_v62 = vadd.f32 %v5973_v41, %v3318_v57 }
0x2653   :  { %v3392_v48 = vadd.f32 %v5806_v30, %v3391_v62 }
0x2655   :  { %4971 = vtanh.f32 %v3392_v48  ;;  %v4061_v5 = vmul.f32 -1.442695, %v3392_v48 }
0x2657   :  { %4973 = vpow2.f32 %v4061_v5 }
0x265f   :  { %v4972_v63 = vpop.eup %4971 }
0x2660   :  { %3402 = vrot.lane.b32.xlu0 %v4972_v63, %s5056_s21 }
0x2661   :  { %v4974_v1 = vpop.eup %4973 }
0x2662   :  { %v3396_v2 = vadd.f32 1.0, %v4974_v1 }
0x2664   :  { %4975 = vrcp.f32 %v3396_v2 }
0x266e   :  { %v4976_v8 = vpop.eup %4975 }
0x266f   :  { %v3400_v9 = vmul.f32 %v4976_v8, %v5925_v47  ;;  %v4064_v47 = vld [vmem:[%s6173_s1 + $0xc] sm:$0x3] }
0x26d2   :  { %v3403_v54 = vpop.permute.xlu0 %3402 }
0x26d3   :  { %v3405_v59 = vmul.f32 %v4976_v8, %v3403_v54 }
0x26d5   :  { %3407 = vrot.lane.b32.xlu0 %v3405_v59, %s5057_s5 }
0x2747   :  { %v3408_v35 = vpop.permute.xlu0 %3407 }
0x2748   :  { %v6037_v41 = vadd.f32 %v3408_v35, %v3400_v9 }
0x274a   :  { %4977 = vtanh.f32 %v6037_v41 }
0x2754   :  { %v4978_v30 = vpop.eup %4977 }
0x2755   :  { %3413 = vrot.lane.b32.xlu0 %v4978_v30, %s5056_s21 }
0x27c7   :  { %v3414_v10 = vpop.permute.xlu0 %3413 }
0x27c8   :  { %v3416_v27 = vmul.f32 %v4976_v8, %v3414_v10 }
0x27ca   :  { %3418 = vrot.lane.b32.xlu1 %v3416_v27, %s5057_s5 }
0x283c   :  { %v3419_v13 = vpop.permute.xlu1 %3418 }
0x283d   :  { %4062 = vst.msk [vmem:[%s6185_s13 + $0xa] sm:$0x3] %vm652_vm6, %v3419_v13  ;;  %4559 = vmatmul.mubr.msk.f32.vlgmr.msra.gmra.mrb[24].mxu0 %vm89_vm1, %v3419_v13 }
0x283e   :  { %4802 = vmatpush3.bf16.msra.mxu0 %v5278_v0  ;;  %4588 = vmatprep.mubr.msk.f32.mxu0 %vm5052_vm0, %v5053_v7 }
0x283f   :  { %4803 = vmatprep.subr.bf16.mxu0 %v5051_v4 }
0x2842   :  { %4805 = vmatpush3.bf16.msra.mxu0 %v5298_v11  ;;  %v5016_v11 = vld [vmem:[%s6178_s6] ss:$0 sm:$0xff] }
0x2843   :  { %4806 = vmatprep.subr.bf16.mxu0 %v5051_v4 }
0x2845   :  { %4589 = vmatmul.mubr.msk.f32.vlgmr.msra.gmra.mrb[26].mxu0 %vm89_vm1, %v4064_v47 }
0x2846   :  { %4808 = vmatpush3.bf16.msra.mxu0 %v5320_v23  ;;  %4599 = vmatprep.mubr.msk.f32.mxu0 %vm5052_vm0, %v5053_v7 }
0x2847   :  { %4809 = vmatprep.subr.bf16.mxu0 %v5051_v4 }
0x284a   :  { %4811 = vmatpush3.bf16.msra.mxu0 %v5341_v15 }
0x284d   :  { %4600 = vmatmul.mubr.msk.f32.vlgmr.msra.gmra.mrb[28].mxu0 %vm89_vm1, %v3419_v13 }
0x2910   :  { %v3513_v0 = vpop.f32.mrb[24].mxu0 }
0x2911   :  { %v3514_v14 = vadd.f32 %v5016_v11, %v3513_v0  ;;  %v4560_v42 = vpop.f32.mrb[25].mxu0 }
0x2913   :  { %v3524_v19 = vrot.slane %v3514_v14, %v5181_v17 }
0x2915   :  { %v3525_v6 = vcombine.high %v3524_v19, %v3524_v19  ;;  %v3532_v23 = vrot.slane %v3524_v19, %v5181_v17 }
0x2917   :  { %v3539_v7 = vrot.slane %v3525_v6, %v5181_v17  ;;  %v3543_v4 = vrot.slane %v3532_v23, %v5186_v22  ;;  %v5019_v17 = vld [vmem:[%s6176_s4 + $0x10] sm:$0xff] }
0x2918   :  { %v6070_v20 = vpop.f32.mrb[26].mxu0 }
0x2919   :  { %v3547_v15 = vrot.slane %v3539_v7, %v5186_v22  ;;  %v3550_v31 = vadd.f32 %v5017_v21, %v3543_v4  ;;  %v3551_v24 = vadd.f32 %v5018_v61, %v3543_v4  ;;  %v4590_v40 = vpop.f32.mrb[27].mxu0 }
0x291b   :  { %v3552_v28 = vadd.f32 %v5019_v17, %v3547_v15  ;;  %v3553_v33 = vadd.f32 %v5020_v3, %v3547_v15  ;;  %4979 = vtanh.f32 %v3550_v31 }
0x291c   :  { %4981 = vtanh.f32 %v3551_v24 }
0x291d   :  { %4983 = vtanh.f32 %v3552_v28 }
0x291e   :  { %4985 = vtanh.f32 %v3553_v33 }
0x2920   :  { %v6085_v18 = vpop.f32.mrb[28].mxu0 }
0x2921   :  { %v4601_v49 = vpop.f32.mrb[29].mxu0 }
0x2925   :  { %v4980_v39 = vpop.eup %4979 }
0x2926   :  { %v4982_v32 = vpop.eup %4981  ;;  %v3558_v38 = vmul.f32 %v5021_v37, %v4980_v39 }
0x2927   :  { %v4984_v16 = vpop.eup %4983  ;;  %v3559_v60 = vmul.f32 %v5021_v37, %v4982_v32 }
0x2928   :  { %v3562_v44 = vsel %vm89_vm1, %v3558_v38, 0.0  ;;  %v3560_v46 = vmul.f32 %v5021_v37, %v4984_v16  ;;  %v4986_v34 = vpop.eup %4985 }
0x2929   :  { %v3565_v26 = vsel %vm89_vm1, %v3559_v60, 0.0  ;;  %3563 = vadd.xlane.f32.xlu0 %v3562_v44  ;;  %v3561_v43 = vmul.f32 %v5021_v37, %v4986_v34  ;;  %v5022_v34 = vld [vmem:[%s6172_s0] sm:$0xff] }
0x292a   :  { %3566 = vadd.xlane.f32.xlu1 %v3565_v26  ;;  %v3568_v36 = vsel %vm89_vm1, %v3560_v46, 0.0 }
0x292b   :  { %v3571_v25 = vsel %vm89_vm1, %v3561_v43, 0.0 }
0x292d   :  { %3569 = vadd.xlane.f32.xlu0 %v3568_v36 }
0x2931   :  { %3572 = vadd.xlane.f32.xlu0 %v3571_v25 }
0x29b6   :  { %v3564_v29 = vpop.xlane.xlu0 %3563 }
0x29b7   :  { %v3567_v50 = vpop.xlane.xlu1 %3566  ;;  %v3574_v45 = vadd.f32 %v3564_v29, %v5235_v58 }
0x29b8   :  { %v3575_v51 = vadd.f32 %v3567_v50, %v5235_v58 }
0x29b9   :  { %v3585_v48 = vrot.slane %v3574_v45, %v5230_v55 }
0x29ba   :  { %v3570_v52 = vpop.xlane.xlu0 %3569  ;;  %v3589_v62 = vrot.slane %v3575_v51, %v5233_v56 }
0x29bb   :  { %v3576_v57 = vadd.f32 %v3570_v52, %v5235_v58 }
0x29bc   :  { %v3590_v2 = vsel %vm254_vm2, %v3589_v62, %v3585_v48 }
0x29bd   :  { %v3594_v5 = vrot.slane %v3576_v57, %v5230_v55 }
0x29be   :  { %v3573_v53 = vpop.xlane.xlu0 %3572 }
0x29bf   :  { %v3577_v63 = vadd.f32 %v3573_v53, %v5235_v58 }
0x29c1   :  { %v3598_v1 = vrot.slane %v3577_v63, %v5233_v56 }
0x29c3   :  { %v3599_v8 = vsel %vm254_vm2, %v3598_v1, %v3594_v5  ;;  %v5025_v5 = vld [vmem:[%s6172_s0 + $0x18] sm:$0xff] }
0x29c4   :  { %v3600_v54 = vsel %vm265_vm3, %v3599_v8, %v3590_v2 }
0x29c5   :  { %v3602_v59 = vsel %vm268_vm4, %v3600_v54, -inf }
0x29c6   :  { %3603 = vmax.xlane.f32.xlu0 %v3602_v59 }
0x2a53   :  { %v3604_v9 = vpop.xlane.xlu0 %3603 }
0x2a54   :  { %v3609_v35 = vrot.slane %v3604_v9, %v5186_v22  ;;  %v3613_v30 = vrot.slane %v3604_v9, %v5250_v12 }
0x2a56   :  { %v3616_v10 = vsub.f32 %v3574_v45, %v3609_v35  ;;  %v3617_v58 = vsub.f32 %v3575_v51, %v3609_v35  ;;  %v3618_v27 = vsub.f32 %v3576_v57, %v3613_v30  ;;  %v3619_v13 = vsub.f32 %v3577_v63, %v3613_v30  ;;  %v5024_v45 = vld [vmem:[%s6172_s0 + $0x10] sm:$0xff] }
0x2a58   :  { %v3620_v47 = vmul.f32 1.442695, %v3616_v10  ;;  %v3622_v0 = vmul.f32 1.442695, %v3617_v58  ;;  %v3624_v11 = vmul.f32 1.442695, %v3618_v27 }
0x2a59   :  { %v3626_v14 = vmul.f32 1.442695, %v3619_v13 }
0x2a5a   :  { %4987 = vpow2.f32 %v3620_v47 }
0x2a5b   :  { %4989 = vpow2.f32 %v3622_v0 }
0x2a5c   :  { %4991 = vpow2.f32 %v3624_v11 }
0x2a5d   :  { %4993 = vpow2.f32 %v3626_v14 }
0x2a64   :  { %v4988_v42 = vpop.eup %4987 }
0x2a65   :  { %v4990_v19 = vpop.eup %4989  ;;  %3633 = vperm.xlu0 %4821, %v4988_v42  }
0x2a66   :  { %3636 = vperm.xlu1 %4822, %v4990_v19   ;;  %v4992_v6 = vpop.eup %4991 }
0x2a67   :  { %v4994_v23 = vpop.eup %4993 }
0x2a69   :  { %3639 = vperm.xlu0 %4821, %v4992_v6  }
0x2a6a   :  { %3642 = vperm.xlu1 %4822, %v4994_v23  }
0x2ae4   :  { %v3634_v7 = vpop.permute.xlu0 %3633 }
0x2ae5   :  { %v3637_v4 = vpop.permute.xlu1 %3636  ;;  %v3647_v21 = vrot.slane %v3634_v7, %v5230_v55 }
0x2ae6   :  { %v3651_v15 = vrot.slane %v3637_v4, %v5233_v56  ;;  %v5026_v4 = vld [vmem:[%s6184_s12] ss:$0 sm:$0xff]  ;;  %s5058_s12 = smov [#allocation3]  }
0x2ae7   :  { %s4006_s3 = sshll.u32 %s5058_s12, 4  ;;  %s4007_s3 = int_to_ptr.vmem [resolvable:$true] %s4006_s3 }
0x2ae8   :  { %v3640_v31 = vpop.permute.xlu0 %3639  ;;  %v3652_v17 = vsel %vm254_vm2, %v3651_v15, %v3647_v21  ;;  %s5027_s22 = scalar_lea.vmem %s4007_s3, 224  ;;  %p5032_p1 = scmp.lt.s32.totalorder %s4007_s3, %s4007_s3 }
0x2ae9   :  { %v3643_v61 = vpop.permute.xlu1 %3642  ;;  %v3656_v24 = vrot.slane %v3640_v31, %v5230_v55  ;;  %p5028_p0 = scmp.ne.s32.totalorder %s4007_s3, %s5027_s22  ;;  %p5033_p2 = scmp.lt.s32.totalorder %s5027_s22, %s5027_s22 }
0x2aea   :  { %v3660_v40 = vrot.slane %v3643_v61, %v5233_v56 }
0x2aeb   :  { %p5034_p3 = por %p5033_p2, %p5032_p1 }
0x2aec   :  { %v3661_v28 = vsel %vm254_vm2, %v3660_v40, %v3656_v24 }
0x2aed   :  { %v3662_v3 = vsel %vm265_vm3, %v3661_v28, %v3652_v17  ;;  %p5035_p4 = pnand %p5034_p3, %p5028_p0 }
0x2aee   :  { %v3664_v33 = vsel %vm268_vm4, %v3662_v3, 0.0 }
0x2aef   :  { %3665 = vadd.xlane.f32.xlu0 %v3664_v33 }
0x2b7c   :  { %v3666_v49 = vpop.xlane.xlu0 %3665 }
0x2b7d   :  { %4995 = vrcp.f32 %v3666_v49 }
0x2b87   :  { %v4996_v39 = vpop.eup %4995 }
0x2b88   :  { %v3672_v32 = vrot.slane %v4996_v39, %v5186_v22  ;;  %v3676_v16 = vrot.slane %v4996_v39, %v5250_v12  ;;  %v5023_v22 = vld [vmem:[%s6172_s0 + $0x8] sm:$0xff] }
0x2b8a   :  { %v3679_v37 = vmul.f32 %v4988_v42, %v3672_v32  ;;  %v3680_v38 = vmul.f32 %v4990_v19, %v3672_v32  ;;  %v3681_v60 = vmul.f32 %v4992_v6, %v3676_v16  ;;  %v3682_v44 = vmul.f32 %v4994_v23, %v3676_v16 }
0x2b8c   :  { %3685 = vperm.xlu1 %4822, %v3679_v37  }
0x2b90   :  { %3690 = vperm.xlu1 %4822, %v3680_v38  }
0x2b94   :  { %3695 = vperm.xlu1 %4822, %v3681_v60  }
0x2b98   :  { %3700 = vperm.xlu1 %4822, %v3682_v44  }
0x2c0b   :  { %v3686_v46 = vpop.permute.xlu1 %3685 }
0x2c0c   :  { %v3703_v26 = vmul.f32 %v5022_v34, %v3686_v46  ;;  %v3980_v48 = vrot.slane %v3686_v46, %v5230_v55 }
0x2c0e   :  { %v3707_v25 = vsel %vm374_vm5, %v3703_v26, 0.0 }
0x2c0f   :  { %v3691_v36 = vpop.permute.xlu1 %3690 }
0x2c10   :  { %v3704_v43 = vmul.f32 %v5023_v22, %v3691_v36  ;;  %v3984_v51 = vrot.slane %v3691_v36, %v5233_v56 }
0x2c12   :  { %v3708_v12 = vsel %vm374_vm5, %v3704_v43, 0.0  ;;  %v3985_v8 = vsel %vm254_vm2, %v3984_v51, %v3980_v48 }
0x2c13   :  { %v3709_v29 = vadd.f32 %v3708_v12, %v3707_v25  ;;  %v3696_v50 = vpop.permute.xlu1 %3695 }
0x2c14   :  { %v3705_v57 = vmul.f32 %v5024_v45, %v3696_v50  ;;  %v3989_v63 = vrot.slane %v3696_v50, %v5230_v55 }
0x2c15   :  { %v3710_v52 = vrot.slane %v3709_v29, 4 }
0x2c16   :  { %v3716_v54 = vsel %vm374_vm5, %v3705_v57, 0.0 }
0x2c17   :  { %v3711_v53 = vadd.f32 %v3710_v52, %v3709_v29  ;;  %v3701_v62 = vpop.permute.xlu1 %3700 }
0x2c18   :  { %v3706_v1 = vmul.f32 %v5025_v5, %v3701_v62  ;;  %v3993_v2 = vrot.slane %v3701_v62, %v5233_v56 }
0x2c19   :  { %v3712_v35 = vrot.slane %v3711_v53, 2 }
0x2c1a   :  { %v3717_v59 = vsel %vm374_vm5, %v3706_v1, 0.0  ;;  %v3994_v9 = vsel %vm254_vm2, %v3993_v2, %v3989_v63 }
0x2c1b   :  { %v3718_v30 = vadd.f32 %v3717_v59, %v3716_v54  ;;  %v3995_v10 = vsel %vm265_vm3, %v3994_v9, %v3985_v8  ;;  %v3713_v58 = vadd.f32 %v3712_v35, %v3711_v53 }
0x2c1c   :  { %3998 = vst.msk [vmem:[#allocation3 + $0xc] sm:$0x3] %vm268_vm4, %v3995_v10 }
0x2c1d   :  { %v3719_v55 = vrot.slane %v3718_v30, 4  ;;  %v3714_v47 = vrot.slane %v3713_v58, 1 }
0x2c1f   :  { %v3720_v27 = vadd.f32 %v3719_v55, %v3718_v30  ;;  %v3715_v11 = vadd.f32 %v3714_v47, %v3713_v58 }
0x2c21   :  { %v3721_v13 = vrot.slane %v3720_v27, 2 }
0x2c23   :  { %v3722_v56 = vadd.f32 %v3721_v13, %v3720_v27 }
0x2c25   :  { %v3723_v0 = vrot.slane %v3722_v56, 1 }
0x2c27   :  { %v3724_v14 = vadd.f32 %v3723_v0, %v3722_v56 }
0x2c29   :  { %v3729_v42 = vsel %vm265_vm3, %v3724_v14, %v3715_v11 }
0x2c2a   :  { %4578 = vmatmul.mubr.msk.f32.vlgmr.msra.gmra.mrb[24].mxu1 %vm374_vm5, %v3729_v42 }
0x2cfd   :  { %v3798_v19 = vpop.f32.mrb[24].mxu1 }
0x2cfe   :  { %v3872_v6 = vadd.f32 %v6070_v20, %v3798_v19  ;;  %v4579_v23 = vpop.f32.mrb[25].mxu1 }
0x2d00   :  { %v3945_v7 = vadd.f32 %v6085_v18, %v3872_v6 }
0x2d02   :  { %v3946_v15 = vadd.f32 %v5026_v4, %v3945_v7 }
0x2d04   :  { %4997 = vtanh.f32 %v3946_v15  ;;  %v4068_v31 = vmul.f32 -1.442695, %v3946_v15 }
0x2d06   :  { %4999 = vpow2.f32 %v4068_v31 }
0x2d0e   :  { %v4998_v21 = vpop.eup %4997 }
0x2d0f   :  { %3956 = vrot.lane.b32.xlu1 %v4998_v21, %s5056_s21 }
0x2d10   :  { %v5000_v61 = vpop.eup %4999 }
0x2d11   :  { %v3950_v24 = vadd.f32 1.0, %v5000_v61 }
0x2d13   :  { %5001 = vrcp.f32 %v3950_v24 }
0x2d1d   :  { %v5002_v40 = vpop.eup %5001 }
0x2d1e   :  { %v3954_v18 = vmul.f32 %v5002_v40, %v6037_v41 }
0x2d81   :  { %v3957_v17 = vpop.permute.xlu1 %3956 }
0x2d82   :  { %v3959_v20 = vmul.f32 %v5002_v40, %v3957_v17 }
0x2d84   :  { %3961 = vrot.lane.b32.xlu1 %v3959_v20, %s5057_s5 }
0x2df6   :  { %v3962_v28 = vpop.permute.xlu1 %3961 }
0x2df7   :  { %v3964_v3 = vadd.f32 %v3962_v28, %v3954_v18 }
0x2df9   :  { %5003 = vtanh.f32 %v3964_v3 }
0x2e03   :  { %v5004_v33 = vpop.eup %5003 }
0x2e04   :  { %3967 = vrot.lane.b32.xlu1 %v5004_v33, %s5056_s21 }
0x2e05   :  { %5038 = shalt.err (!%p5035_p4)
}
0x2e06   :  { %s5039_s24 = scalar_lea.hbm %s6186_s14, 224 }
0x2e07   :  { %p5040_p5 = scmp.ne.s32.totalorder %s6186_s14, %s5039_s24  ;;  %p5043_p6 = scmp.lt.u32.totalorder %s5039_s24, %s6186_s14 }
0x2e09   :  { %p5045_p7 = pnand %p5043_p6, %p5040_p5 }
0x2e0b   :  { %5048 = shalt.err (!%p5045_p7)
}
0x2e0c   :  { %s5059_s6 = smov 2  }
0x2e0d   :  { %4012 = dma.vmem_to_hbm [thread:$0]  %s4007_s3, 224, %s6186_s14, [#allocation4], %s5057_s5, %s5057_s5, %s5059_s6  }
0x2e76   :  { %v3968_v41 = vpop.permute.xlu1 %3967 }
0x2e77   :  { %v3970_v49 = vmul.f32 %v5002_v40, %v3968_v41 }
0x2e79   :  { %3972 = vrot.lane.b32.xlu0 %v3970_v49, %s5057_s5 }
0x2eeb   :  { %v3973_v39 = vpop.permute.xlu0 %3972 }
0x2eec   :  { %4069 = vst.msk [vmem:[%s6185_s13 + $0xc] sm:$0x3] %vm652_vm6, %v3973_v39 }
0x2eed   :  { %5049 = dma.done.wait [#allocation4], 224  }
0x2eee   :  { %5050 = vsyncadd [#allocation4], 4294967072 }
0x2eef   :  { %4018 = vsyncpa [#allocation4], 1 }

</bundles_post_ra>
